<compile_context>
chip_gen: v6e
topology: v6e:2x2x1
jax: 0.10.0
libtpu: 0.0.40
codegen_flags: <defaults>
</compile_context>

<pallas_src>
import numpy as np
import jax
import jax.numpy as jnp
from jax.experimental import pallas as pl
from jax.experimental.pallas import tpu as pltpu

# Stand-in backbone widths: in_channels=2 -> enc1 8 -> enc2 16 -> dec 2 (vector V field).
CIN, C1, C2, COUT = 2, 8, 16, 2


# ----------------------------------------------------------------------------
# In-kernel helpers (everything stays in VMEM / vregs; contractions on the MXU)
# ----------------------------------------------------------------------------
def _conv3x3(x, w_ref, b_ref, s_ref, relu):
    """3x3 'same' conv in lane-dense (C, H*W) layout, channel contraction on the MXU.

    x     : (cin, HW) f32 value.
    w_ref : (9, cout, cin) VMEM ref (tap-major PyTorch weights).
    b_ref : (cout, 1) VMEM ref.
    s_ref : (9, HW, HW) VMEM ref of per-tap shift-with-zero-pad matrices.
    """
    cout = b_ref.shape[0]
    hw = x.shape[1]
    acc = jnp.zeros((cout, hw), jnp.float32)
    for t in range(9):                                   # static unrolled tap loop
        shifted = jnp.dot(x, s_ref[t], preferred_element_type=jnp.float32)   # (cin, HW)
        acc = acc + jnp.dot(w_ref[t], shifted,
                            preferred_element_type=jnp.float32)              # (cout, HW)
    acc = acc + b_ref[...]                               # bias folded into the epilogue
    return jnp.maximum(acc, 0.0) if relu else acc


def _unet_fused_kernel(x_ref, w1_ref, b1_ref, w2_ref, b2_ref, w3_ref, b3_ref,
                       sfull_ref, shalf_ref, pool_ref, up_ref, o_ref):
    x = x_ref[0]                                                            # (CIN, HW)
    e1 = _conv3x3(x, w1_ref, b1_ref, sfull_ref, relu=True)                  # (C1, HW)
    p1 = jnp.dot(e1, pool_ref[...], preferred_element_type=jnp.float32)     # (C1, HW//4)
    e2 = _conv3x3(p1, w2_ref, b2_ref, shalf_ref, relu=True)                 # (C2, HW//4)
    u1 = jnp.dot(e2, up_ref[...], preferred_element_type=jnp.float32)       # (C2, HW)
    cat = jnp.concatenate([u1, e1], axis=0)              # (C2+C1, HW), sublane-aligned, in VMEM
    out = _conv3x3(cat, w3_ref, b3_ref, sfull_ref, relu=False)              # (COUT, HW)
    o_ref[0] = out


# ----------------------------------------------------------------------------
# Host-side constant operators (shift / pool / upsample matrices, NumPy)
# ----------------------------------------------------------------------------
def _shift_stack_np(H, W):
    """(9, HW, HW) S_t with (x_flat @ S_t)[p] = x[h+dy, w+dx] (zero outside)."""
    hw = H * W
    p = np.arange(hw)
    hp, wp = p // W, p % W
    rows = np.arange(hw)[:, None]
    mats = []
    for dy in (-1, 0, 1):
        for dx in (-1, 0, 1):                            # tap order matches _prep_w
            hq, wq = hp + dy, wp + dx
            valid = (hq >= 0) & (hq < H) & (wq >= 0) & (wq < W)
            q = np.where(valid, hq * W + wq, -1)
            mats.append((rows == q[None, :]).astype(np.float32))
    return np.stack(mats, axis=0)


def _pool_up_np(H, W):
    """pool: (HW, HW/4) 2x2 mean; up: (HW/4, HW) nearest-neighbor 2x upsample."""
    hw, hw4 = H * W, (H // 2) * (W // 2)
    p = np.arange(hw)
    q = (p // W // 2) * (W // 2) + (p % W) // 2
    onehot = (q[:, None] == np.arange(hw4)[None, :]).astype(np.float32)
    return onehot * 0.25, onehot.T


def _prep_w(w):
    """PyTorch (cout, cin, 3, 3) conv weight -> tap-major (9, cout, cin)."""
    co, ci = w.shape[0], w.shape[1]
    return jnp.transpose(w, (2, 3, 0, 1)).reshape(9, co, ci)


# ----------------------------------------------------------------------------
# Fused pallas_call
# ----------------------------------------------------------------------------
def _full(a):
    nd = a.ndim
    return pl.BlockSpec(a.shape, lambda n: (0,) * nd)   # whole array, resident across grid


def _unet_pallas(x_flat, consts):
    N, cin, hw = x_flat.shape
    return pl.pallas_call(
        _unet_fused_kernel,
        out_shape=jax.ShapeDtypeStruct((N, COUT, hw), jnp.float32),
        grid=(N,),
        in_specs=[pl.BlockSpec((1, cin, hw), lambda n: (n, 0, 0))]
                 + [_full(c) for c in consts],
        out_specs=pl.BlockSpec((1, COUT, hw), lambda n: (n, 0, 0)),
        compiler_params=pltpu.CompilerParams(
            dimension_semantics=("parallel",)),          # batch axis feeds both v7x TCs
    )(x_flat, *consts)


@jax.jit
def forward(params, x):
    """UNet2D_vectorV.forward: outs = unet(x); return [out for out in outs]."""
    N, cin, H, W = x.shape
    sfull = jnp.asarray(_shift_stack_np(H, W))           # trace-time constants
    shalf = jnp.asarray(_shift_stack_np(H // 2, W // 2))
    pool_np, up_np = _pool_up_np(H, W)
    pool, up = jnp.asarray(pool_np), jnp.asarray(up_np)
    w1 = _prep_w(params["enc1_w"]); b1 = params["enc1_b"].reshape(-1, 1)
    w2 = _prep_w(params["enc2_w"]); b2 = params["enc2_b"].reshape(-1, 1)
    w3 = _prep_w(params["dec_w"]);  b3 = params["dec_b"].reshape(-1, 1)
    x_flat = x.reshape(N, cin, H * W)                    # lane-dense layout (last dim = 256)
    consts = (w1, b1, w2, b2, w3, b3, sfull, shalf, pool, up)
    out_flat = _unet_pallas(x_flat, consts)
    out = out_flat.reshape(N, COUT, H, W)
    return [out]                                         # UNet2D_vectorV returns outputs as-is


# ----------------------------------------------------------------------------
# Pure-JAX reference of the same stand-in backbone (for correctness check)
# ----------------------------------------------------------------------------
def forward_ref(params, x):
    dn = ("NCHW", "OIHW", "NCHW")

    def conv(v, w, b, relu):
        y = jax.lax.conv_general_dilated(v, w, (1, 1), "SAME", dimension_numbers=dn,
                                         precision=jax.lax.Precision.HIGHEST)
        y = y + b[None, :, None, None]
        return jnp.maximum(y, 0.0) if relu else y

    e1 = conv(x, params["enc1_w"], params["enc1_b"], True)
    N, c1, H, W = e1.shape
    p1 = e1.reshape(N, c1, H // 2, 2, W // 2, 2).mean(axis=(3, 5))
    e2 = conv(p1, params["enc2_w"], params["enc2_b"], True)
    u1 = jnp.repeat(jnp.repeat(e2, 2, axis=2), 2, axis=3)
    cat = jnp.concatenate([u1, e1], axis=1)
    return [conv(cat, params["dec_w"], params["dec_b"], False)]


# ----------------------------------------------------------------------------
# Deterministic parameter init
# ----------------------------------------------------------------------------
def init_params(key):
    ks = jax.random.split(key, 6)

    def conv_w(k, cout, cin):
        return (jax.random.normal(k, (cout, cin, 3, 3), jnp.float32)
                / jnp.sqrt(float(cin * 9)))

    return dict(
        enc1_w=conv_w(ks[0], C1, CIN),
        enc1_b=0.01 * jax.random.normal(ks[1], (C1,), jnp.float32),
        enc2_w=conv_w(ks[2], C2, C1),
        enc2_b=0.01 * jax.random.normal(ks[3], (C2,), jnp.float32),
        dec_w=conv_w(ks[4], COUT, C2 + C1),
        dec_b=0.01 * jax.random.normal(ks[5], (COUT,), jnp.float32),
    )


if __name__ == "__main__":
    key = jax.random.PRNGKey(0)
    k_param, k_x = jax.random.split(key)
    params = init_params(k_param)

    # in_channels=2 (module default), args.data_dim[0]=16 < 64 -> UNet2D_32 path
    x = jax.random.normal(k_x, (2, CIN, 16, 16), jnp.float32)

    Vs = forward(params, x)
    Vs = jax.block_until_ready(Vs)

    V = Vs[0]
    assert V.shape == (2, COUT, 16, 16) and V.dtype == jnp.float32

    V_ref = forward_ref(params, x)[0]
    max_err = float(jnp.max(jnp.abs(V - V_ref)))
    assert max_err < 1e-2, f"mismatch vs pure-JAX reference: max |err| = {max_err}"

    print("KERNEL_OK")
</pallas_src>

<mosaic_0001>
module attributes {stable_mosaic.version = 11 : i64} {
  func.func @_unet_fused_kernel(%arg0: i32, %arg1: memref<1x2x256xf32, #tpu.memory_space<vmem>>, %arg2: memref<9x8x2xf32, #tpu.memory_space<vmem>>, %arg3: memref<8x1xf32, #tpu.memory_space<vmem>>, %arg4: memref<9x16x8xf32, #tpu.memory_space<vmem>>, %arg5: memref<16x1xf32, #tpu.memory_space<vmem>>, %arg6: memref<9x2x24xf32, #tpu.memory_space<vmem>>, %arg7: memref<2x1xf32, #tpu.memory_space<vmem>>, %arg8: memref<9x256x256xf32, #tpu.memory_space<vmem>>, %arg9: memref<9x64x64xf32, #tpu.memory_space<vmem>>, %arg10: memref<256x64xf32, #tpu.memory_space<vmem>>, %arg11: memref<64x256xf32, #tpu.memory_space<vmem>>, %arg12: memref<1x2x256xf32, #tpu.memory_space<vmem>>) attributes {dimension_semantics = [#tpu.dimension_semantics<parallel>], iteration_bounds = array<i64: 2>, scalar_prefetch = 0 : i64, scratch_operands = 0 : i64, tpu.core_type = #tpu.core_type<tc>, window_params = [{transform_indices = @transform_0, window_bounds = array<i64: 1, 2, 256>}, {pipeline_mode = #tpu.pipeline_mode<synchronous>, transform_indices = @transform_1, window_bounds = array<i64: 9, 8, 2>}, {pipeline_mode = #tpu.pipeline_mode<synchronous>, transform_indices = @transform_2, window_bounds = array<i64: 8, 1>}, {pipeline_mode = #tpu.pipeline_mode<synchronous>, transform_indices = @transform_3, window_bounds = array<i64: 9, 16, 8>}, {pipeline_mode = #tpu.pipeline_mode<synchronous>, transform_indices = @transform_4, window_bounds = array<i64: 16, 1>}, {pipeline_mode = #tpu.pipeline_mode<synchronous>, transform_indices = @transform_5, window_bounds = array<i64: 9, 2, 24>}, {pipeline_mode = #tpu.pipeline_mode<synchronous>, transform_indices = @transform_6, window_bounds = array<i64: 2, 1>}, {pipeline_mode = #tpu.pipeline_mode<synchronous>, transform_indices = @transform_7, window_bounds = array<i64: 9, 256, 256>}, {pipeline_mode = #tpu.pipeline_mode<synchronous>, transform_indices = @transform_8, window_bounds = array<i64: 9, 64, 64>}, {pipeline_mode = #tpu.pipeline_mode<synchronous>, transform_indices = @transform_9, window_bounds = array<i64: 256, 64>}, {pipeline_mode = #tpu.pipeline_mode<synchronous>, transform_indices = @transform_10, window_bounds = array<i64: 64, 256>}, {transform_indices = @transform_11, window_bounds = array<i64: 1, 2, 256>}]} {
    %c0 = arith.constant 0 : index
    %c0_0 = arith.constant 0 : index
    %c0_1 = arith.constant 0 : index
    %0 = vector.load %arg1[%c0, %c0_0, %c0_1] : memref<1x2x256xf32, #tpu.memory_space<vmem>>, vector<1x2x256xf32>
    %1 = vector.shape_cast %0 : vector<1x2x256xf32> to vector<2x256xf32>
    %cst = arith.constant 0.000000e+00 : f32
    %2 = vector.broadcast %cst : f32 to vector<8x256xf32>
    %c0_2 = arith.constant 0 : index
    %c0_3 = arith.constant 0 : index
    %c0_4 = arith.constant 0 : index
    %3 = vector.load %arg8[%c0_2, %c0_3, %c0_4] : memref<9x256x256xf32, #tpu.memory_space<vmem>>, vector<1x256x256xf32>
    %4 = vector.shape_cast %3 : vector<1x256x256xf32> to vector<256x256xf32>
    %cst_5 = arith.constant dense<0.000000e+00> : vector<2x256xf32>
    %5 = tpu.matmul %1, %4, %cst_5 {dimension_numbers = #tpu.dot_dimension_numbers<[1], [0], [0], [1], [0, 0, 1, 1], [], []>} : vector<2x256xf32>, vector<256x256xf32>, vector<2x256xf32> -> vector<2x256xf32>
    %c0_6 = arith.constant 0 : index
    %c0_7 = arith.constant 0 : index
    %c0_8 = arith.constant 0 : index
    %6 = vector.load %arg2[%c0_6, %c0_7, %c0_8] : memref<9x8x2xf32, #tpu.memory_space<vmem>>, vector<1x8x2xf32>
    %7 = vector.shape_cast %6 : vector<1x8x2xf32> to vector<8x2xf32>
    %cst_9 = arith.constant dense<0.000000e+00> : vector<8x256xf32>
    %8 = tpu.matmul %7, %5, %cst_9 {dimension_numbers = #tpu.dot_dimension_numbers<[1], [0], [0], [1], [0, 0, 1, 1], [], []>} : vector<8x2xf32>, vector<2x256xf32>, vector<8x256xf32> -> vector<8x256xf32>
    %9 = arith.addf %2, %8 : vector<8x256xf32>
    %c1 = arith.constant 1 : index
    %c0_10 = arith.constant 0 : index
    %c0_11 = arith.constant 0 : index
    %10 = vector.load %arg8[%c1, %c0_10, %c0_11] : memref<9x256x256xf32, #tpu.memory_space<vmem>>, vector<1x256x256xf32>
    %11 = vector.shape_cast %10 : vector<1x256x256xf32> to vector<256x256xf32>
    %cst_12 = arith.constant dense<0.000000e+00> : vector<2x256xf32>
    %12 = tpu.matmul %1, %11, %cst_12 {dimension_numbers = #tpu.dot_dimension_numbers<[1], [0], [0], [1], [0, 0, 1, 1], [], []>} : vector<2x256xf32>, vector<256x256xf32>, vector<2x256xf32> -> vector<2x256xf32>
    %c1_13 = arith.constant 1 : index
    %c0_14 = arith.constant 0 : index
    %c0_15 = arith.constant 0 : index
    %13 = vector.load %arg2[%c1_13, %c0_14, %c0_15] : memref<9x8x2xf32, #tpu.memory_space<vmem>>, vector<1x8x2xf32>
    %14 = vector.shape_cast %13 : vector<1x8x2xf32> to vector<8x2xf32>
    %cst_16 = arith.constant dense<0.000000e+00> : vector<8x256xf32>
    %15 = tpu.matmul %14, %12, %cst_16 {dimension_numbers = #tpu.dot_dimension_numbers<[1], [0], [0], [1], [0, 0, 1, 1], [], []>} : vector<8x2xf32>, vector<2x256xf32>, vector<8x256xf32> -> vector<8x256xf32>
    %16 = arith.addf %9, %15 : vector<8x256xf32>
    %c2 = arith.constant 2 : index
    %c0_17 = arith.constant 0 : index
    %c0_18 = arith.constant 0 : index
    %17 = vector.load %arg8[%c2, %c0_17, %c0_18] : memref<9x256x256xf32, #tpu.memory_space<vmem>>, vector<1x256x256xf32>
    %18 = vector.shape_cast %17 : vector<1x256x256xf32> to vector<256x256xf32>
    %cst_19 = arith.constant dense<0.000000e+00> : vector<2x256xf32>
    %19 = tpu.matmul %1, %18, %cst_19 {dimension_numbers = #tpu.dot_dimension_numbers<[1], [0], [0], [1], [0, 0, 1, 1], [], []>} : vector<2x256xf32>, vector<256x256xf32>, vector<2x256xf32> -> vector<2x256xf32>
    %c2_20 = arith.constant 2 : index
    %c0_21 = arith.constant 0 : index
    %c0_22 = arith.constant 0 : index
    %20 = vector.load %arg2[%c2_20, %c0_21, %c0_22] : memref<9x8x2xf32, #tpu.memory_space<vmem>>, vector<1x8x2xf32>
    %21 = vector.shape_cast %20 : vector<1x8x2xf32> to vector<8x2xf32>
    %cst_23 = arith.constant dense<0.000000e+00> : vector<8x256xf32>
    %22 = tpu.matmul %21, %19, %cst_23 {dimension_numbers = #tpu.dot_dimension_numbers<[1], [0], [0], [1], [0, 0, 1, 1], [], []>} : vector<8x2xf32>, vector<2x256xf32>, vector<8x256xf32> -> vector<8x256xf32>
    %23 = arith.addf %16, %22 : vector<8x256xf32>
    %c3 = arith.constant 3 : index
    %c0_24 = arith.constant 0 : index
    %c0_25 = arith.constant 0 : index
    %24 = vector.load %arg8[%c3, %c0_24, %c0_25] : memref<9x256x256xf32, #tpu.memory_space<vmem>>, vector<1x256x256xf32>
    %25 = vector.shape_cast %24 : vector<1x256x256xf32> to vector<256x256xf32>
    %cst_26 = arith.constant dense<0.000000e+00> : vector<2x256xf32>
    %26 = tpu.matmul %1, %25, %cst_26 {dimension_numbers = #tpu.dot_dimension_numbers<[1], [0], [0], [1], [0, 0, 1, 1], [], []>} : vector<2x256xf32>, vector<256x256xf32>, vector<2x256xf32> -> vector<2x256xf32>
    %c3_27 = arith.constant 3 : index
    %c0_28 = arith.constant 0 : index
    %c0_29 = arith.constant 0 : index
    %27 = vector.load %arg2[%c3_27, %c0_28, %c0_29] : memref<9x8x2xf32, #tpu.memory_space<vmem>>, vector<1x8x2xf32>
    %28 = vector.shape_cast %27 : vector<1x8x2xf32> to vector<8x2xf32>
    %cst_30 = arith.constant dense<0.000000e+00> : vector<8x256xf32>
    %29 = tpu.matmul %28, %26, %cst_30 {dimension_numbers = #tpu.dot_dimension_numbers<[1], [0], [0], [1], [0, 0, 1, 1], [], []>} : vector<8x2xf32>, vector<2x256xf32>, vector<8x256xf32> -> vector<8x256xf32>
    %30 = arith.addf %23, %29 : vector<8x256xf32>
    %c4 = arith.constant 4 : index
    %c0_31 = arith.constant 0 : index
    %c0_32 = arith.constant 0 : index
    %31 = vector.load %arg8[%c4, %c0_31, %c0_32] : memref<9x256x256xf32, #tpu.memory_space<vmem>>, vector<1x256x256xf32>
    %32 = vector.shape_cast %31 : vector<1x256x256xf32> to vector<256x256xf32>
    %cst_33 = arith.constant dense<0.000000e+00> : vector<2x256xf32>
    %33 = tpu.matmul %1, %32, %cst_33 {dimension_numbers = #tpu.dot_dimension_numbers<[1], [0], [0], [1], [0, 0, 1, 1], [], []>} : vector<2x256xf32>, vector<256x256xf32>, vector<2x256xf32> -> vector<2x256xf32>
    %c4_34 = arith.constant 4 : index
    %c0_35 = arith.constant 0 : index
    %c0_36 = arith.constant 0 : index
    %34 = vector.load %arg2[%c4_34, %c0_35, %c0_36] : memref<9x8x2xf32, #tpu.memory_space<vmem>>, vector<1x8x2xf32>
    %35 = vector.shape_cast %34 : vector<1x8x2xf32> to vector<8x2xf32>
    %cst_37 = arith.constant dense<0.000000e+00> : vector<8x256xf32>
    %36 = tpu.matmul %35, %33, %cst_37 {dimension_numbers = #tpu.dot_dimension_numbers<[1], [0], [0], [1], [0, 0, 1, 1], [], []>} : vector<8x2xf32>, vector<2x256xf32>, vector<8x256xf32> -> vector<8x256xf32>
    %37 = arith.addf %30, %36 : vector<8x256xf32>
    %c5 = arith.constant 5 : index
    %c0_38 = arith.constant 0 : index
    %c0_39 = arith.constant 0 : index
    %38 = vector.load %arg8[%c5, %c0_38, %c0_39] : memref<9x256x256xf32, #tpu.memory_space<vmem>>, vector<1x256x256xf32>
    %39 = vector.shape_cast %38 : vector<1x256x256xf32> to vector<256x256xf32>
    %cst_40 = arith.constant dense<0.000000e+00> : vector<2x256xf32>
    %40 = tpu.matmul %1, %39, %cst_40 {dimension_numbers = #tpu.dot_dimension_numbers<[1], [0], [0], [1], [0, 0, 1, 1], [], []>} : vector<2x256xf32>, vector<256x256xf32>, vector<2x256xf32> -> vector<2x256xf32>
    %c5_41 = arith.constant 5 : index
    %c0_42 = arith.constant 0 : index
    %c0_43 = arith.constant 0 : index
    %41 = vector.load %arg2[%c5_41, %c0_42, %c0_43] : memref<9x8x2xf32, #tpu.memory_space<vmem>>, vector<1x8x2xf32>
    %42 = vector.shape_cast %41 : vector<1x8x2xf32> to vector<8x2xf32>
    %cst_44 = arith.constant dense<0.000000e+00> : vector<8x256xf32>
    %43 = tpu.matmul %42, %40, %cst_44 {dimension_numbers = #tpu.dot_dimension_numbers<[1], [0], [0], [1], [0, 0, 1, 1], [], []>} : vector<8x2xf32>, vector<2x256xf32>, vector<8x256xf32> -> vector<8x256xf32>
    %44 = arith.addf %37, %43 : vector<8x256xf32>
    %c6 = arith.constant 6 : index
    %c0_45 = arith.constant 0 : index
    %c0_46 = arith.constant 0 : index
    %45 = vector.load %arg8[%c6, %c0_45, %c0_46] : memref<9x256x256xf32, #tpu.memory_space<vmem>>, vector<1x256x256xf32>
    %46 = vector.shape_cast %45 : vector<1x256x256xf32> to vector<256x256xf32>
    %cst_47 = arith.constant dense<0.000000e+00> : vector<2x256xf32>
    %47 = tpu.matmul %1, %46, %cst_47 {dimension_numbers = #tpu.dot_dimension_numbers<[1], [0], [0], [1], [0, 0, 1, 1], [], []>} : vector<2x256xf32>, vector<256x256xf32>, vector<2x256xf32> -> vector<2x256xf32>
    %c6_48 = arith.constant 6 : index
    %c0_49 = arith.constant 0 : index
    %c0_50 = arith.constant 0 : index
    %48 = vector.load %arg2[%c6_48, %c0_49, %c0_50] : memref<9x8x2xf32, #tpu.memory_space<vmem>>, vector<1x8x2xf32>
    %49 = vector.shape_cast %48 : vector<1x8x2xf32> to vector<8x2xf32>
    %cst_51 = arith.constant dense<0.000000e+00> : vector<8x256xf32>
    %50 = tpu.matmul %49, %47, %cst_51 {dimension_numbers = #tpu.dot_dimension_numbers<[1], [0], [0], [1], [0, 0, 1, 1], [], []>} : vector<8x2xf32>, vector<2x256xf32>, vector<8x256xf32> -> vector<8x256xf32>
    %51 = arith.addf %44, %50 : vector<8x256xf32>
    %c7 = arith.constant 7 : index
    %c0_52 = arith.constant 0 : index
    %c0_53 = arith.constant 0 : index
    %52 = vector.load %arg8[%c7, %c0_52, %c0_53] : memref<9x256x256xf32, #tpu.memory_space<vmem>>, vector<1x256x256xf32>
    %53 = vector.shape_cast %52 : vector<1x256x256xf32> to vector<256x256xf32>
    %cst_54 = arith.constant dense<0.000000e+00> : vector<2x256xf32>
    %54 = tpu.matmul %1, %53, %cst_54 {dimension_numbers = #tpu.dot_dimension_numbers<[1], [0], [0], [1], [0, 0, 1, 1], [], []>} : vector<2x256xf32>, vector<256x256xf32>, vector<2x256xf32> -> vector<2x256xf32>
    %c7_55 = arith.constant 7 : index
    %c0_56 = arith.constant 0 : index
    %c0_57 = arith.constant 0 : index
    %55 = vector.load %arg2[%c7_55, %c0_56, %c0_57] : memref<9x8x2xf32, #tpu.memory_space<vmem>>, vector<1x8x2xf32>
    %56 = vector.shape_cast %55 : vector<1x8x2xf32> to vector<8x2xf32>
    %cst_58 = arith.constant dense<0.000000e+00> : vector<8x256xf32>
    %57 = tpu.matmul %56, %54, %cst_58 {dimension_numbers = #tpu.dot_dimension_numbers<[1], [0], [0], [1], [0, 0, 1, 1], [], []>} : vector<8x2xf32>, vector<2x256xf32>, vector<8x256xf32> -> vector<8x256xf32>
    %58 = arith.addf %51, %57 : vector<8x256xf32>
    %c8 = arith.constant 8 : index
    %c0_59 = arith.constant 0 : index
    %c0_60 = arith.constant 0 : index
    %59 = vector.load %arg8[%c8, %c0_59, %c0_60] : memref<9x256x256xf32, #tpu.memory_space<vmem>>, vector<1x256x256xf32>
    %60 = vector.shape_cast %59 : vector<1x256x256xf32> to vector<256x256xf32>
    %cst_61 = arith.constant dense<0.000000e+00> : vector<2x256xf32>
    %61 = tpu.matmul %1, %60, %cst_61 {dimension_numbers = #tpu.dot_dimension_numbers<[1], [0], [0], [1], [0, 0, 1, 1], [], []>} : vector<2x256xf32>, vector<256x256xf32>, vector<2x256xf32> -> vector<2x256xf32>
    %c8_62 = arith.constant 8 : index
    %c0_63 = arith.constant 0 : index
    %c0_64 = arith.constant 0 : index
    %62 = vector.load %arg2[%c8_62, %c0_63, %c0_64] : memref<9x8x2xf32, #tpu.memory_space<vmem>>, vector<1x8x2xf32>
    %63 = vector.shape_cast %62 : vector<1x8x2xf32> to vector<8x2xf32>
    %cst_65 = arith.constant dense<0.000000e+00> : vector<8x256xf32>
    %64 = tpu.matmul %63, %61, %cst_65 {dimension_numbers = #tpu.dot_dimension_numbers<[1], [0], [0], [1], [0, 0, 1, 1], [], []>} : vector<8x2xf32>, vector<2x256xf32>, vector<8x256xf32> -> vector<8x256xf32>
    %65 = arith.addf %58, %64 : vector<8x256xf32>
    %c0_66 = arith.constant 0 : index
    %c0_67 = arith.constant 0 : index
    %66 = vector.load %arg3[%c0_66, %c0_67] : memref<8x1xf32, #tpu.memory_space<vmem>>, vector<8x1xf32>
    %67 = vector.broadcast %66 : vector<8x1xf32> to vector<8x256xf32>
    %68 = arith.addf %65, %67 : vector<8x256xf32>
    %cst_68 = arith.constant 0.000000e+00 : f32
    %69 = vector.broadcast %cst_68 : f32 to vector<8x256xf32>
    %70 = arith.maximumf %68, %69 : vector<8x256xf32>
    %c0_69 = arith.constant 0 : index
    %c0_70 = arith.constant 0 : index
    %71 = vector.load %arg10[%c0_69, %c0_70] : memref<256x64xf32, #tpu.memory_space<vmem>>, vector<256x64xf32>
    %cst_71 = arith.constant dense<0.000000e+00> : vector<8x64xf32>
    %72 = tpu.matmul %70, %71, %cst_71 {dimension_numbers = #tpu.dot_dimension_numbers<[1], [0], [0], [1], [0, 0, 1, 1], [], []>} : vector<8x256xf32>, vector<256x64xf32>, vector<8x64xf32> -> vector<8x64xf32>
    %cst_72 = arith.constant 0.000000e+00 : f32
    %73 = vector.broadcast %cst_72 : f32 to vector<16x64xf32>
    %c0_73 = arith.constant 0 : index
    %c0_74 = arith.constant 0 : index
    %c0_75 = arith.constant 0 : index
    %74 = vector.load %arg9[%c0_73, %c0_74, %c0_75] : memref<9x64x64xf32, #tpu.memory_space<vmem>>, vector<1x64x64xf32>
    %75 = vector.shape_cast %74 : vector<1x64x64xf32> to vector<64x64xf32>
    %cst_76 = arith.constant dense<0.000000e+00> : vector<8x64xf32>
    %76 = tpu.matmul %72, %75, %cst_76 {dimension_numbers = #tpu.dot_dimension_numbers<[1], [0], [0], [1], [0, 0, 1, 1], [], []>} : vector<8x64xf32>, vector<64x64xf32>, vector<8x64xf32> -> vector<8x64xf32>
    %c0_77 = arith.constant 0 : index
    %c0_78 = arith.constant 0 : index
    %c0_79 = arith.constant 0 : index
    %77 = vector.load %arg4[%c0_77, %c0_78, %c0_79] : memref<9x16x8xf32, #tpu.memory_space<vmem>>, vector<1x16x8xf32>
    %78 = vector.shape_cast %77 : vector<1x16x8xf32> to vector<16x8xf32>
    %cst_80 = arith.constant dense<0.000000e+00> : vector<16x64xf32>
    %79 = tpu.matmul %78, %76, %cst_80 {dimension_numbers = #tpu.dot_dimension_numbers<[1], [0], [0], [1], [0, 0, 1, 1], [], []>} : vector<16x8xf32>, vector<8x64xf32>, vector<16x64xf32> -> vector<16x64xf32>
    %80 = arith.addf %73, %79 : vector<16x64xf32>
    %c1_81 = arith.constant 1 : index
    %c0_82 = arith.constant 0 : index
    %c0_83 = arith.constant 0 : index
    %81 = vector.load %arg9[%c1_81, %c0_82, %c0_83] : memref<9x64x64xf32, #tpu.memory_space<vmem>>, vector<1x64x64xf32>
    %82 = vector.shape_cast %81 : vector<1x64x64xf32> to vector<64x64xf32>
    %cst_84 = arith.constant dense<0.000000e+00> : vector<8x64xf32>
    %83 = tpu.matmul %72, %82, %cst_84 {dimension_numbers = #tpu.dot_dimension_numbers<[1], [0], [0], [1], [0, 0, 1, 1], [], []>} : vector<8x64xf32>, vector<64x64xf32>, vector<8x64xf32> -> vector<8x64xf32>
    %c1_85 = arith.constant 1 : index
    %c0_86 = arith.constant 0 : index
    %c0_87 = arith.constant 0 : index
    %84 = vector.load %arg4[%c1_85, %c0_86, %c0_87] : memref<9x16x8xf32, #tpu.memory_space<vmem>>, vector<1x16x8xf32>
    %85 = vector.shape_cast %84 : vector<1x16x8xf32> to vector<16x8xf32>
    %cst_88 = arith.constant dense<0.000000e+00> : vector<16x64xf32>
    %86 = tpu.matmul %85, %83, %cst_88 {dimension_numbers = #tpu.dot_dimension_numbers<[1], [0], [0], [1], [0, 0, 1, 1], [], []>} : vector<16x8xf32>, vector<8x64xf32>, vector<16x64xf32> -> vector<16x64xf32>
    %87 = arith.addf %80, %86 : vector<16x64xf32>
    %c2_89 = arith.constant 2 : index
    %c0_90 = arith.constant 0 : index
    %c0_91 = arith.constant 0 : index
    %88 = vector.load %arg9[%c2_89, %c0_90, %c0_91] : memref<9x64x64xf32, #tpu.memory_space<vmem>>, vector<1x64x64xf32>
    %89 = vector.shape_cast %88 : vector<1x64x64xf32> to vector<64x64xf32>
    %cst_92 = arith.constant dense<0.000000e+00> : vector<8x64xf32>
    %90 = tpu.matmul %72, %89, %cst_92 {dimension_numbers = #tpu.dot_dimension_numbers<[1], [0], [0], [1], [0, 0, 1, 1], [], []>} : vector<8x64xf32>, vector<64x64xf32>, vector<8x64xf32> -> vector<8x64xf32>
    %c2_93 = arith.constant 2 : index
    %c0_94 = arith.constant 0 : index
    %c0_95 = arith.constant 0 : index
    %91 = vector.load %arg4[%c2_93, %c0_94, %c0_95] : memref<9x16x8xf32, #tpu.memory_space<vmem>>, vector<1x16x8xf32>
    %92 = vector.shape_cast %91 : vector<1x16x8xf32> to vector<16x8xf32>
    %cst_96 = arith.constant dense<0.000000e+00> : vector<16x64xf32>
    %93 = tpu.matmul %92, %90, %cst_96 {dimension_numbers = #tpu.dot_dimension_numbers<[1], [0], [0], [1], [0, 0, 1, 1], [], []>} : vector<16x8xf32>, vector<8x64xf32>, vector<16x64xf32> -> vector<16x64xf32>
    %94 = arith.addf %87, %93 : vector<16x64xf32>
    %c3_97 = arith.constant 3 : index
    %c0_98 = arith.constant 0 : index
    %c0_99 = arith.constant 0 : index
    %95 = vector.load %arg9[%c3_97, %c0_98, %c0_99] : memref<9x64x64xf32, #tpu.memory_space<vmem>>, vector<1x64x64xf32>
    %96 = vector.shape_cast %95 : vector<1x64x64xf32> to vector<64x64xf32>
    %cst_100 = arith.constant dense<0.000000e+00> : vector<8x64xf32>
    %97 = tpu.matmul %72, %96, %cst_100 {dimension_numbers = #tpu.dot_dimension_numbers<[1], [0], [0], [1], [0, 0, 1, 1], [], []>} : vector<8x64xf32>, vector<64x64xf32>, vector<8x64xf32> -> vector<8x64xf32>
    %c3_101 = arith.constant 3 : index
    %c0_102 = arith.constant 0 : index
    %c0_103 = arith.constant 0 : index
    %98 = vector.load %arg4[%c3_101, %c0_102, %c0_103] : memref<9x16x8xf32, #tpu.memory_space<vmem>>, vector<1x16x8xf32>
    %99 = vector.shape_cast %98 : vector<1x16x8xf32> to vector<16x8xf32>
    %cst_104 = arith.constant dense<0.000000e+00> : vector<16x64xf32>
    %100 = tpu.matmul %99, %97, %cst_104 {dimension_numbers = #tpu.dot_dimension_numbers<[1], [0], [0], [1], [0, 0, 1, 1], [], []>} : vector<16x8xf32>, vector<8x64xf32>, vector<16x64xf32> -> vector<16x64xf32>
    %101 = arith.addf %94, %100 : vector<16x64xf32>
    %c4_105 = arith.constant 4 : index
    %c0_106 = arith.constant 0 : index
    %c0_107 = arith.constant 0 : index
    %102 = vector.load %arg9[%c4_105, %c0_106, %c0_107] : memref<9x64x64xf32, #tpu.memory_space<vmem>>, vector<1x64x64xf32>
    %103 = vector.shape_cast %102 : vector<1x64x64xf32> to vector<64x64xf32>
    %cst_108 = arith.constant dense<0.000000e+00> : vector<8x64xf32>
    %104 = tpu.matmul %72, %103, %cst_108 {dimension_numbers = #tpu.dot_dimension_numbers<[1], [0], [0], [1], [0, 0, 1, 1], [], []>} : vector<8x64xf32>, vector<64x64xf32>, vector<8x64xf32> -> vector<8x64xf32>
    %c4_109 = arith.constant 4 : index
    %c0_110 = arith.constant 0 : index
    %c0_111 = arith.constant 0 : index
    %105 = vector.load %arg4[%c4_109, %c0_110, %c0_111] : memref<9x16x8xf32, #tpu.memory_space<vmem>>, vector<1x16x8xf32>
    %106 = vector.shape_cast %105 : vector<1x16x8xf32> to vector<16x8xf32>
    %cst_112 = arith.constant dense<0.000000e+00> : vector<16x64xf32>
    %107 = tpu.matmul %106, %104, %cst_112 {dimension_numbers = #tpu.dot_dimension_numbers<[1], [0], [0], [1], [0, 0, 1, 1], [], []>} : vector<16x8xf32>, vector<8x64xf32>, vector<16x64xf32> -> vector<16x64xf32>
    %108 = arith.addf %101, %107 : vector<16x64xf32>
    %c5_113 = arith.constant 5 : index
    %c0_114 = arith.constant 0 : index
    %c0_115 = arith.constant 0 : index
    %109 = vector.load %arg9[%c5_113, %c0_114, %c0_115] : memref<9x64x64xf32, #tpu.memory_space<vmem>>, vector<1x64x64xf32>
    %110 = vector.shape_cast %109 : vector<1x64x64xf32> to vector<64x64xf32>
    %cst_116 = arith.constant dense<0.000000e+00> : vector<8x64xf32>
    %111 = tpu.matmul %72, %110, %cst_116 {dimension_numbers = #tpu.dot_dimension_numbers<[1], [0], [0], [1], [0, 0, 1, 1], [], []>} : vector<8x64xf32>, vector<64x64xf32>, vector<8x64xf32> -> vector<8x64xf32>
    %c5_117 = arith.constant 5 : index
    %c0_118 = arith.constant 0 : index
    %c0_119 = arith.constant 0 : index
    %112 = vector.load %arg4[%c5_117, %c0_118, %c0_119] : memref<9x16x8xf32, #tpu.memory_space<vmem>>, vector<1x16x8xf32>
    %113 = vector.shape_cast %112 : vector<1x16x8xf32> to vector<16x8xf32>
    %cst_120 = arith.constant dense<0.000000e+00> : vector<16x64xf32>
    %114 = tpu.matmul %113, %111, %cst_120 {dimension_numbers = #tpu.dot_dimension_numbers<[1], [0], [0], [1], [0, 0, 1, 1], [], []>} : vector<16x8xf32>, vector<8x64xf32>, vector<16x64xf32> -> vector<16x64xf32>
    %115 = arith.addf %108, %114 : vector<16x64xf32>
    %c6_121 = arith.constant 6 : index
    %c0_122 = arith.constant 0 : index
    %c0_123 = arith.constant 0 : index
    %116 = vector.load %arg9[%c6_121, %c0_122, %c0_123] : memref<9x64x64xf32, #tpu.memory_space<vmem>>, vector<1x64x64xf32>
    %117 = vector.shape_cast %116 : vector<1x64x64xf32> to vector<64x64xf32>
    %cst_124 = arith.constant dense<0.000000e+00> : vector<8x64xf32>
    %118 = tpu.matmul %72, %117, %cst_124 {dimension_numbers = #tpu.dot_dimension_numbers<[1], [0], [0], [1], [0, 0, 1, 1], [], []>} : vector<8x64xf32>, vector<64x64xf32>, vector<8x64xf32> -> vector<8x64xf32>
    %c6_125 = arith.constant 6 : index
    %c0_126 = arith.constant 0 : index
    %c0_127 = arith.constant 0 : index
    %119 = vector.load %arg4[%c6_125, %c0_126, %c0_127] : memref<9x16x8xf32, #tpu.memory_space<vmem>>, vector<1x16x8xf32>
    %120 = vector.shape_cast %119 : vector<1x16x8xf32> to vector<16x8xf32>
    %cst_128 = arith.constant dense<0.000000e+00> : vector<16x64xf32>
    %121 = tpu.matmul %120, %118, %cst_128 {dimension_numbers = #tpu.dot_dimension_numbers<[1], [0], [0], [1], [0, 0, 1, 1], [], []>} : vector<16x8xf32>, vector<8x64xf32>, vector<16x64xf32> -> vector<16x64xf32>
    %122 = arith.addf %115, %121 : vector<16x64xf32>
    %c7_129 = arith.constant 7 : index
    %c0_130 = arith.constant 0 : index
    %c0_131 = arith.constant 0 : index
    %123 = vector.load %arg9[%c7_129, %c0_130, %c0_131] : memref<9x64x64xf32, #tpu.memory_space<vmem>>, vector<1x64x64xf32>
    %124 = vector.shape_cast %123 : vector<1x64x64xf32> to vector<64x64xf32>
    %cst_132 = arith.constant dense<0.000000e+00> : vector<8x64xf32>
    %125 = tpu.matmul %72, %124, %cst_132 {dimension_numbers = #tpu.dot_dimension_numbers<[1], [0], [0], [1], [0, 0, 1, 1], [], []>} : vector<8x64xf32>, vector<64x64xf32>, vector<8x64xf32> -> vector<8x64xf32>
    %c7_133 = arith.constant 7 : index
    %c0_134 = arith.constant 0 : index
    %c0_135 = arith.constant 0 : index
    %126 = vector.load %arg4[%c7_133, %c0_134, %c0_135] : memref<9x16x8xf32, #tpu.memory_space<vmem>>, vector<1x16x8xf32>
    %127 = vector.shape_cast %126 : vector<1x16x8xf32> to vector<16x8xf32>
    %cst_136 = arith.constant dense<0.000000e+00> : vector<16x64xf32>
    %128 = tpu.matmul %127, %125, %cst_136 {dimension_numbers = #tpu.dot_dimension_numbers<[1], [0], [0], [1], [0, 0, 1, 1], [], []>} : vector<16x8xf32>, vector<8x64xf32>, vector<16x64xf32> -> vector<16x64xf32>
    %129 = arith.addf %122, %128 : vector<16x64xf32>
    %c8_137 = arith.constant 8 : index
    %c0_138 = arith.constant 0 : index
    %c0_139 = arith.constant 0 : index
    %130 = vector.load %arg9[%c8_137, %c0_138, %c0_139] : memref<9x64x64xf32, #tpu.memory_space<vmem>>, vector<1x64x64xf32>
    %131 = vector.shape_cast %130 : vector<1x64x64xf32> to vector<64x64xf32>
    %cst_140 = arith.constant dense<0.000000e+00> : vector<8x64xf32>
    %132 = tpu.matmul %72, %131, %cst_140 {dimension_numbers = #tpu.dot_dimension_numbers<[1], [0], [0], [1], [0, 0, 1, 1], [], []>} : vector<8x64xf32>, vector<64x64xf32>, vector<8x64xf32> -> vector<8x64xf32>
    %c8_141 = arith.constant 8 : index
    %c0_142 = arith.constant 0 : index
    %c0_143 = arith.constant 0 : index
    %133 = vector.load %arg4[%c8_141, %c0_142, %c0_143] : memref<9x16x8xf32, #tpu.memory_space<vmem>>, vector<1x16x8xf32>
    %134 = vector.shape_cast %133 : vector<1x16x8xf32> to vector<16x8xf32>
    %cst_144 = arith.constant dense<0.000000e+00> : vector<16x64xf32>
    %135 = tpu.matmul %134, %132, %cst_144 {dimension_numbers = #tpu.dot_dimension_numbers<[1], [0], [0], [1], [0, 0, 1, 1], [], []>} : vector<16x8xf32>, vector<8x64xf32>, vector<16x64xf32> -> vector<16x64xf32>
    %136 = arith.addf %129, %135 : vector<16x64xf32>
    %c0_145 = arith.constant 0 : index
    %c0_146 = arith.constant 0 : index
    %137 = vector.load %arg5[%c0_145, %c0_146] : memref<16x1xf32, #tpu.memory_space<vmem>>, vector<16x1xf32>
    %138 = vector.broadcast %137 : vector<16x1xf32> to vector<16x64xf32>
    %139 = arith.addf %136, %138 : vector<16x64xf32>
    %cst_147 = arith.constant 0.000000e+00 : f32
    %140 = vector.broadcast %cst_147 : f32 to vector<16x64xf32>
    %141 = arith.maximumf %139, %140 : vector<16x64xf32>
    %c0_148 = arith.constant 0 : index
    %c0_149 = arith.constant 0 : index
    %142 = vector.load %arg11[%c0_148, %c0_149] : memref<64x256xf32, #tpu.memory_space<vmem>>, vector<64x256xf32>
    %cst_150 = arith.constant dense<0.000000e+00> : vector<16x256xf32>
    %143 = tpu.matmul %141, %142, %cst_150 {dimension_numbers = #tpu.dot_dimension_numbers<[1], [0], [0], [1], [0, 0, 1, 1], [], []>} : vector<16x64xf32>, vector<64x256xf32>, vector<16x256xf32> -> vector<16x256xf32>
    %144 = tpu.concatenate %143, %70 in 0 : vector<16x256xf32>, vector<8x256xf32> -> vector<24x256xf32>
    %cst_151 = arith.constant 0.000000e+00 : f32
    %145 = vector.broadcast %cst_151 : f32 to vector<2x256xf32>
    %c0_152 = arith.constant 0 : index
    %c0_153 = arith.constant 0 : index
    %c0_154 = arith.constant 0 : index
    %146 = vector.load %arg8[%c0_152, %c0_153, %c0_154] : memref<9x256x256xf32, #tpu.memory_space<vmem>>, vector<1x256x256xf32>
    %147 = vector.shape_cast %146 : vector<1x256x256xf32> to vector<256x256xf32>
    %cst_155 = arith.constant dense<0.000000e+00> : vector<24x256xf32>
    %148 = tpu.matmul %144, %147, %cst_155 {dimension_numbers = #tpu.dot_dimension_numbers<[1], [0], [0], [1], [0, 0, 1, 1], [], []>} : vector<24x256xf32>, vector<256x256xf32>, vector<24x256xf32> -> vector<24x256xf32>
    %c0_156 = arith.constant 0 : index
    %c0_157 = arith.constant 0 : index
    %c0_158 = arith.constant 0 : index
    %149 = vector.load %arg6[%c0_156, %c0_157, %c0_158] : memref<9x2x24xf32, #tpu.memory_space<vmem>>, vector<1x2x24xf32>
    %150 = vector.shape_cast %149 : vector<1x2x24xf32> to vector<2x24xf32>
    %cst_159 = arith.constant dense<0.000000e+00> : vector<2x256xf32>
    %151 = tpu.matmul %150, %148, %cst_159 {dimension_numbers = #tpu.dot_dimension_numbers<[1], [0], [0], [1], [0, 0, 1, 1], [], []>} : vector<2x24xf32>, vector<24x256xf32>, vector<2x256xf32> -> vector<2x256xf32>
    %152 = arith.addf %145, %151 : vector<2x256xf32>
    %c1_160 = arith.constant 1 : index
    %c0_161 = arith.constant 0 : index
    %c0_162 = arith.constant 0 : index
    %153 = vector.load %arg8[%c1_160, %c0_161, %c0_162] : memref<9x256x256xf32, #tpu.memory_space<vmem>>, vector<1x256x256xf32>
    %154 = vector.shape_cast %153 : vector<1x256x256xf32> to vector<256x256xf32>
    %cst_163 = arith.constant dense<0.000000e+00> : vector<24x256xf32>
    %155 = tpu.matmul %144, %154, %cst_163 {dimension_numbers = #tpu.dot_dimension_numbers<[1], [0], [0], [1], [0, 0, 1, 1], [], []>} : vector<24x256xf32>, vector<256x256xf32>, vector<24x256xf32> -> vector<24x256xf32>
    %c1_164 = arith.constant 1 : index
    %c0_165 = arith.constant 0 : index
    %c0_166 = arith.constant 0 : index
    %156 = vector.load %arg6[%c1_164, %c0_165, %c0_166] : memref<9x2x24xf32, #tpu.memory_space<vmem>>, vector<1x2x24xf32>
    %157 = vector.shape_cast %156 : vector<1x2x24xf32> to vector<2x24xf32>
    %cst_167 = arith.constant dense<0.000000e+00> : vector<2x256xf32>
    %158 = tpu.matmul %157, %155, %cst_167 {dimension_numbers = #tpu.dot_dimension_numbers<[1], [0], [0], [1], [0, 0, 1, 1], [], []>} : vector<2x24xf32>, vector<24x256xf32>, vector<2x256xf32> -> vector<2x256xf32>
    %159 = arith.addf %152, %158 : vector<2x256xf32>
    %c2_168 = arith.constant 2 : index
    %c0_169 = arith.constant 0 : index
    %c0_170 = arith.constant 0 : index
    %160 = vector.load %arg8[%c2_168, %c0_169, %c0_170] : memref<9x256x256xf32, #tpu.memory_space<vmem>>, vector<1x256x256xf32>
    %161 = vector.shape_cast %160 : vector<1x256x256xf32> to vector<256x256xf32>
    %cst_171 = arith.constant dense<0.000000e+00> : vector<24x256xf32>
    %162 = tpu.matmul %144, %161, %cst_171 {dimension_numbers = #tpu.dot_dimension_numbers<[1], [0], [0], [1], [0, 0, 1, 1], [], []>} : vector<24x256xf32>, vector<256x256xf32>, vector<24x256xf32> -> vector<24x256xf32>
    %c2_172 = arith.constant 2 : index
    %c0_173 = arith.constant 0 : index
    %c0_174 = arith.constant 0 : index
    %163 = vector.load %arg6[%c2_172, %c0_173, %c0_174] : memref<9x2x24xf32, #tpu.memory_space<vmem>>, vector<1x2x24xf32>
    %164 = vector.shape_cast %163 : vector<1x2x24xf32> to vector<2x24xf32>
    %cst_175 = arith.constant dense<0.000000e+00> : vector<2x256xf32>
    %165 = tpu.matmul %164, %162, %cst_175 {dimension_numbers = #tpu.dot_dimension_numbers<[1], [0], [0], [1], [0, 0, 1, 1], [], []>} : vector<2x24xf32>, vector<24x256xf32>, vector<2x256xf32> -> vector<2x256xf32>
    %166 = arith.addf %159, %165 : vector<2x256xf32>
    %c3_176 = arith.constant 3 : index
    %c0_177 = arith.constant 0 : index
    %c0_178 = arith.constant 0 : index
    %167 = vector.load %arg8[%c3_176, %c0_177, %c0_178] : memref<9x256x256xf32, #tpu.memory_space<vmem>>, vector<1x256x256xf32>
    %168 = vector.shape_cast %167 : vector<1x256x256xf32> to vector<256x256xf32>
    %cst_179 = arith.constant dense<0.000000e+00> : vector<24x256xf32>
    %169 = tpu.matmul %144, %168, %cst_179 {dimension_numbers = #tpu.dot_dimension_numbers<[1], [0], [0], [1], [0, 0, 1, 1], [], []>} : vector<24x256xf32>, vector<256x256xf32>, vector<24x256xf32> -> vector<24x256xf32>
    %c3_180 = arith.constant 3 : index
    %c0_181 = arith.constant 0 : index
    %c0_182 = arith.constant 0 : index
    %170 = vector.load %arg6[%c3_180, %c0_181, %c0_182] : memref<9x2x24xf32, #tpu.memory_space<vmem>>, vector<1x2x24xf32>
    %171 = vector.shape_cast %170 : vector<1x2x24xf32> to vector<2x24xf32>
    %cst_183 = arith.constant dense<0.000000e+00> : vector<2x256xf32>
    %172 = tpu.matmul %171, %169, %cst_183 {dimension_numbers = #tpu.dot_dimension_numbers<[1], [0], [0], [1], [0, 0, 1, 1], [], []>} : vector<2x24xf32>, vector<24x256xf32>, vector<2x256xf32> -> vector<2x256xf32>
    %173 = arith.addf %166, %172 : vector<2x256xf32>
    %c4_184 = arith.constant 4 : index
    %c0_185 = arith.constant 0 : index
    %c0_186 = arith.constant 0 : index
    %174 = vector.load %arg8[%c4_184, %c0_185, %c0_186] : memref<9x256x256xf32, #tpu.memory_space<vmem>>, vector<1x256x256xf32>
    %175 = vector.shape_cast %174 : vector<1x256x256xf32> to vector<256x256xf32>
    %cst_187 = arith.constant dense<0.000000e+00> : vector<24x256xf32>
    %176 = tpu.matmul %144, %175, %cst_187 {dimension_numbers = #tpu.dot_dimension_numbers<[1], [0], [0], [1], [0, 0, 1, 1], [], []>} : vector<24x256xf32>, vector<256x256xf32>, vector<24x256xf32> -> vector<24x256xf32>
    %c4_188 = arith.constant 4 : index
    %c0_189 = arith.constant 0 : index
    %c0_190 = arith.constant 0 : index
    %177 = vector.load %arg6[%c4_188, %c0_189, %c0_190] : memref<9x2x24xf32, #tpu.memory_space<vmem>>, vector<1x2x24xf32>
    %178 = vector.shape_cast %177 : vector<1x2x24xf32> to vector<2x24xf32>
    %cst_191 = arith.constant dense<0.000000e+00> : vector<2x256xf32>
    %179 = tpu.matmul %178, %176, %cst_191 {dimension_numbers = #tpu.dot_dimension_numbers<[1], [0], [0], [1], [0, 0, 1, 1], [], []>} : vector<2x24xf32>, vector<24x256xf32>, vector<2x256xf32> -> vector<2x256xf32>
    %180 = arith.addf %173, %179 : vector<2x256xf32>
    %c5_192 = arith.constant 5 : index
    %c0_193 = arith.constant 0 : index
    %c0_194 = arith.constant 0 : index
    %181 = vector.load %arg8[%c5_192, %c0_193, %c0_194] : memref<9x256x256xf32, #tpu.memory_space<vmem>>, vector<1x256x256xf32>
    %182 = vector.shape_cast %181 : vector<1x256x256xf32> to vector<256x256xf32>
    %cst_195 = arith.constant dense<0.000000e+00> : vector<24x256xf32>
    %183 = tpu.matmul %144, %182, %cst_195 {dimension_numbers = #tpu.dot_dimension_numbers<[1], [0], [0], [1], [0, 0, 1, 1], [], []>} : vector<24x256xf32>, vector<256x256xf32>, vector<24x256xf32> -> vector<24x256xf32>
    %c5_196 = arith.constant 5 : index
    %c0_197 = arith.constant 0 : index
    %c0_198 = arith.constant 0 : index
    %184 = vector.load %arg6[%c5_196, %c0_197, %c0_198] : memref<9x2x24xf32, #tpu.memory_space<vmem>>, vector<1x2x24xf32>
    %185 = vector.shape_cast %184 : vector<1x2x24xf32> to vector<2x24xf32>
    %cst_199 = arith.constant dense<0.000000e+00> : vector<2x256xf32>
    %186 = tpu.matmul %185, %183, %cst_199 {dimension_numbers = #tpu.dot_dimension_numbers<[1], [0], [0], [1], [0, 0, 1, 1], [], []>} : vector<2x24xf32>, vector<24x256xf32>, vector<2x256xf32> -> vector<2x256xf32>
    %187 = arith.addf %180, %186 : vector<2x256xf32>
    %c6_200 = arith.constant 6 : index
    %c0_201 = arith.constant 0 : index
    %c0_202 = arith.constant 0 : index
    %188 = vector.load %arg8[%c6_200, %c0_201, %c0_202] : memref<9x256x256xf32, #tpu.memory_space<vmem>>, vector<1x256x256xf32>
    %189 = vector.shape_cast %188 : vector<1x256x256xf32> to vector<256x256xf32>
    %cst_203 = arith.constant dense<0.000000e+00> : vector<24x256xf32>
    %190 = tpu.matmul %144, %189, %cst_203 {dimension_numbers = #tpu.dot_dimension_numbers<[1], [0], [0], [1], [0, 0, 1, 1], [], []>} : vector<24x256xf32>, vector<256x256xf32>, vector<24x256xf32> -> vector<24x256xf32>
    %c6_204 = arith.constant 6 : index
    %c0_205 = arith.constant 0 : index
    %c0_206 = arith.constant 0 : index
    %191 = vector.load %arg6[%c6_204, %c0_205, %c0_206] : memref<9x2x24xf32, #tpu.memory_space<vmem>>, vector<1x2x24xf32>
    %192 = vector.shape_cast %191 : vector<1x2x24xf32> to vector<2x24xf32>
    %cst_207 = arith.constant dense<0.000000e+00> : vector<2x256xf32>
    %193 = tpu.matmul %192, %190, %cst_207 {dimension_numbers = #tpu.dot_dimension_numbers<[1], [0], [0], [1], [0, 0, 1, 1], [], []>} : vector<2x24xf32>, vector<24x256xf32>, vector<2x256xf32> -> vector<2x256xf32>
    %194 = arith.addf %187, %193 : vector<2x256xf32>
    %c7_208 = arith.constant 7 : index
    %c0_209 = arith.constant 0 : index
    %c0_210 = arith.constant 0 : index
    %195 = vector.load %arg8[%c7_208, %c0_209, %c0_210] : memref<9x256x256xf32, #tpu.memory_space<vmem>>, vector<1x256x256xf32>
    %196 = vector.shape_cast %195 : vector<1x256x256xf32> to vector<256x256xf32>
    %cst_211 = arith.constant dense<0.000000e+00> : vector<24x256xf32>
    %197 = tpu.matmul %144, %196, %cst_211 {dimension_numbers = #tpu.dot_dimension_numbers<[1], [0], [0], [1], [0, 0, 1, 1], [], []>} : vector<24x256xf32>, vector<256x256xf32>, vector<24x256xf32> -> vector<24x256xf32>
    %c7_212 = arith.constant 7 : index
    %c0_213 = arith.constant 0 : index
    %c0_214 = arith.constant 0 : index
    %198 = vector.load %arg6[%c7_212, %c0_213, %c0_214] : memref<9x2x24xf32, #tpu.memory_space<vmem>>, vector<1x2x24xf32>
    %199 = vector.shape_cast %198 : vector<1x2x24xf32> to vector<2x24xf32>
    %cst_215 = arith.constant dense<0.000000e+00> : vector<2x256xf32>
    %200 = tpu.matmul %199, %197, %cst_215 {dimension_numbers = #tpu.dot_dimension_numbers<[1], [0], [0], [1], [0, 0, 1, 1], [], []>} : vector<2x24xf32>, vector<24x256xf32>, vector<2x256xf32> -> vector<2x256xf32>
    %201 = arith.addf %194, %200 : vector<2x256xf32>
    %c8_216 = arith.constant 8 : index
    %c0_217 = arith.constant 0 : index
    %c0_218 = arith.constant 0 : index
    %202 = vector.load %arg8[%c8_216, %c0_217, %c0_218] : memref<9x256x256xf32, #tpu.memory_space<vmem>>, vector<1x256x256xf32>
    %203 = vector.shape_cast %202 : vector<1x256x256xf32> to vector<256x256xf32>
    %cst_219 = arith.constant dense<0.000000e+00> : vector<24x256xf32>
    %204 = tpu.matmul %144, %203, %cst_219 {dimension_numbers = #tpu.dot_dimension_numbers<[1], [0], [0], [1], [0, 0, 1, 1], [], []>} : vector<24x256xf32>, vector<256x256xf32>, vector<24x256xf32> -> vector<24x256xf32>
    %c8_220 = arith.constant 8 : index
    %c0_221 = arith.constant 0 : index
    %c0_222 = arith.constant 0 : index
    %205 = vector.load %arg6[%c8_220, %c0_221, %c0_222] : memref<9x2x24xf32, #tpu.memory_space<vmem>>, vector<1x2x24xf32>
    %206 = vector.shape_cast %205 : vector<1x2x24xf32> to vector<2x24xf32>
    %cst_223 = arith.constant dense<0.000000e+00> : vector<2x256xf32>
    %207 = tpu.matmul %206, %204, %cst_223 {dimension_numbers = #tpu.dot_dimension_numbers<[1], [0], [0], [1], [0, 0, 1, 1], [], []>} : vector<2x24xf32>, vector<24x256xf32>, vector<2x256xf32> -> vector<2x256xf32>
    %208 = arith.addf %201, %207 : vector<2x256xf32>
    %c0_224 = arith.constant 0 : index
    %c0_225 = arith.constant 0 : index
    %209 = vector.load %arg7[%c0_224, %c0_225] : memref<2x1xf32, #tpu.memory_space<vmem>>, vector<2x1xf32>
    %210 = vector.broadcast %209 : vector<2x1xf32> to vector<2x256xf32>
    %211 = arith.addf %208, %210 : vector<2x256xf32>
    %c0_226 = arith.constant 0 : index
    %c0_227 = arith.constant 0 : index
    %c0_228 = arith.constant 0 : index
    %212 = vector.load %arg12[%c0_226, %c0_227, %c0_228] : memref<1x2x256xf32, #tpu.memory_space<vmem>>, vector<1x2x256xf32>
    %213 = vector.shape_cast %212 : vector<1x2x256xf32> to vector<2x256xf32>
    %214 = vector.shape_cast %211 : vector<2x256xf32> to vector<1x2x256xf32>
    tpu.vector_store %arg12[%c0_226, %c0_227, %c0_228], %214 {strides = array<i32>} : memref<1x2x256xf32, #tpu.memory_space<vmem>>, vector<1x2x256xf32>,
    return
  }
  func.func @transform_0(%arg0: i32) -> (i32, i32, i32) {
    %c0_i32 = arith.constant 0 : i32
    %c0_i32_0 = arith.constant 0 : i32
    %c0_i32_1 = arith.constant 0 : i32
    return %arg0, %c0_i32, %c0_i32_0 : i32, i32, i32
  }
  func.func @transform_1(%arg0: i32) -> (i32, i32, i32) {
    %c0_i32 = arith.constant 0 : i32
    %c0_i32_0 = arith.constant 0 : i32
    %c0_i32_1 = arith.constant 0 : i32
    %c0_i32_2 = arith.constant 0 : i32
    return %c0_i32, %c0_i32_0, %c0_i32_1 : i32, i32, i32
  }
  func.func @transform_2(%arg0: i32) -> (i32, i32) {
    %c0_i32 = arith.constant 0 : i32
    %c0_i32_0 = arith.constant 0 : i32
    %c0_i32_1 = arith.constant 0 : i32
    return %c0_i32, %c0_i32_0 : i32, i32
  }
  func.func @transform_3(%arg0: i32) -> (i32, i32, i32) {
    %c0_i32 = arith.constant 0 : i32
    %c0_i32_0 = arith.constant 0 : i32
    %c0_i32_1 = arith.constant 0 : i32
    %c0_i32_2 = arith.constant 0 : i32
    return %c0_i32, %c0_i32_0, %c0_i32_1 : i32, i32, i32
  }
  func.func @transform_4(%arg0: i32) -> (i32, i32) {
    %c0_i32 = arith.constant 0 : i32
    %c0_i32_0 = arith.constant 0 : i32
    %c0_i32_1 = arith.constant 0 : i32
    return %c0_i32, %c0_i32_0 : i32, i32
  }
  func.func @transform_5(%arg0: i32) -> (i32, i32, i32) {
    %c0_i32 = arith.constant 0 : i32
    %c0_i32_0 = arith.constant 0 : i32
    %c0_i32_1 = arith.constant 0 : i32
    %c0_i32_2 = arith.constant 0 : i32
    return %c0_i32, %c0_i32_0, %c0_i32_1 : i32, i32, i32
  }
  func.func @transform_6(%arg0: i32) -> (i32, i32) {
    %c0_i32 = arith.constant 0 : i32
    %c0_i32_0 = arith.constant 0 : i32
    %c0_i32_1 = arith.constant 0 : i32
    return %c0_i32, %c0_i32_0 : i32, i32
  }
  func.func @transform_7(%arg0: i32) -> (i32, i32, i32) {
    %c0_i32 = arith.constant 0 : i32
    %c0_i32_0 = arith.constant 0 : i32
    %c0_i32_1 = arith.constant 0 : i32
    %c0_i32_2 = arith.constant 0 : i32
    return %c0_i32, %c0_i32_0, %c0_i32_1 : i32, i32, i32
  }
  func.func @transform_8(%arg0: i32) -> (i32, i32, i32) {
    %c0_i32 = arith.constant 0 : i32
    %c0_i32_0 = arith.constant 0 : i32
    %c0_i32_1 = arith.constant 0 : i32
    %c0_i32_2 = arith.constant 0 : i32
    return %c0_i32, %c0_i32_0, %c0_i32_1 : i32, i32, i32
  }
  func.func @transform_9(%arg0: i32) -> (i32, i32) {
    %c0_i32 = arith.constant 0 : i32
    %c0_i32_0 = arith.constant 0 : i32
    %c0_i32_1 = arith.constant 0 : i32
    return %c0_i32, %c0_i32_0 : i32, i32
  }
  func.func @transform_10(%arg0: i32) -> (i32, i32) {
    %c0_i32 = arith.constant 0 : i32
    %c0_i32_0 = arith.constant 0 : i32
    %c0_i32_1 = arith.constant 0 : i32
    return %c0_i32, %c0_i32_0 : i32, i32
  }
  func.func @transform_11(%arg0: i32) -> (i32, i32, i32) {
    %c0_i32 = arith.constant 0 : i32
    %c0_i32_0 = arith.constant 0 : i32
    %c0_i32_1 = arith.constant 0 : i32
    return %arg0, %c0_i32, %c0_i32_0 : i32, i32, i32
  }
}

</mosaic_0001>

<bundles_post_ra>
// kernel: forward.1
= control target key start
LH: loop header
LB: loop body
LE: loop exit
PB: predicated region body
PF: predicated region fallthrough
CT: control target
= control target key end

     0   :  { %16 = vsyncpa [#allocation3], 0  ;;  %s7640_s0 = inlined_call_operand.vmem [shape: f32[2,2,256], index: 0, kind: input, shape index: {}]   ;;  %s7641_s1 = inlined_call_operand.vmem [shape: f32[9,8,2], index: 1, kind: input, shape index: {}]   ;;  %s7642_s2 = inlined_call_operand.vmem [shape: f32[8,1], index: 2, kind: input, shape index: {}]   ;;  %s7643_s3 = inlined_call_operand.vmem [shape: f32[9,16,8], index: 3, kind: input, shape index: {}]   ;;  %s7644_s4 = inlined_call_operand.vmem [shape: f32[16,1], index: 4, kind: input, shape index: {}]   ;;  %s7645_s5 = inlined_call_operand.hbm [shape: f32[9,2,24], index: 5, kind: input, shape index: {}]   ;;  %s7646_s6 = inlined_call_operand.vmem [shape: f32[2,1], index: 6, kind: input, shape index: {}]   ;;  %s7647_s7 = inlined_call_operand.hbm [shape: f32[9,256,256], index: 7, kind: input, shape index: {}]   ;;  %s7648_s8 = inlined_call_operand.hbm [shape: f32[9,64,64], index: 8, kind: input, shape index: {}]   ;;  %s7649_s9 = inlined_call_operand.hbm [shape: f32[256,64], index: 9, kind: input, shape index: {}]   ;;  %s7650_s10 = inlined_call_operand.hbm [shape: f32[64,256], index: 10, kind: input, shape index: {}]   ;;  %s7651_s11 = inlined_call_operand.vmem [shape: f32[2,2,256], index: 11, kind: output, shape index: {}]  }
   0x1   :  { %17 = vsyncpa [#allocation5], 0 }
   0x2   :  { %18 = vsyncpa [#allocation8], 0  ;;  %s7073_s17 = smov 0  }
   0x3 LB: > { %s6999_s18 = smov [#allocation4]   ;;  %s7079_s20 = sadd.s32 4294967295, %s6997_s17   ;;  %s6997_s17 = sphi %s7073_s17, %s24_s17  }
   0x4   : > { %s331_s19 = sshll.u32 %s6999_s18, 4  ;;  %p5731_p0 = scmp.ge.s32.totalorder %s6997_s17, 1  ;;  %s332_s19 = int_to_ptr.vmem [resolvable:$true] %s331_s19 }
   0x5   : > { %p291_p1 = scmp.lt.s32.totalorder %s6997_s17, 3  ;;  %p6238_p2 = scmp.eq.s32.totalorder %s7079_s20, 0 }
   0x6   : > { %s7000_s23 = smov [#allocation7]   ;;  %s7001_s25 = smov [#allocation2]  }
   0x7   : > { %p7084_p3 = pnand %p5731_p0, %p291_p1  ;;  %s357_s24 = sshll.u32 %s7000_s23, 4  ;;  %s7096_s24 = int_to_ptr.vmem [resolvable:$true] %s357_s24 }
   0x8   : > { %s315_s26 = sshll.u32 %s7001_s25, 4  ;;  %s6860_s28 = scalar_lea.vmem %s332_s19, 73728  ;;  %s7098_s26 = int_to_ptr.vmem [resolvable:$true] %s315_s26 }
   0x9   : > { %p6222_p4 = pneg %p7084_p3  ;;  %p6861_p7 = scmp.ne.s32.totalorder %s332_s19, %s6860_s28 }
   0xa   : > { %p6868_p10 = scmp.lt.s32.totalorder %s332_s19, %s332_s19  ;;  %p6869_p11 = scmp.lt.s32.totalorder %s6860_s28, %s6860_s28 }
   0xb   : > { %p7092_p5 = pnand %p6238_p2, %p6222_p4 }
   0xc   : > { %p6870_p12 = por %p6869_p11, %p6868_p10 }
   0xd   : > { %p7102_p6 = pneg %p7092_p5 }
   0xf   : > { %p6863_p8 = pnand %p6861_p7, %p7102_p6 }
  0x11   : > { %p6864_p9 = pneg %p6863_p8 }
  0x13   : > { %p6871_p13 = pnand %p6870_p12, %p6864_p9 }
  0x15   : > { %6874 = shalt.err (!%p6871_p13)
}
  0x16   : > { %s7002_s29 = smov 256   ;;  %s7003_s30 = smov 16  }
  0x17   : > { %6228 = dma.hbm_to_vmem [thread:$0]  (!%p7092_p5), %s7647_s7, 73728, %s332_s19, [#allocation5], %s7002_s29, %s7002_s29, %s7003_s30  }
  0x18   : > { %s6886_s14 = scalar_lea.vmem %s7096_s24, 4096  ;;  %p6894_p7 = scmp.lt.s32.totalorder %s7096_s24, %s7096_s24 }
  0x19   : > { %p6887_p0 = scmp.ne.s32.totalorder %s7096_s24, %s6886_s14  ;;  %p6895_p8 = scmp.lt.s32.totalorder %s6886_s14, %s6886_s14 }
  0x1b   : > { %p6889_p1 = pnand %p6887_p0, %p7102_p6  ;;  %p6896_p9 = por %p6895_p8, %p6894_p7 }
  0x1d   : > { %p6890_p4 = pneg %p6889_p1 }
  0x1f   : > { %p6897_p10 = pnand %p6896_p9, %p6890_p4 }
  0x21   : > { %6900 = shalt.err (!%p6897_p10)
}
  0x22   : > { %s7004_s15 = smov 128   ;;  %s7005_s16 = smov 8  }
  0x23   : > { %6234 = dma.hbm_to_vmem [thread:$0]  (!%p7092_p5), %s7649_s9, 4096, %s7096_s24, [#allocation8], %s7004_s15, %s7004_s15, %s7005_s16  }
  0x24   : > { %s6912_s23 = scalar_lea.vmem %s7098_s26, 288  ;;  %p6920_p0 = scmp.lt.s32.totalorder %s7098_s26, %s7098_s26 }
  0x25   : > { %p6913_p11 = scmp.ne.s32.totalorder %s7098_s26, %s6912_s23  ;;  %p6921_p1 = scmp.lt.s32.totalorder %s6912_s23, %s6912_s23 }
  0x27   : > { %p6915_p12 = pnand %p6913_p11, %p7102_p6  ;;  %p6922_p4 = por %p6921_p1, %p6920_p0 }
  0x29   : > { %p6916_p13 = pneg %p6915_p12 }
  0x2b   : > { %p6923_p7 = pnand %p6922_p4, %p6916_p13 }
  0x2d   : > { %6926 = shalt.err (!%p6923_p7)
}
  0x2e   : > { %s7006_s25 = smov 32   ;;  %s7007_s28 = smov 2  }
  0x2f   : > { %6225 = dma.hbm_to_vmem [thread:$0]  (!%p7092_p5), %s7645_s5, 288, %s7098_s26, [#allocation3], %s7006_s25, %s7006_s25, %s7007_s28  }
  0x30   : > { %s7008_s24 = smov [#allocation6]   ;;  %s7009_s18 = smov [#allocation9]  }
  0x31   : > { %s344_s14 = sshll.u32 %s7008_s24, 4  ;;  %s370_s19 = sshll.u32 %s7009_s18, 4  ;;  %s345_s14 = int_to_ptr.vmem [resolvable:$true] %s344_s14  ;;  %s371_s19 = int_to_ptr.vmem [resolvable:$true] %s370_s19 }
  0x32   : > { %s6938_s23 = scalar_lea.vmem %s345_s14, 9216  ;;  %p6946_p11 = scmp.lt.s32.totalorder %s345_s14, %s345_s14 }
  0x33   : > { %p6939_p8 = scmp.ne.s32.totalorder %s345_s14, %s6938_s23  ;;  %p6947_p12 = scmp.lt.s32.totalorder %s6938_s23, %s6938_s23 }
  0x35   : > { %p6941_p9 = pnand %p6939_p8, %p7102_p6  ;;  %p6948_p13 = por %p6947_p12, %p6946_p11 }
  0x37   : > { %p6942_p10 = pneg %p6941_p9 }
  0x39   : > { %p6949_p0 = pnand %p6948_p13, %p6942_p10 }
  0x3b   : > { %6952 = shalt.err (!%p6949_p0)
}
  0x3c   : > { %6231 = dma.hbm_to_vmem [thread:$0]  (!%p7092_p5), %s7648_s8, 9216, %s345_s14, [#allocation5], %s7004_s15, %s7004_s15, %s7005_s16  }
  0x3d   : > { %s6964_s28 = scalar_lea.vmem %s371_s19, 2048  ;;  %p6972_p8 = scmp.lt.s32.totalorder %s371_s19, %s371_s19 }
  0x3e   : > { %p6965_p1 = scmp.ne.s32.totalorder %s371_s19, %s6964_s28  ;;  %p6973_p9 = scmp.lt.s32.totalorder %s6964_s28, %s6964_s28 }
  0x40   : > { %p6967_p4 = pnand %p6965_p1, %p7102_p6  ;;  %p6974_p11 = por %p6973_p9, %p6972_p8 }
  0x42   : > { %p6968_p7 = pneg %p6967_p4 }
  0x44   : > { %p6975_p10 = pnand %p6974_p11, %p6968_p7 }
  0x46   : > { %6978 = shalt.err (!%p6975_p10)
}
  0x47   : > { %6237 = dma.hbm_to_vmem [thread:$0]  (!%p7092_p5), %s7650_s10, 2048, %s371_s19, [#allocation8], %s7002_s29, %s7002_s29, %s7003_s30  }
  0x48   : > { %394 = sbr.rel (%p7084_p3) target bundleno = 5918 (0x171e), region = 64 }
  0x4d   : > { %6984 = dma.done.wait (%p6238_p2), [#allocation3], 288  }
  0x4e   : > { %6986 = vsyncadd (%p6238_p2), [#allocation3], 4294967008 }
  0x4f   : > { %6988 = dma.done.wait (%p6238_p2), [#allocation5], 82944  }
  0x50   : > { %6990 = vsyncadd (%p6238_p2), [#allocation5], 4294884352 }
  0x51   : > { %6992 = dma.done.wait (%p6238_p2), [#allocation8], 6144  }
  0x52   : > { %6994 = vsyncadd (%p6238_p2), [#allocation8], 4294961152  ;;  %v492_v0 = vld [vmem:[#allocation4 + $0xf8] sm:$0xff]  ;;  %v491_v2 = vld [vmem:[#allocation4 + $0xf0] sm:$0xff]  ;;  %p450_p2 = scmp.lt.s32.totalorder %s7079_s20, 1  ;;  %vm750_vm0 = vcmask 1041408  }
  0x53   : > { %v640_v1 = vld [vmem:[#allocation4 + $0x2f8] sm:$0xff]  ;;  %536 = vmatprep.subr.mxu0 %v492_v0  ;;  %v639_v3 = vld [vmem:[#allocation4 + $0x2f0] sm:$0xff]  ;;  %v490_v4 = vld [vmem:[#allocation4 + $0xe8] sm:$0xff]  ;;  %vm746_vm1 = vcmask 15360   ;;  %vm7012_vm2 = vmmov 0   ;;  %vm2568_vm3 = vcmask 523264  }
  0x54   : > { %673 = vmatprep.subr.mxu1 %v640_v1  ;;  %v638_v5 = vld [vmem:[#allocation4 + $0x2e8] sm:$0xff]  ;;  %537 = vmatpush1.msra.mxu0 %v491_v2  ;;  %v489_v6 = vld [vmem:[#allocation4 + $0xe0] sm:$0xff]  ;;  %v488_v8 = vld [vmem:[#allocation4 + $0xd8] sm:$0xff]  ;;  %s7656_s20 = smov (!%p450_p2, %s7079_s20), 1  ;;  %vm2726_vm4 = vcmask 64512   ;;  %vm4328_vm5 = vcmask 195584  }
  0x55   : > { %674 = vmatpush1.msra.mxu1 %v639_v3  ;;  %v637_v7 = vld [vmem:[#allocation4 + $0x2e0] sm:$0xff]  ;;  %538 = vmatprep.subr.mxu0 %v490_v4  ;;  %v636_v9 = vld [vmem:[#allocation4 + $0x2d8] sm:$0xff]  ;;  %v487_v10 = vld [vmem:[#allocation4 + $0xd0] sm:$0xff]  ;;  %s5841_s21 = sshll.u32 %s7656_s20, 2 }
  0x56   : > { %675 = vmatprep.subr.mxu1 %v638_v5  ;;  %v635_v11 = vld [vmem:[#allocation4 + $0x2d0] sm:$0xff]  ;;  %539 = vmatpush1.msra.mxu0 %v489_v6  ;;  %v486_v12 = vld [vmem:[#allocation4 + $0xc8] sm:$0xff]  ;;  %v485_v14 = vld [vmem:[#allocation4 + $0xc0] sm:$0xff]  ;;  %s7189_s29 = scalar_lea.vmem %s7640_s0, %s5841_s21  ;;  %s459_s30 = scalar_lea.vmem %s7651_s11, %s5841_s21 }
  0x57   : > { %676 = vmatpush1.msra.mxu1 %v637_v7  ;;  %v634_v13 = vld [vmem:[#allocation4 + $0x2c8] sm:$0xff]  ;;  %540 = vmatprep.subr.mxu0 %v488_v8  ;;  %v633_v15 = vld [vmem:[#allocation4 + $0x2c0] sm:$0xff]  ;;  %v484_v16 = vld [vmem:[#allocation4 + $0xb8] sm:$0xff] }
  0x58   : > { %677 = vmatprep.subr.mxu1 %v636_v9  ;;  %541 = vmatpush1.msra.mxu0 %v487_v10  ;;  %v632_v17 = vld [vmem:[#allocation4 + $0x2b8] sm:$0xff]  ;;  %v483_v18 = vld [vmem:[#allocation4 + $0xb0] sm:$0xff]  ;;  %v482_v20 = vld [vmem:[#allocation4 + $0xa8] sm:$0xff] }
  0x59   : > { %678 = vmatpush1.msra.mxu1 %v635_v11  ;;  %542 = vmatprep.subr.mxu0 %v486_v12  ;;  %v631_v19 = vld [vmem:[#allocation4 + $0x2b0] sm:$0xff]  ;;  %v630_v21 = vld [vmem:[#allocation4 + $0x2a8] sm:$0xff]  ;;  %v481_v22 = vld [vmem:[#allocation4 + $0xa0] sm:$0xff] }
  0x5a   : > { %679 = vmatprep.subr.mxu1 %v634_v13  ;;  %543 = vmatpush1.msra.mxu0 %v485_v14  ;;  %v629_v23 = vld [vmem:[#allocation4 + $0x2a0] sm:$0xff]  ;;  %v480_v24 = vld [vmem:[#allocation4 + $0x98] sm:$0xff]  ;;  %v479_v26 = vld [vmem:[#allocation4 + $0x90] sm:$0xff] }
  0x5b   : > { %680 = vmatpush1.msra.mxu1 %v633_v15  ;;  %544 = vmatprep.subr.mxu0 %v484_v16  ;;  %v628_v25 = vld [vmem:[#allocation4 + $0x298] sm:$0xff]  ;;  %v627_v27 = vld [vmem:[#allocation4 + $0x290] sm:$0xff]  ;;  %v478_v28 = vld [vmem:[#allocation4 + $0x88] sm:$0xff] }
  0x5c   : > { %681 = vmatprep.subr.mxu1 %v632_v17  ;;  %545 = vmatpush1.msra.mxu0 %v483_v18  ;;  %v626_v29 = vld [vmem:[#allocation4 + $0x288] sm:$0xff]  ;;  %v477_v30 = vld [vmem:[#allocation4 + $0x80] sm:$0xff]  ;;  %v476_v32 = vld [vmem:[#allocation4 + $0x78] sm:$0xff] }
  0x5d   : > { %682 = vmatpush1.msra.mxu1 %v631_v19  ;;  %546 = vmatprep.subr.mxu0 %v482_v20  ;;  %v625_v31 = vld [vmem:[#allocation4 + $0x280] sm:$0xff]  ;;  %v624_v33 = vld [vmem:[#allocation4 + $0x278] sm:$0xff]  ;;  %v475_v34 = vld [vmem:[#allocation4 + $0x70] sm:$0xff] }
  0x5e   : > { %683 = vmatprep.subr.mxu1 %v630_v21  ;;  %547 = vmatpush1.msra.mxu0 %v481_v22  ;;  %v623_v35 = vld [vmem:[#allocation4 + $0x270] sm:$0xff]  ;;  %v474_v36 = vld [vmem:[#allocation4 + $0x68] sm:$0xff]  ;;  %v473_v38 = vld [vmem:[#allocation4 + $0x60] sm:$0xff] }
  0x5f   : > { %684 = vmatpush1.msra.mxu1 %v629_v23  ;;  %548 = vmatprep.subr.mxu0 %v480_v24  ;;  %v622_v37 = vld [vmem:[#allocation4 + $0x268] sm:$0xff]  ;;  %v621_v39 = vld [vmem:[#allocation4 + $0x260] sm:$0xff]  ;;  %v472_v40 = vld [vmem:[#allocation4 + $0x58] sm:$0xff] }
  0x60   : > { %685 = vmatprep.subr.mxu1 %v628_v25  ;;  %549 = vmatpush1.msra.mxu0 %v479_v26  ;;  %v620_v41 = vld [vmem:[#allocation4 + $0x258] sm:$0xff]  ;;  %v471_v42 = vld [vmem:[#allocation4 + $0x50] sm:$0xff]  ;;  %v470_v44 = vld [vmem:[#allocation4 + $0x48] sm:$0xff] }
  0x61   : > { %686 = vmatpush1.msra.mxu1 %v627_v27  ;;  %550 = vmatprep.subr.mxu0 %v478_v28  ;;  %v619_v43 = vld [vmem:[#allocation4 + $0x250] sm:$0xff]  ;;  %v618_v45 = vld [vmem:[#allocation4 + $0x248] sm:$0xff]  ;;  %v469_v46 = vld [vmem:[#allocation4 + $0x40] sm:$0xff] }
  0x62   : > { %687 = vmatprep.subr.mxu1 %v626_v29  ;;  %551 = vmatpush1.msra.mxu0 %v477_v30  ;;  %v617_v47 = vld [vmem:[#allocation4 + $0x240] sm:$0xff]  ;;  %v468_v48 = vld [vmem:[#allocation4 + $0x38] sm:$0xff]  ;;  %v467_v50 = vld [vmem:[#allocation4 + $0x30] sm:$0xff] }
  0x63   : > { %688 = vmatpush1.msra.mxu1 %v625_v31  ;;  %552 = vmatprep.subr.mxu0 %v476_v32  ;;  %v616_v49 = vld [vmem:[#allocation4 + $0x238] sm:$0xff]  ;;  %v615_v51 = vld [vmem:[#allocation4 + $0x230] sm:$0xff]  ;;  %v466_v52 = vld [vmem:[#allocation4 + $0x28] sm:$0xff] }
  0x64   : > { %689 = vmatprep.subr.mxu1 %v624_v33  ;;  %553 = vmatpush1.msra.mxu0 %v475_v34  ;;  %v614_v53 = vld [vmem:[#allocation4 + $0x228] sm:$0xff]  ;;  %v465_v54 = vld [vmem:[#allocation4 + $0x20] sm:$0xff]  ;;  %v464_v56 = vld [vmem:[#allocation4 + $0x18] sm:$0xff] }
  0x65   : > { %690 = vmatpush1.msra.mxu1 %v623_v35  ;;  %554 = vmatprep.subr.mxu0 %v474_v36  ;;  %v613_v55 = vld [vmem:[#allocation4 + $0x220] sm:$0xff]  ;;  %v612_v57 = vld [vmem:[#allocation4 + $0x218] sm:$0xff]  ;;  %v463_v58 = vld [vmem:[#allocation4 + $0x10] sm:$0xff] }
  0x66   : > { %691 = vmatprep.subr.mxu1 %v622_v37  ;;  %555 = vmatpush1.msra.mxu0 %v473_v38  ;;  %v611_v59 = vld [vmem:[#allocation4 + $0x210] sm:$0xff]  ;;  %v462_v60 = vld [vmem:[#allocation4 + $0x8] sm:$0xff]  ;;  %v461_v62 = vld [vmem:[#allocation4] sm:$0xff] }
  0x67   : > { %692 = vmatpush1.msra.mxu1 %v621_v39  ;;  %556 = vmatprep.subr.mxu0 %v472_v40  ;;  %v610_v61 = vld [vmem:[#allocation4 + $0x208] sm:$0xff]  ;;  %v609_v63 = vld [vmem:[#allocation4 + $0x200] sm:$0xff]  ;;  %v524_v0 = vld [vmem:[#allocation4 + $0x1f8] sm:$0xff] }
  0x68   : > { %693 = vmatprep.subr.mxu1 %v620_v41  ;;  %557 = vmatpush1.msra.mxu0 %v471_v42  ;;  %v672_v1 = vld [vmem:[#allocation4 + $0x3f8] sm:$0xff]  ;;  %v523_v2 = vld [vmem:[#allocation4 + $0x1f0] sm:$0xff]  ;;  %v522_v4 = vld [vmem:[#allocation4 + $0x1e8] sm:$0xff] }
  0x69   : > { %694 = vmatpush1.msra.mxu1 %v619_v43  ;;  %558 = vmatprep.subr.mxu0 %v470_v44  ;;  %v671_v3 = vld [vmem:[#allocation4 + $0x3f0] sm:$0xff]  ;;  %v670_v5 = vld [vmem:[#allocation4 + $0x3e8] sm:$0xff]  ;;  %v521_v6 = vld [vmem:[#allocation4 + $0x1e0] sm:$0xff] }
  0x6a   : > { %695 = vmatprep.subr.mxu1 %v618_v45  ;;  %559 = vmatpush1.msra.mxu0 %v469_v46  ;;  %v669_v7 = vld [vmem:[#allocation4 + $0x3e0] sm:$0xff]  ;;  %v520_v8 = vld [vmem:[#allocation4 + $0x1d8] sm:$0xff]  ;;  %v519_v10 = vld [vmem:[#allocation4 + $0x1d0] sm:$0xff] }
  0x6b   : > { %696 = vmatpush1.msra.mxu1 %v617_v47  ;;  %560 = vmatprep.subr.mxu0 %v468_v48  ;;  %v668_v9 = vld [vmem:[#allocation4 + $0x3d8] sm:$0xff]  ;;  %v667_v11 = vld [vmem:[#allocation4 + $0x3d0] sm:$0xff]  ;;  %v518_v12 = vld [vmem:[#allocation4 + $0x1c8] sm:$0xff] }
  0x6c   : > { %697 = vmatprep.subr.mxu1 %v616_v49  ;;  %561 = vmatpush1.msra.mxu0 %v467_v50  ;;  %v666_v13 = vld [vmem:[#allocation4 + $0x3c8] sm:$0xff]  ;;  %v517_v14 = vld [vmem:[#allocation4 + $0x1c0] sm:$0xff]  ;;  %v516_v16 = vld [vmem:[#allocation4 + $0x1b8] sm:$0xff] }
  0x6d   : > { %698 = vmatpush1.msra.mxu1 %v615_v51  ;;  %562 = vmatprep.subr.mxu0 %v466_v52  ;;  %v665_v15 = vld [vmem:[#allocation4 + $0x3c0] sm:$0xff]  ;;  %v664_v17 = vld [vmem:[#allocation4 + $0x3b8] sm:$0xff]  ;;  %v515_v18 = vld [vmem:[#allocation4 + $0x1b0] sm:$0xff] }
  0x6e   : > { %699 = vmatprep.subr.mxu1 %v614_v53  ;;  %563 = vmatpush1.msra.mxu0 %v465_v54  ;;  %v663_v19 = vld [vmem:[#allocation4 + $0x3b0] sm:$0xff]  ;;  %v514_v20 = vld [vmem:[#allocation4 + $0x1a8] sm:$0xff]  ;;  %v513_v22 = vld [vmem:[#allocation4 + $0x1a0] sm:$0xff] }
  0x6f   : > { %700 = vmatpush1.msra.mxu1 %v613_v55  ;;  %564 = vmatprep.subr.mxu0 %v464_v56  ;;  %v662_v21 = vld [vmem:[#allocation4 + $0x3a8] sm:$0xff]  ;;  %v661_v23 = vld [vmem:[#allocation4 + $0x3a0] sm:$0xff]  ;;  %v512_v24 = vld [vmem:[#allocation4 + $0x198] sm:$0xff] }
  0x70   : > { %701 = vmatprep.subr.mxu1 %v612_v57  ;;  %565 = vmatpush1.msra.mxu0 %v463_v58  ;;  %v660_v25 = vld [vmem:[#allocation4 + $0x398] sm:$0xff]  ;;  %v511_v26 = vld [vmem:[#allocation4 + $0x190] sm:$0xff]  ;;  %v510_v28 = vld [vmem:[#allocation4 + $0x188] sm:$0xff] }
  0x71   : > { %702 = vmatpush1.msra.mxu1 %v611_v59  ;;  %566 = vmatprep.subr.mxu0 %v462_v60  ;;  %v659_v27 = vld [vmem:[#allocation4 + $0x390] sm:$0xff]  ;;  %v658_v29 = vld [vmem:[#allocation4 + $0x388] sm:$0xff]  ;;  %v509_v30 = vld [vmem:[#allocation4 + $0x180] sm:$0xff] }
  0x72   : > { %703 = vmatprep.subr.mxu1 %v610_v61  ;;  %567 = vmatpush1.msra.mxu0 %v461_v62  ;;  %v657_v31 = vld [vmem:[#allocation4 + $0x380] sm:$0xff]  ;;  %v508_v32 = vld [vmem:[#allocation4 + $0x178] sm:$0xff]  ;;  %v507_v34 = vld [vmem:[#allocation4 + $0x170] sm:$0xff] }
  0x73   : > { %704 = vmatpush1.msra.mxu1 %v609_v63  ;;  %568 = vmatprep.subr.mxu0 %v524_v0  ;;  %v656_v33 = vld [vmem:[#allocation4 + $0x378] sm:$0xff]  ;;  %v655_v35 = vld [vmem:[#allocation4 + $0x370] sm:$0xff]  ;;  %v506_v36 = vld [vmem:[#allocation4 + $0x168] sm:$0xff] }
  0x74   : > { %705 = vmatprep.subr.mxu1 %v672_v1  ;;  %569 = vmatpush2.msra.mxu0 %v523_v2  ;;  %v654_v37 = vld [vmem:[#allocation4 + $0x368] sm:$0xff]  ;;  %v505_v38 = vld [vmem:[#allocation4 + $0x160] sm:$0xff]  ;;  %v504_v40 = vld [vmem:[#allocation4 + $0x158] sm:$0xff] }
  0x75   : > { %706 = vmatpush2.msra.mxu1 %v671_v3  ;;  %570 = vmatprep.subr.mxu0 %v522_v4  ;;  %v653_v39 = vld [vmem:[#allocation4 + $0x360] sm:$0xff]  ;;  %v652_v41 = vld [vmem:[#allocation4 + $0x358] sm:$0xff]  ;;  %v503_v42 = vld [vmem:[#allocation4 + $0x150] sm:$0xff] }
  0x76   : > { %707 = vmatprep.subr.mxu1 %v670_v5  ;;  %571 = vmatpush2.msra.mxu0 %v521_v6  ;;  %v651_v43 = vld [vmem:[#allocation4 + $0x350] sm:$0xff]  ;;  %v502_v44 = vld [vmem:[#allocation4 + $0x148] sm:$0xff]  ;;  %v501_v46 = vld [vmem:[#allocation4 + $0x140] sm:$0xff] }
  0x77   : > { %708 = vmatpush2.msra.mxu1 %v669_v7  ;;  %572 = vmatprep.subr.mxu0 %v520_v8  ;;  %v650_v45 = vld [vmem:[#allocation4 + $0x348] sm:$0xff]  ;;  %v649_v47 = vld [vmem:[#allocation4 + $0x340] sm:$0xff]  ;;  %v500_v48 = vld [vmem:[#allocation4 + $0x138] sm:$0xff] }
  0x78   : > { %709 = vmatprep.subr.mxu1 %v668_v9  ;;  %573 = vmatpush2.msra.mxu0 %v519_v10  ;;  %v648_v49 = vld [vmem:[#allocation4 + $0x338] sm:$0xff]  ;;  %v499_v50 = vld [vmem:[#allocation4 + $0x130] sm:$0xff]  ;;  %v498_v52 = vld [vmem:[#allocation4 + $0x128] sm:$0xff] }
  0x79   : > { %710 = vmatpush2.msra.mxu1 %v667_v11  ;;  %574 = vmatprep.subr.mxu0 %v518_v12  ;;  %v647_v51 = vld [vmem:[#allocation4 + $0x330] sm:$0xff]  ;;  %v646_v53 = vld [vmem:[#allocation4 + $0x328] sm:$0xff]  ;;  %v497_v54 = vld [vmem:[#allocation4 + $0x120] sm:$0xff] }
  0x7a   : > { %711 = vmatprep.subr.mxu1 %v666_v13  ;;  %575 = vmatpush2.msra.mxu0 %v517_v14  ;;  %v645_v55 = vld [vmem:[#allocation4 + $0x320] sm:$0xff]  ;;  %v7192_v56 = vld.sshfl [vmem:[%s7189_s29] sm:$0x33 pattern:$0x76325410]  ;;  %v496_v57 = vld [vmem:[#allocation4 + $0x118] sm:$0xff] }
  0x7b   : > { %712 = vmatpush2.msra.mxu1 %v665_v15  ;;  %576 = vmatprep.subr.mxu0 %v516_v16  ;;  %v644_v58 = vld [vmem:[#allocation4 + $0x318] sm:$0xff]  ;;  %v495_v59 = vld [vmem:[#allocation4 + $0x110] sm:$0xff]  ;;  %v494_v61 = vld [vmem:[#allocation4 + $0x108] sm:$0xff]  ;;  %v7196_v63 = vcombine.high %v7192_v56, %v7192_v56 }
  0x7c   : > { %713 = vmatprep.subr.mxu1 %v664_v17  ;;  %577 = vmatpush2.msra.mxu0 %v515_v18  ;;  %v643_v60 = vld [vmem:[#allocation4 + $0x310] sm:$0xff]  ;;  %v642_v62 = vld [vmem:[#allocation4 + $0x308] sm:$0xff]  ;;  %v493_v0 = vld [vmem:[#allocation4 + $0x100] sm:$0xff] }
  0x7d   : > { %714 = vmatpush2.msra.mxu1 %v663_v19  ;;  %578 = vmatprep.subr.mxu0 %v514_v20  ;;  %v641_v1 = vld [vmem:[#allocation4 + $0x300] sm:$0xff]  ;;  %v940_v2 = vld [vmem:[#allocation4 + $0x4f8] sm:$0xff]  ;;  %v939_v3 = vld [vmem:[#allocation4 + $0x4f0] sm:$0xff] }
  0x7e   : > { %715 = vmatprep.subr.mxu1 %v662_v21  ;;  %579 = vmatpush2.msra.mxu0 %v513_v22  ;;  %v938_v4 = vld [vmem:[#allocation4 + $0x4e8] sm:$0xff]  ;;  %v937_v5 = vld [vmem:[#allocation4 + $0x4e0] sm:$0xff]  ;;  %v936_v6 = vld [vmem:[#allocation4 + $0x4d8] sm:$0xff] }
  0x7f   : > { %716 = vmatpush2.msra.mxu1 %v661_v23  ;;  %580 = vmatprep.subr.mxu0 %v512_v24  ;;  %v935_v7 = vld [vmem:[#allocation4 + $0x4d0] sm:$0xff]  ;;  %v934_v8 = vld [vmem:[#allocation4 + $0x4c8] sm:$0xff]  ;;  %v933_v9 = vld [vmem:[#allocation4 + $0x4c0] sm:$0xff] }
  0x80   : > { %717 = vmatprep.subr.mxu1 %v660_v25  ;;  %581 = vmatpush2.msra.mxu0 %v511_v26  ;;  %v932_v10 = vld [vmem:[#allocation4 + $0x4b8] sm:$0xff]  ;;  %v931_v11 = vld [vmem:[#allocation4 + $0x4b0] sm:$0xff]  ;;  %v930_v12 = vld [vmem:[#allocation4 + $0x4a8] sm:$0xff] }
  0x81   : > { %718 = vmatpush2.msra.mxu1 %v659_v27  ;;  %582 = vmatprep.subr.mxu0 %v510_v28  ;;  %v929_v13 = vld [vmem:[#allocation4 + $0x4a0] sm:$0xff]  ;;  %v928_v14 = vld [vmem:[#allocation4 + $0x498] sm:$0xff]  ;;  %v927_v15 = vld [vmem:[#allocation4 + $0x490] sm:$0xff] }
  0x82   : > { %719 = vmatprep.subr.mxu1 %v658_v29  ;;  %583 = vmatpush2.msra.mxu0 %v509_v30  ;;  %v926_v16 = vld [vmem:[#allocation4 + $0x488] sm:$0xff]  ;;  %v925_v17 = vld [vmem:[#allocation4 + $0x480] sm:$0xff]  ;;  %v924_v18 = vld [vmem:[#allocation4 + $0x478] sm:$0xff] }
  0x83   : > { %720 = vmatpush2.msra.mxu1 %v657_v31  ;;  %584 = vmatprep.subr.mxu0 %v508_v32  ;;  %v923_v19 = vld [vmem:[#allocation4 + $0x470] sm:$0xff]  ;;  %v922_v20 = vld [vmem:[#allocation4 + $0x468] sm:$0xff]  ;;  %v921_v21 = vld [vmem:[#allocation4 + $0x460] sm:$0xff] }
  0x84   : > { %721 = vmatprep.subr.mxu1 %v656_v33  ;;  %585 = vmatpush2.msra.mxu0 %v507_v34  ;;  %v920_v22 = vld [vmem:[#allocation4 + $0x458] sm:$0xff]  ;;  %v919_v23 = vld [vmem:[#allocation4 + $0x450] sm:$0xff]  ;;  %v918_v24 = vld [vmem:[#allocation4 + $0x448] sm:$0xff] }
  0x85   : > { %722 = vmatpush2.msra.mxu1 %v655_v35  ;;  %586 = vmatprep.subr.mxu0 %v506_v36  ;;  %v917_v25 = vld [vmem:[#allocation4 + $0x440] sm:$0xff]  ;;  %v916_v26 = vld [vmem:[#allocation4 + $0x438] sm:$0xff]  ;;  %v915_v27 = vld [vmem:[#allocation4 + $0x430] sm:$0xff] }
  0x86   : > { %723 = vmatprep.subr.mxu1 %v654_v37  ;;  %587 = vmatpush2.msra.mxu0 %v505_v38  ;;  %v914_v28 = vld [vmem:[#allocation4 + $0x428] sm:$0xff]  ;;  %v913_v29 = vld [vmem:[#allocation4 + $0x420] sm:$0xff]  ;;  %v912_v30 = vld [vmem:[#allocation4 + $0x418] sm:$0xff] }
  0x87   : > { %724 = vmatpush2.msra.mxu1 %v653_v39  ;;  %588 = vmatprep.subr.mxu0 %v504_v40  ;;  %v911_v31 = vld [vmem:[#allocation4 + $0x410] sm:$0xff]  ;;  %v910_v32 = vld [vmem:[#allocation4 + $0x408] sm:$0xff]  ;;  %v909_v33 = vld [vmem:[#allocation4 + $0x400] sm:$0xff] }
  0x88   : > { %725 = vmatprep.subr.mxu1 %v652_v41  ;;  %589 = vmatpush2.msra.mxu0 %v503_v42  ;;  %v972_v34 = vld [vmem:[#allocation4 + $0x5f8] sm:$0xff]  ;;  %v971_v35 = vld [vmem:[#allocation4 + $0x5f0] sm:$0xff]  ;;  %v970_v36 = vld [vmem:[#allocation4 + $0x5e8] sm:$0xff] }
  0x89   : > { %726 = vmatpush2.msra.mxu1 %v651_v43  ;;  %590 = vmatprep.subr.mxu0 %v502_v44  ;;  %v969_v37 = vld [vmem:[#allocation4 + $0x5e0] sm:$0xff]  ;;  %v968_v38 = vld [vmem:[#allocation4 + $0x5d8] sm:$0xff]  ;;  %v967_v39 = vld [vmem:[#allocation4 + $0x5d0] sm:$0xff] }
  0x8a   : > { %727 = vmatprep.subr.mxu1 %v650_v45  ;;  %591 = vmatpush2.msra.mxu0 %v501_v46  ;;  %v966_v40 = vld [vmem:[#allocation4 + $0x5c8] sm:$0xff]  ;;  %v965_v41 = vld [vmem:[#allocation4 + $0x5c0] sm:$0xff]  ;;  %v964_v42 = vld [vmem:[#allocation4 + $0x5b8] sm:$0xff] }
  0x8b   : > { %728 = vmatpush2.msra.mxu1 %v649_v47  ;;  %592 = vmatprep.subr.mxu0 %v500_v48  ;;  %v963_v43 = vld [vmem:[#allocation4 + $0x5b0] sm:$0xff]  ;;  %v962_v44 = vld [vmem:[#allocation4 + $0x5a8] sm:$0xff]  ;;  %v961_v45 = vld [vmem:[#allocation4 + $0x5a0] sm:$0xff] }
  0x8c   : > { %729 = vmatprep.subr.mxu1 %v648_v49  ;;  %593 = vmatpush2.msra.mxu0 %v499_v50  ;;  %v960_v46 = vld [vmem:[#allocation4 + $0x598] sm:$0xff]  ;;  %v959_v47 = vld [vmem:[#allocation4 + $0x590] sm:$0xff]  ;;  %v958_v48 = vld [vmem:[#allocation4 + $0x588] sm:$0xff] }
  0x8d   : > { %730 = vmatpush2.msra.mxu1 %v647_v51  ;;  %594 = vmatprep.subr.mxu0 %v498_v52  ;;  %v957_v49 = vld [vmem:[#allocation4 + $0x580] sm:$0xff]  ;;  %v956_v50 = vld [vmem:[#allocation4 + $0x578] sm:$0xff]  ;;  %v955_v51 = vld [vmem:[#allocation4 + $0x570] sm:$0xff] }
  0x8e   : > { %731 = vmatprep.subr.mxu1 %v646_v53  ;;  %595 = vmatpush2.msra.mxu0 %v497_v54  ;;  %v954_v52 = vld [vmem:[#allocation4 + $0x568] sm:$0xff]  ;;  %v953_v53 = vld [vmem:[#allocation4 + $0x560] sm:$0xff]  ;;  %v952_v54 = vld [vmem:[#allocation4 + $0x558] sm:$0xff] }
  0x8f   : > { %732 = vmatpush2.msra.mxu1 %v645_v55  ;;  %596 = vmatprep.subr.mxu0 %v496_v57  ;;  %v951_v55 = vld [vmem:[#allocation4 + $0x550] sm:$0xff]  ;;  %v950_v57 = vld [vmem:[#allocation4 + $0x548] sm:$0xff] }
  0x90   : > { %733 = vmatprep.subr.mxu1 %v644_v58  ;;  %597 = vmatpush2.msra.mxu0 %v495_v59  ;;  %v949_v58 = vld [vmem:[#allocation4 + $0x540] sm:$0xff]  ;;  %v948_v59 = vld [vmem:[#allocation4 + $0x538] sm:$0xff] }
  0x91   : > { %734 = vmatpush2.msra.mxu1 %v643_v60  ;;  %598 = vmatprep.subr.mxu0 %v494_v61  ;;  %v947_v60 = vld [vmem:[#allocation4 + $0x530] sm:$0xff]  ;;  %v946_v61 = vld [vmem:[#allocation4 + $0x528] sm:$0xff] }
  0x92   : > { %735 = vmatprep.subr.mxu1 %v642_v62  ;;  %599 = vmatpush2.msra.mxu0 %v493_v0  ;;  %v945_v62 = vld [vmem:[#allocation4 + $0x520] sm:$0xff]  ;;  %v944_v0 = vld [vmem:[#allocation4 + $0x518] sm:$0xff] }
  0x93   : > { %600 = vmatprep.mubr.f32.mxu0 %v7196_v63  ;;  %736 = vmatpush2.msra.mxu1 %v641_v1  ;;  %v943_v1 = vld [vmem:[#allocation4 + $0x510] sm:$0xff] }
  0x94   : > { %737 = vmatprep.mubr.f32.mxu1 %v7196_v63  ;;  %601 = vmatmul.mubr.f32.vlgmr.msra.gmra.mxu0 %v7192_v56 }
  0x95   : > { %738 = vmatmul.mubr.f32.vlgmr.msra.gmra.mxu1 %v7192_v56  ;;  %973 = vmatprep.subr.mxu0 %v940_v2  ;;  %v942_v2 = vld [vmem:[#allocation4 + $0x508] sm:$0xff] }
  0x96   : > { %1037 = vmatprep.mubr.f32.mxu0 %v7196_v63  ;;  %974 = vmatpush1.msra.mxu0 %v939_v3  ;;  %v941_v3 = vld [vmem:[#allocation4 + $0x500] sm:$0xff] }
  0x97   : > { %975 = vmatprep.subr.mxu0 %v938_v4  ;;  %v7010_v4 = vmov 0.0  }
  0x98   : > { %976 = vmatpush1.msra.mxu0 %v937_v5  ;;  %821 = vmatprep.mubr.f32.mxu1 %v7010_v4 }
  0x99   : > { %977 = vmatprep.subr.mxu0 %v936_v6 }
  0x9a   : > { %978 = vmatpush1.msra.mxu0 %v935_v7 }
  0x9b   : > { %979 = vmatprep.subr.mxu0 %v934_v8  ;;  %v5749_v8 = vld [vmem:[%s7641_s1 + $0x8] sm:$0xff] }
  0x9c   : > { %980 = vmatpush1.msra.mxu0 %v933_v9 }
  0x9d   : > { %981 = vmatprep.subr.mxu0 %v932_v10  ;;  %v607_v10 = vld [vmem:[%s7641_s1] sm:$0xff] }
  0x9e   : > { %982 = vmatpush1.msra.mxu0 %v931_v11 }
  0x9f   : > { %983 = vmatprep.subr.mxu0 %v930_v12 }
  0xa0   : > { %984 = vmatpush1.msra.mxu0 %v929_v13  ;;  %v5756_v13 = vld [vmem:[%s7641_s1 + $0x10] sm:$0xff] }
  0xa1   : > { %985 = vmatprep.subr.mxu0 %v928_v14  ;;  %v1160_v14 = vld [vmem:[#allocation4 + $0x6f8] sm:$0xff] }
  0xa2   : > { %986 = vmatpush1.msra.mxu0 %v927_v15  ;;  %v1159_v15 = vld [vmem:[#allocation4 + $0x6f0] sm:$0xff] }
  0xa3   : > { %987 = vmatprep.subr.mxu0 %v926_v16  ;;  %v1158_v16 = vld [vmem:[#allocation4 + $0x6e8] sm:$0xff] }
  0xa4   : > { %988 = vmatpush1.msra.mxu0 %v925_v17  ;;  %v1157_v17 = vld [vmem:[#allocation4 + $0x6e0] sm:$0xff] }
  0xa5   : > { %989 = vmatprep.subr.mxu0 %v924_v18  ;;  %v1156_v18 = vld [vmem:[#allocation4 + $0x6d8] sm:$0xff] }
  0xa6   : > { %990 = vmatpush1.msra.mxu0 %v923_v19  ;;  %v1155_v19 = vld [vmem:[#allocation4 + $0x6d0] sm:$0xff] }
  0xa7   : > { %991 = vmatprep.subr.mxu0 %v922_v20  ;;  %v1154_v20 = vld [vmem:[#allocation4 + $0x6c8] sm:$0xff] }
  0xa8   : > { %992 = vmatpush1.msra.mxu0 %v921_v21  ;;  %v1153_v21 = vld [vmem:[#allocation4 + $0x6c0] sm:$0xff] }
  0xa9   : > { %993 = vmatprep.subr.mxu0 %v920_v22  ;;  %v1152_v22 = vld [vmem:[#allocation4 + $0x6b8] sm:$0xff] }
  0xaa   : > { %994 = vmatpush1.msra.mxu0 %v919_v23  ;;  %v1151_v23 = vld [vmem:[#allocation4 + $0x6b0] sm:$0xff] }
  0xab   : > { %995 = vmatprep.subr.mxu0 %v918_v24  ;;  %v1150_v24 = vld [vmem:[#allocation4 + $0x6a8] sm:$0xff] }
  0xac   : > { %996 = vmatpush1.msra.mxu0 %v917_v25  ;;  %v1149_v25 = vld [vmem:[#allocation4 + $0x6a0] sm:$0xff] }
  0xad   : > { %997 = vmatprep.subr.mxu0 %v916_v26  ;;  %v1148_v26 = vld [vmem:[#allocation4 + $0x698] sm:$0xff] }
  0xae   : > { %998 = vmatpush1.msra.mxu0 %v915_v27  ;;  %v1147_v27 = vld [vmem:[#allocation4 + $0x690] sm:$0xff] }
  0xaf   : > { %999 = vmatprep.subr.mxu0 %v914_v28  ;;  %v1146_v28 = vld [vmem:[#allocation4 + $0x688] sm:$0xff] }
  0xb0   : > { %1000 = vmatpush1.msra.mxu0 %v913_v29  ;;  %v1145_v29 = vld [vmem:[#allocation4 + $0x680] sm:$0xff] }
  0xb1   : > { %1001 = vmatprep.subr.mxu0 %v912_v30  ;;  %v1144_v30 = vld [vmem:[#allocation4 + $0x678] sm:$0xff] }
  0xb2   : > { %1002 = vmatpush1.msra.mxu0 %v911_v31  ;;  %v1143_v31 = vld [vmem:[#allocation4 + $0x670] sm:$0xff] }
  0xb3   : > { %1003 = vmatprep.subr.mxu0 %v910_v32  ;;  %v1142_v32 = vld [vmem:[#allocation4 + $0x668] sm:$0xff] }
  0xb4   : > { %1004 = vmatpush1.msra.mxu0 %v909_v33  ;;  %v1141_v33 = vld [vmem:[#allocation4 + $0x660] sm:$0xff] }
  0xb5   : > { %1005 = vmatprep.subr.mxu0 %v972_v34  ;;  %v1140_v34 = vld [vmem:[#allocation4 + $0x658] sm:$0xff] }
  0xb6   : > { %1006 = vmatpush2.msra.mxu0 %v971_v35  ;;  %v1139_v35 = vld [vmem:[#allocation4 + $0x650] sm:$0xff] }
  0xb7   : > { %1007 = vmatprep.subr.mxu0 %v970_v36  ;;  %v1138_v36 = vld [vmem:[#allocation4 + $0x648] sm:$0xff] }
  0xb8   : > { %1008 = vmatpush2.msra.mxu0 %v969_v37  ;;  %v1137_v37 = vld [vmem:[#allocation4 + $0x640] sm:$0xff] }
  0xb9   : > { %1009 = vmatprep.subr.mxu0 %v968_v38  ;;  %v1136_v38 = vld [vmem:[#allocation4 + $0x638] sm:$0xff] }
  0xba   : > { %1010 = vmatpush2.msra.mxu0 %v967_v39  ;;  %v1135_v39 = vld [vmem:[#allocation4 + $0x630] sm:$0xff] }
  0xbb   : > { %1011 = vmatprep.subr.mxu0 %v966_v40  ;;  %v1134_v40 = vld [vmem:[#allocation4 + $0x628] sm:$0xff] }
  0xbc   : > { %1012 = vmatpush2.msra.mxu0 %v965_v41  ;;  %v1133_v41 = vld [vmem:[#allocation4 + $0x620] sm:$0xff] }
  0xbd   : > { %1013 = vmatprep.subr.mxu0 %v964_v42  ;;  %v1132_v42 = vld [vmem:[#allocation4 + $0x618] sm:$0xff] }
  0xbe   : > { %1014 = vmatpush2.msra.mxu0 %v963_v43  ;;  %v1131_v43 = vld [vmem:[#allocation4 + $0x610] sm:$0xff] }
  0xbf   : > { %1015 = vmatprep.subr.mxu0 %v962_v44  ;;  %v1130_v44 = vld [vmem:[#allocation4 + $0x608] sm:$0xff] }
  0xc0   : > { %1016 = vmatpush2.msra.mxu0 %v961_v45  ;;  %v1129_v45 = vld [vmem:[#allocation4 + $0x600] sm:$0xff] }
  0xc1   : > { %1017 = vmatprep.subr.mxu0 %v960_v46  ;;  %v1192_v46 = vld [vmem:[#allocation4 + $0x7f8] sm:$0xff] }
  0xc2   : > { %1018 = vmatpush2.msra.mxu0 %v959_v47  ;;  %v1191_v47 = vld [vmem:[#allocation4 + $0x7f0] sm:$0xff] }
  0xc3   : > { %1019 = vmatprep.subr.mxu0 %v958_v48  ;;  %v1190_v48 = vld [vmem:[#allocation4 + $0x7e8] sm:$0xff] }
  0xc4   : > { %1020 = vmatpush2.msra.mxu0 %v957_v49  ;;  %v1189_v49 = vld [vmem:[#allocation4 + $0x7e0] sm:$0xff] }
  0xc5   : > { %1021 = vmatprep.subr.mxu0 %v956_v50  ;;  %v1188_v50 = vld [vmem:[#allocation4 + $0x7d8] sm:$0xff] }
  0xc6   : > { %1022 = vmatpush2.msra.mxu0 %v955_v51  ;;  %v1187_v51 = vld [vmem:[#allocation4 + $0x7d0] sm:$0xff] }
  0xc7   : > { %1023 = vmatprep.subr.mxu0 %v954_v52  ;;  %v1186_v52 = vld [vmem:[#allocation4 + $0x7c8] sm:$0xff] }
  0xc8   : > { %1024 = vmatpush2.msra.mxu0 %v953_v53  ;;  %v1185_v53 = vld [vmem:[#allocation4 + $0x7c0] sm:$0xff] }
  0xc9   : > { %1025 = vmatprep.subr.mxu0 %v952_v54  ;;  %v1184_v54 = vld [vmem:[#allocation4 + $0x7b8] sm:$0xff] }
  0xca   : > { %1026 = vmatpush2.msra.mxu0 %v951_v55  ;;  %v1183_v55 = vld [vmem:[#allocation4 + $0x7b0] sm:$0xff] }
  0xcb   : > { %1027 = vmatprep.subr.mxu0 %v950_v57  ;;  %v1182_v57 = vld [vmem:[#allocation4 + $0x7a8] sm:$0xff] }
  0xcc   : > { %1028 = vmatpush2.msra.mxu0 %v949_v58  ;;  %v1181_v58 = vld [vmem:[#allocation4 + $0x7a0] sm:$0xff] }
  0xcd   : > { %1029 = vmatprep.subr.mxu0 %v948_v59  ;;  %v1180_v59 = vld [vmem:[#allocation4 + $0x798] sm:$0xff] }
  0xce   : > { %1030 = vmatpush2.msra.mxu0 %v947_v60  ;;  %v1179_v60 = vld [vmem:[#allocation4 + $0x790] sm:$0xff] }
  0xcf   : > { %1031 = vmatprep.subr.mxu0 %v946_v61  ;;  %v1178_v61 = vld [vmem:[#allocation4 + $0x788] sm:$0xff] }
  0xd0   : > { %1032 = vmatpush2.msra.mxu0 %v945_v62  ;;  %v1177_v62 = vld [vmem:[#allocation4 + $0x780] sm:$0xff] }
  0xd1   : > { %1033 = vmatprep.subr.mxu0 %v944_v0  ;;  %v1176_v0 = vld [vmem:[#allocation4 + $0x778] sm:$0xff] }
  0xd2   : > { %1034 = vmatpush2.msra.mxu0 %v943_v1  ;;  %v1175_v1 = vld [vmem:[#allocation4 + $0x770] sm:$0xff] }
  0xd3   : > { %1035 = vmatprep.subr.mxu0 %v942_v2  ;;  %v1174_v2 = vld [vmem:[#allocation4 + $0x768] sm:$0xff] }
  0xd4   : > { %1036 = vmatpush2.msra.mxu0 %v941_v3  ;;  %v1173_v3 = vld [vmem:[#allocation4 + $0x760] sm:$0xff] }
  0xd5   : > { %1038 = vmatmul.mubr.f32.vlgmr.msra.gmra.mxu0 %v7192_v56 }
  0xd6   : > { %1339 = vmatprep.mubr.f32.mxu0 %v7010_v4 }
 0x154   : > { %v602_v5 = vpop.f32.mrf.mxu0 }
 0x155   : > { %v739_v6 = vpop.f32.mrf.mxu1 }
 0x156   : > { %v604_v9 = vpop.f32.mrf.mxu0 }
 0x157   : > { %v741_v7 = vpop.f32.mrf.mxu1 }
 0x158   : > { %5750 = vmatprep.subr.msk.mxu1 %vm750_vm0, %v741_v7  ;;  %v1170_v7 = vld [vmem:[#allocation4 + $0x748] sm:$0xff] }
 0x159   : > { %5751 = vmatpush1.msk.msra.mxu1 %vm750_vm0, %v739_v6  ;;  %v1171_v6 = vld [vmem:[#allocation4 + $0x750] sm:$0xff] }
 0x15a   : > { %5753 = vmatprep.subr.msk.mxu1 %vm750_vm0, %v604_v9  ;;  %5752 = vmatmul.mubr.msk.f32.vlgmr.msra.gmra.mxu1 %vm746_vm1, %v5749_v8  ;;  %v1169_v8 = vld [vmem:[#allocation4 + $0x740] sm:$0xff]  ;;  %v1168_v9 = vld [vmem:[#allocation4 + $0x738] sm:$0xff] }
 0x15b   : > { %5754 = vmatpush1.msk.msra.mxu1 %vm750_vm0, %v602_v5  ;;  %901 = vmatprep.mubr.f32.mxu1 %v7010_v4  ;;  %v1172_v5 = vld [vmem:[#allocation4 + $0x758] sm:$0xff] }
 0x15e   : > { %5755 = vmatmul.mubr.msk.f32.vlgmr.msra.gmra.mxu1 %vm746_vm1, %v607_v10  ;;  %v1167_v10 = vld [vmem:[#allocation4 + $0x730] sm:$0xff] }
 0x15f   : > { %1119 = vmatprep.mubr.f32.mxu1 %v7010_v4 }
 0x195   : > { %v1039_v11 = vpop.f32.mrf.mxu0 }
 0x197   : > { %v1041_v12 = vpop.f32.mrf.mxu0 }
 0x198   : > { %5757 = vmatprep.subr.msk.mxu1 %vm750_vm0, %v1041_v12  ;;  %v1165_v12 = vld [vmem:[#allocation4 + $0x720] sm:$0xff] }
 0x199   : > { %5758 = vmatpush1.msk.msra.mxu1 %vm750_vm0, %v1039_v11  ;;  %v1166_v11 = vld [vmem:[#allocation4 + $0x728] sm:$0xff] }
 0x19a   : > { %5759 = vmatmul.mubr.msk.f32.vlgmr.msra.gmra.mxu1 %vm746_vm1, %v5756_v13  ;;  %1193 = vmatprep.subr.mxu1 %v1160_v14  ;;  %v1164_v13 = vld [vmem:[#allocation4 + $0x718] sm:$0xff]  ;;  %v1163_v14 = vld [vmem:[#allocation4 + $0x710] sm:$0xff] }
 0x19b   : > { %1194 = vmatpush1.msra.mxu1 %v1159_v15  ;;  %1257 = vmatprep.mubr.f32.mxu1 %v7196_v63  ;;  %v1162_v15 = vld [vmem:[#allocation4 + $0x708] sm:$0xff] }
 0x19c   : > { %1195 = vmatprep.subr.mxu1 %v1158_v16  ;;  %v1161_v16 = vld [vmem:[#allocation4 + $0x700] sm:$0xff] }
 0x19d   : > { %1196 = vmatpush1.msra.mxu1 %v1157_v17 }
 0x19e   : > { %1197 = vmatprep.subr.mxu1 %v1156_v18 }
 0x19f   : > { %1198 = vmatpush1.msra.mxu1 %v1155_v19 }
 0x1a0   : > { %1199 = vmatprep.subr.mxu1 %v1154_v20 }
 0x1a1   : > { %1200 = vmatpush1.msra.mxu1 %v1153_v21 }
 0x1a2   : > { %1201 = vmatprep.subr.mxu1 %v1152_v22 }
 0x1a3   : > { %1202 = vmatpush1.msra.mxu1 %v1151_v23 }
 0x1a4   : > { %1203 = vmatprep.subr.mxu1 %v1150_v24 }
 0x1a5   : > { %1204 = vmatpush1.msra.mxu1 %v1149_v25 }
 0x1a6   : > { %1205 = vmatprep.subr.mxu1 %v1148_v26 }
 0x1a7   : > { %1206 = vmatpush1.msra.mxu1 %v1147_v27 }
 0x1a8   : > { %1207 = vmatprep.subr.mxu1 %v1146_v28 }
 0x1a9   : > { %1208 = vmatpush1.msra.mxu1 %v1145_v29  ;;  %v5760_v29 = vld [vmem:[%s7641_s1 + $0x18] sm:$0xff] }
 0x1aa   : > { %1209 = vmatprep.subr.mxu1 %v1144_v30  ;;  %v1380_v30 = vld [vmem:[#allocation4 + $0x8f8] sm:$0xff] }
 0x1ab   : > { %1210 = vmatpush1.msra.mxu1 %v1143_v31  ;;  %v1379_v31 = vld [vmem:[#allocation4 + $0x8f0] sm:$0xff] }
 0x1ac   : > { %1211 = vmatprep.subr.mxu1 %v1142_v32  ;;  %v1378_v32 = vld [vmem:[#allocation4 + $0x8e8] sm:$0xff] }
 0x1ad   : > { %1212 = vmatpush1.msra.mxu1 %v1141_v33  ;;  %v1377_v33 = vld [vmem:[#allocation4 + $0x8e0] sm:$0xff] }
 0x1ae   : > { %1213 = vmatprep.subr.mxu1 %v1140_v34  ;;  %v1376_v34 = vld [vmem:[#allocation4 + $0x8d8] sm:$0xff] }
 0x1af   : > { %1214 = vmatpush1.msra.mxu1 %v1139_v35  ;;  %v1375_v35 = vld [vmem:[#allocation4 + $0x8d0] sm:$0xff] }
 0x1b0   : > { %1215 = vmatprep.subr.mxu1 %v1138_v36  ;;  %v1374_v36 = vld [vmem:[#allocation4 + $0x8c8] sm:$0xff] }
 0x1b1   : > { %1216 = vmatpush1.msra.mxu1 %v1137_v37  ;;  %v1373_v37 = vld [vmem:[#allocation4 + $0x8c0] sm:$0xff] }
 0x1b2   : > { %1217 = vmatprep.subr.mxu1 %v1136_v38  ;;  %v1372_v38 = vld [vmem:[#allocation4 + $0x8b8] sm:$0xff] }
 0x1b3   : > { %1218 = vmatpush1.msra.mxu1 %v1135_v39  ;;  %v1371_v39 = vld [vmem:[#allocation4 + $0x8b0] sm:$0xff] }
 0x1b4   : > { %1219 = vmatprep.subr.mxu1 %v1134_v40  ;;  %v1370_v40 = vld [vmem:[#allocation4 + $0x8a8] sm:$0xff] }
 0x1b5   : > { %1220 = vmatpush1.msra.mxu1 %v1133_v41  ;;  %v1369_v41 = vld [vmem:[#allocation4 + $0x8a0] sm:$0xff] }
 0x1b6   : > { %1221 = vmatprep.subr.mxu1 %v1132_v42  ;;  %v1368_v42 = vld [vmem:[#allocation4 + $0x898] sm:$0xff] }
 0x1b7   : > { %1222 = vmatpush1.msra.mxu1 %v1131_v43  ;;  %v1367_v43 = vld [vmem:[#allocation4 + $0x890] sm:$0xff] }
 0x1b8   : > { %1223 = vmatprep.subr.mxu1 %v1130_v44  ;;  %v1366_v44 = vld [vmem:[#allocation4 + $0x888] sm:$0xff] }
 0x1b9   : > { %1224 = vmatpush1.msra.mxu1 %v1129_v45  ;;  %v1365_v45 = vld [vmem:[#allocation4 + $0x880] sm:$0xff] }
 0x1ba   : > { %1225 = vmatprep.subr.mxu1 %v1192_v46  ;;  %v1364_v46 = vld [vmem:[#allocation4 + $0x878] sm:$0xff] }
 0x1bb   : > { %1226 = vmatpush2.msra.mxu1 %v1191_v47  ;;  %v1363_v47 = vld [vmem:[#allocation4 + $0x870] sm:$0xff] }
 0x1bc   : > { %1227 = vmatprep.subr.mxu1 %v1190_v48  ;;  %v1362_v48 = vld [vmem:[#allocation4 + $0x868] sm:$0xff] }
 0x1bd   : > { %1228 = vmatpush2.msra.mxu1 %v1189_v49  ;;  %v1361_v49 = vld [vmem:[#allocation4 + $0x860] sm:$0xff] }
 0x1be   : > { %1229 = vmatprep.subr.mxu1 %v1188_v50  ;;  %v1360_v50 = vld [vmem:[#allocation4 + $0x858] sm:$0xff] }
 0x1bf   : > { %1230 = vmatpush2.msra.mxu1 %v1187_v51  ;;  %v1359_v51 = vld [vmem:[#allocation4 + $0x850] sm:$0xff] }
 0x1c0   : > { %1231 = vmatprep.subr.mxu1 %v1186_v52  ;;  %v1358_v52 = vld [vmem:[#allocation4 + $0x848] sm:$0xff] }
 0x1c1   : > { %1232 = vmatpush2.msra.mxu1 %v1185_v53  ;;  %v1357_v53 = vld [vmem:[#allocation4 + $0x840] sm:$0xff] }
 0x1c2   : > { %1233 = vmatprep.subr.mxu1 %v1184_v54  ;;  %v1356_v54 = vld [vmem:[#allocation4 + $0x838] sm:$0xff] }
 0x1c3   : > { %1234 = vmatpush2.msra.mxu1 %v1183_v55  ;;  %v1355_v55 = vld [vmem:[#allocation4 + $0x830] sm:$0xff] }
 0x1c4   : > { %1235 = vmatprep.subr.mxu1 %v1182_v57  ;;  %v1354_v57 = vld [vmem:[#allocation4 + $0x828] sm:$0xff] }
 0x1c5   : > { %1236 = vmatpush2.msra.mxu1 %v1181_v58  ;;  %v1353_v58 = vld [vmem:[#allocation4 + $0x820] sm:$0xff] }
 0x1c6   : > { %1237 = vmatprep.subr.mxu1 %v1180_v59  ;;  %v1352_v59 = vld [vmem:[#allocation4 + $0x818] sm:$0xff] }
 0x1c7   : > { %1238 = vmatpush2.msra.mxu1 %v1179_v60  ;;  %v1351_v60 = vld [vmem:[#allocation4 + $0x810] sm:$0xff] }
 0x1c8   : > { %1239 = vmatprep.subr.mxu1 %v1178_v61  ;;  %v1350_v61 = vld [vmem:[#allocation4 + $0x808] sm:$0xff] }
 0x1c9   : > { %1240 = vmatpush2.msra.mxu1 %v1177_v62  ;;  %v1349_v62 = vld [vmem:[#allocation4 + $0x800] sm:$0xff] }
 0x1ca   : > { %1241 = vmatprep.subr.mxu1 %v1176_v0  ;;  %v1412_v0 = vld [vmem:[#allocation4 + $0x9f8] sm:$0xff] }
 0x1cb   : > { %1242 = vmatpush2.msra.mxu1 %v1175_v1  ;;  %v1411_v1 = vld [vmem:[#allocation4 + $0x9f0] sm:$0xff] }
 0x1cc   : > { %1243 = vmatprep.subr.mxu1 %v1174_v2  ;;  %v1410_v2 = vld [vmem:[#allocation4 + $0x9e8] sm:$0xff] }
 0x1cd   : > { %1244 = vmatpush2.msra.mxu1 %v1173_v3  ;;  %v1409_v3 = vld [vmem:[#allocation4 + $0x9e0] sm:$0xff] }
 0x1ce   : > { %1245 = vmatprep.subr.mxu1 %v1172_v5  ;;  %v1408_v5 = vld [vmem:[#allocation4 + $0x9d8] sm:$0xff] }
 0x1cf   : > { %1246 = vmatpush2.msra.mxu1 %v1171_v6  ;;  %v1407_v6 = vld [vmem:[#allocation4 + $0x9d0] sm:$0xff] }
 0x1d0   : > { %1247 = vmatprep.subr.mxu1 %v1170_v7  ;;  %v1406_v7 = vld [vmem:[#allocation4 + $0x9c8] sm:$0xff] }
 0x1d1   : > { %1248 = vmatpush2.msra.mxu1 %v1169_v8  ;;  %v1405_v8 = vld [vmem:[#allocation4 + $0x9c0] sm:$0xff] }
 0x1d2   : > { %1249 = vmatprep.subr.mxu1 %v1168_v9  ;;  %v1404_v9 = vld [vmem:[#allocation4 + $0x9b8] sm:$0xff] }
 0x1d3   : > { %1250 = vmatpush2.msra.mxu1 %v1167_v10  ;;  %v1403_v10 = vld [vmem:[#allocation4 + $0x9b0] sm:$0xff] }
 0x1d4   : > { %1251 = vmatprep.subr.mxu1 %v1166_v11  ;;  %v1402_v11 = vld [vmem:[#allocation4 + $0x9a8] sm:$0xff] }
 0x1d5   : > { %1252 = vmatpush2.msra.mxu1 %v1165_v12  ;;  %v1401_v12 = vld [vmem:[#allocation4 + $0x9a0] sm:$0xff] }
 0x1d6   : > { %1253 = vmatprep.subr.mxu1 %v1164_v13  ;;  %v1400_v13 = vld [vmem:[#allocation4 + $0x998] sm:$0xff] }
 0x1d7   : > { %1254 = vmatpush2.msra.mxu1 %v1163_v14  ;;  %v1399_v14 = vld [vmem:[#allocation4 + $0x990] sm:$0xff] }
 0x1d8   : > { %1255 = vmatprep.subr.mxu1 %v1162_v15  ;;  %v1398_v15 = vld [vmem:[#allocation4 + $0x988] sm:$0xff] }
 0x1d9   : > { %1256 = vmatpush2.msra.mxu1 %v1161_v16  ;;  %v1397_v16 = vld [vmem:[#allocation4 + $0x980] sm:$0xff] }
 0x1da   : > { %1258 = vmatmul.mubr.f32.vlgmr.msra.gmra.mxu1 %v7192_v56 }
 0x1db   : > { %1559 = vmatprep.mubr.f32.mxu1 %v7010_v4 }
 0x21a   : > { %v823_v17 = vpop.f32.mrf.mxu1 }
 0x21c   : > { %v825_v18 = vpop.f32.mrf.mxu1 }
 0x21e   : > { %v903_v19 = vpop.f32.mrf.mxu1 }
 0x21f   : > { %v904_v20 = vadd.f32 %v903_v19, %v823_v17  ;;  %v1396_v17 = vld [vmem:[#allocation4 + $0x978] sm:$0xff]  ;;  %v1394_v19 = vld [vmem:[#allocation4 + $0x968] sm:$0xff] }
 0x220   : > { %v905_v21 = vpop.f32.mrf.mxu1 }
 0x221   : > { %v906_v22 = vadd.f32 %v905_v21, %v825_v18  ;;  %v1395_v18 = vld [vmem:[#allocation4 + $0x970] sm:$0xff]  ;;  %v1392_v21 = vld [vmem:[#allocation4 + $0x958] sm:$0xff] }
 0x25a   : > { %v1121_v23 = vpop.f32.mrf.mxu1 }
 0x25b   : > { %v7229_v24 = vadd.f32 %v1121_v23, %v904_v20  ;;  %v1393_v20 = vld [vmem:[#allocation4 + $0x960] sm:$0xff]  ;;  %v1390_v23 = vld [vmem:[#allocation4 + $0x948] sm:$0xff] }
 0x25c   : > { %v1123_v25 = vpop.f32.mrf.mxu1 }
 0x25d   : > { %v7231_v26 = vadd.f32 %v1123_v25, %v906_v22  ;;  %v1391_v22 = vld [vmem:[#allocation4 + $0x950] sm:$0xff]  ;;  %v1389_v25 = vld [vmem:[#allocation4 + $0x940] sm:$0xff] }
 0x29a   : > { %v1259_v27 = vpop.f32.mrf.mxu1 }
 0x29c   : > { %v1261_v28 = vpop.f32.mrf.mxu1 }
 0x29d   : > { %5761 = vmatprep.subr.msk.mxu0 %vm750_vm0, %v1261_v28  ;;  %v1387_v28 = vld [vmem:[#allocation4 + $0x930] sm:$0xff] }
 0x29e   : > { %5762 = vmatpush1.msk.msra.mxu0 %vm750_vm0, %v1259_v27  ;;  %v1388_v27 = vld [vmem:[#allocation4 + $0x938] sm:$0xff] }
 0x29f   : > { %5763 = vmatmul.mubr.msk.f32.vlgmr.msra.gmra.mxu0 %vm746_vm1, %v5760_v29  ;;  %1413 = vmatprep.subr.mxu0 %v1380_v30  ;;  %v1386_v29 = vld [vmem:[#allocation4 + $0x928] sm:$0xff]  ;;  %v1385_v30 = vld [vmem:[#allocation4 + $0x920] sm:$0xff] }
 0x2a0   : > { %1414 = vmatpush1.msra.mxu0 %v1379_v31  ;;  %1477 = vmatprep.mubr.f32.mxu0 %v7196_v63  ;;  %v1384_v31 = vld [vmem:[#allocation4 + $0x918] sm:$0xff] }
 0x2a1   : > { %1415 = vmatprep.subr.mxu0 %v1378_v32  ;;  %v1383_v32 = vld [vmem:[#allocation4 + $0x910] sm:$0xff] }
 0x2a2   : > { %1416 = vmatpush1.msra.mxu0 %v1377_v33  ;;  %v1382_v33 = vld [vmem:[#allocation4 + $0x908] sm:$0xff] }
 0x2a3   : > { %1417 = vmatprep.subr.mxu0 %v1376_v34  ;;  %v1381_v34 = vld [vmem:[#allocation4 + $0x900] sm:$0xff] }
 0x2a4   : > { %1418 = vmatpush1.msra.mxu0 %v1375_v35 }
 0x2a5   : > { %1419 = vmatprep.subr.mxu0 %v1374_v36 }
 0x2a6   : > { %1420 = vmatpush1.msra.mxu0 %v1373_v37 }
 0x2a7   : > { %1421 = vmatprep.subr.mxu0 %v1372_v38 }
 0x2a8   : > { %1422 = vmatpush1.msra.mxu0 %v1371_v39 }
 0x2a9   : > { %1423 = vmatprep.subr.mxu0 %v1370_v40 }
 0x2aa   : > { %1424 = vmatpush1.msra.mxu0 %v1369_v41  ;;  %v5764_v41 = vld [vmem:[%s7641_s1 + $0x20] sm:$0xff] }
 0x2ab   : > { %1425 = vmatprep.subr.mxu0 %v1368_v42  ;;  %v1600_v42 = vld [vmem:[#allocation4 + $0xaf8] sm:$0xff] }
 0x2ac   : > { %1426 = vmatpush1.msra.mxu0 %v1367_v43  ;;  %v1598_v43 = vld [vmem:[#allocation4 + $0xae8] sm:$0xff] }
 0x2ad   : > { %1427 = vmatprep.subr.mxu0 %v1366_v44  ;;  %v1595_v44 = vld [vmem:[#allocation4 + $0xad0] sm:$0xff] }
 0x2ae   : > { %1428 = vmatpush1.msra.mxu0 %v1365_v45  ;;  %v1594_v45 = vld [vmem:[#allocation4 + $0xac8] sm:$0xff] }
 0x2af   : > { %1429 = vmatprep.subr.mxu0 %v1364_v46  ;;  %v1593_v46 = vld [vmem:[#allocation4 + $0xac0] sm:$0xff] }
 0x2b0   : > { %1430 = vmatpush1.msra.mxu0 %v1363_v47  ;;  %v1592_v47 = vld [vmem:[#allocation4 + $0xab8] sm:$0xff] }
 0x2b1   : > { %1431 = vmatprep.subr.mxu0 %v1362_v48  ;;  %v1591_v48 = vld [vmem:[#allocation4 + $0xab0] sm:$0xff] }
 0x2b2   : > { %1432 = vmatpush1.msra.mxu0 %v1361_v49  ;;  %v1590_v49 = vld [vmem:[#allocation4 + $0xaa8] sm:$0xff] }
 0x2b3   : > { %1433 = vmatprep.subr.mxu0 %v1360_v50  ;;  %v1589_v50 = vld [vmem:[#allocation4 + $0xaa0] sm:$0xff] }
 0x2b4   : > { %1434 = vmatpush1.msra.mxu0 %v1359_v51  ;;  %v1588_v51 = vld [vmem:[#allocation4 + $0xa98] sm:$0xff] }
 0x2b5   : > { %1435 = vmatprep.subr.mxu0 %v1358_v52  ;;  %v1587_v52 = vld [vmem:[#allocation4 + $0xa90] sm:$0xff] }
 0x2b6   : > { %1436 = vmatpush1.msra.mxu0 %v1357_v53  ;;  %v1586_v53 = vld [vmem:[#allocation4 + $0xa88] sm:$0xff] }
 0x2b7   : > { %1437 = vmatprep.subr.mxu0 %v1356_v54  ;;  %v1585_v54 = vld [vmem:[#allocation4 + $0xa80] sm:$0xff] }
 0x2b8   : > { %1438 = vmatpush1.msra.mxu0 %v1355_v55  ;;  %v1584_v55 = vld [vmem:[#allocation4 + $0xa78] sm:$0xff] }
 0x2b9   : > { %1439 = vmatprep.subr.mxu0 %v1354_v57  ;;  %v1583_v57 = vld [vmem:[#allocation4 + $0xa70] sm:$0xff] }
 0x2ba   : > { %1440 = vmatpush1.msra.mxu0 %v1353_v58  ;;  %v1582_v58 = vld [vmem:[#allocation4 + $0xa68] sm:$0xff] }
 0x2bb   : > { %1441 = vmatprep.subr.mxu0 %v1352_v59  ;;  %v1581_v59 = vld [vmem:[#allocation4 + $0xa60] sm:$0xff] }
 0x2bc   : > { %1442 = vmatpush1.msra.mxu0 %v1351_v60  ;;  %v1580_v60 = vld [vmem:[#allocation4 + $0xa58] sm:$0xff] }
 0x2bd   : > { %1443 = vmatprep.subr.mxu0 %v1350_v61  ;;  %v1579_v61 = vld [vmem:[#allocation4 + $0xa50] sm:$0xff] }
 0x2be   : > { %1444 = vmatpush1.msra.mxu0 %v1349_v62  ;;  %v1578_v62 = vld [vmem:[#allocation4 + $0xa48] sm:$0xff] }
 0x2bf   : > { %1445 = vmatprep.subr.mxu0 %v1412_v0  ;;  %v1577_v0 = vld [vmem:[#allocation4 + $0xa40] sm:$0xff] }
 0x2c0   : > { %1446 = vmatpush2.msra.mxu0 %v1411_v1  ;;  %v1576_v1 = vld [vmem:[#allocation4 + $0xa38] sm:$0xff] }
 0x2c1   : > { %1447 = vmatprep.subr.mxu0 %v1410_v2  ;;  %v1575_v2 = vld [vmem:[#allocation4 + $0xa30] sm:$0xff] }
 0x2c2   : > { %1448 = vmatpush2.msra.mxu0 %v1409_v3  ;;  %v1574_v3 = vld [vmem:[#allocation4 + $0xa28] sm:$0xff] }
 0x2c3   : > { %1449 = vmatprep.subr.mxu0 %v1408_v5  ;;  %v1573_v5 = vld [vmem:[#allocation4 + $0xa20] sm:$0xff] }
 0x2c4   : > { %1450 = vmatpush2.msra.mxu0 %v1407_v6  ;;  %v1572_v6 = vld [vmem:[#allocation4 + $0xa18] sm:$0xff] }
 0x2c5   : > { %1451 = vmatprep.subr.mxu0 %v1406_v7  ;;  %v1571_v7 = vld [vmem:[#allocation4 + $0xa10] sm:$0xff] }
 0x2c6   : > { %1452 = vmatpush2.msra.mxu0 %v1405_v8  ;;  %v1570_v8 = vld [vmem:[#allocation4 + $0xa08] sm:$0xff] }
 0x2c7   : > { %1453 = vmatprep.subr.mxu0 %v1404_v9  ;;  %v1569_v9 = vld [vmem:[#allocation4 + $0xa00] sm:$0xff] }
 0x2c8   : > { %1454 = vmatpush2.msra.mxu0 %v1403_v10  ;;  %v1632_v10 = vld [vmem:[#allocation4 + $0xbf8] sm:$0xff] }
 0x2c9   : > { %1455 = vmatprep.subr.mxu0 %v1402_v11  ;;  %v1631_v11 = vld [vmem:[#allocation4 + $0xbf0] sm:$0xff] }
 0x2ca   : > { %1456 = vmatpush2.msra.mxu0 %v1401_v12  ;;  %v1630_v12 = vld [vmem:[#allocation4 + $0xbe8] sm:$0xff] }
 0x2cb   : > { %1457 = vmatprep.subr.mxu0 %v1400_v13  ;;  %v1629_v13 = vld [vmem:[#allocation4 + $0xbe0] sm:$0xff] }
 0x2cc   : > { %1458 = vmatpush2.msra.mxu0 %v1399_v14  ;;  %v1628_v14 = vld [vmem:[#allocation4 + $0xbd8] sm:$0xff] }
 0x2cd   : > { %1459 = vmatprep.subr.mxu0 %v1398_v15  ;;  %v1627_v15 = vld [vmem:[#allocation4 + $0xbd0] sm:$0xff] }
 0x2ce   : > { %1460 = vmatpush2.msra.mxu0 %v1397_v16  ;;  %v1626_v16 = vld [vmem:[#allocation4 + $0xbc8] sm:$0xff] }
 0x2cf   : > { %1461 = vmatprep.subr.mxu0 %v1396_v17  ;;  %v1625_v17 = vld [vmem:[#allocation4 + $0xbc0] sm:$0xff] }
 0x2d0   : > { %1462 = vmatpush2.msra.mxu0 %v1395_v18  ;;  %v1624_v18 = vld [vmem:[#allocation4 + $0xbb8] sm:$0xff] }
 0x2d1   : > { %1463 = vmatprep.subr.mxu0 %v1394_v19  ;;  %v1623_v19 = vld [vmem:[#allocation4 + $0xbb0] sm:$0xff] }
 0x2d2   : > { %1464 = vmatpush2.msra.mxu0 %v1393_v20  ;;  %v1622_v20 = vld [vmem:[#allocation4 + $0xba8] sm:$0xff] }
 0x2d3   : > { %1465 = vmatprep.subr.mxu0 %v1392_v21  ;;  %v1621_v21 = vld [vmem:[#allocation4 + $0xba0] sm:$0xff] }
 0x2d4   : > { %1466 = vmatpush2.msra.mxu0 %v1391_v22  ;;  %v1620_v22 = vld [vmem:[#allocation4 + $0xb98] sm:$0xff] }
 0x2d5   : > { %1467 = vmatprep.subr.mxu0 %v1390_v23  ;;  %v1619_v23 = vld [vmem:[#allocation4 + $0xb90] sm:$0xff] }
 0x2d6   : > { %1468 = vmatpush2.msra.mxu0 %v1389_v25  ;;  %v1618_v25 = vld [vmem:[#allocation4 + $0xb88] sm:$0xff] }
 0x2d7   : > { %1469 = vmatprep.subr.mxu0 %v1388_v27  ;;  %v1617_v27 = vld [vmem:[#allocation4 + $0xb80] sm:$0xff] }
 0x2d8   : > { %1470 = vmatpush2.msra.mxu0 %v1387_v28  ;;  %v1616_v28 = vld [vmem:[#allocation4 + $0xb78] sm:$0xff] }
 0x2d9   : > { %1471 = vmatprep.subr.mxu0 %v1386_v29  ;;  %v1615_v29 = vld [vmem:[#allocation4 + $0xb70] sm:$0xff] }
 0x2da   : > { %1472 = vmatpush2.msra.mxu0 %v1385_v30  ;;  %v1614_v30 = vld [vmem:[#allocation4 + $0xb68] sm:$0xff] }
 0x2db   : > { %1473 = vmatprep.subr.mxu0 %v1384_v31  ;;  %v1613_v31 = vld [vmem:[#allocation4 + $0xb60] sm:$0xff] }
 0x2dc   : > { %1474 = vmatpush2.msra.mxu0 %v1383_v32  ;;  %v1612_v32 = vld [vmem:[#allocation4 + $0xb58] sm:$0xff] }
 0x2dd   : > { %1475 = vmatprep.subr.mxu0 %v1382_v33  ;;  %v1611_v33 = vld [vmem:[#allocation4 + $0xb50] sm:$0xff] }
 0x2de   : > { %1476 = vmatpush2.msra.mxu0 %v1381_v34  ;;  %v1610_v34 = vld [vmem:[#allocation4 + $0xb48] sm:$0xff] }
 0x2df   : > { %1478 = vmatmul.mubr.f32.vlgmr.msra.gmra.mxu0 %v7192_v56  ;;  %v1599_v56 = vld [vmem:[#allocation4 + $0xaf0] sm:$0xff] }
 0x2e0   : > { %1779 = vmatprep.mubr.f32.mxu0 %v7010_v4 }
 0x35f   : > { %v1341_v35 = vpop.f32.mrf.mxu0 }
 0x360   : > { %v7243_v36 = vadd.f32 %v1341_v35, %v7229_v24  ;;  %v1597_v24 = vld [vmem:[#allocation4 + $0xae0] sm:$0xff] }
 0x361   : > { %v1343_v37 = vpop.f32.mrf.mxu0  ;;  %v1609_v35 = vld [vmem:[#allocation4 + $0xb40] sm:$0xff] }
 0x362   : > { %v7246_v38 = vadd.f32 %v1343_v37, %v7231_v26  ;;  %v1596_v26 = vld [vmem:[#allocation4 + $0xad8] sm:$0xff] }
 0x363   : > { %v1608_v37 = vld [vmem:[#allocation4 + $0xb38] sm:$0xff] }
 0x39f   : > { %v1479_v39 = vpop.f32.mrf.mxu0 }
 0x3a1   : > { %v1481_v40 = vpop.f32.mrf.mxu0 }
 0x3a2   : > { %5765 = vmatprep.subr.msk.mxu1 %vm750_vm0, %v1481_v40  ;;  %v1606_v40 = vld [vmem:[#allocation4 + $0xb28] sm:$0xff] }
 0x3a3   : > { %5766 = vmatpush1.msk.msra.mxu1 %vm750_vm0, %v1479_v39  ;;  %v1607_v39 = vld [vmem:[#allocation4 + $0xb30] sm:$0xff] }
 0x3a4   : > { %5767 = vmatmul.mubr.msk.f32.vlgmr.msra.gmra.mxu1 %vm746_vm1, %v5764_v41  ;;  %1633 = vmatprep.subr.mxu1 %v1600_v42  ;;  %v1605_v41 = vld [vmem:[#allocation4 + $0xb20] sm:$0xff]  ;;  %v1604_v42 = vld [vmem:[#allocation4 + $0xb18] sm:$0xff] }
 0x3a5   : > { %1634 = vmatpush1.msra.mxu1 %v1599_v56  ;;  %1697 = vmatprep.mubr.f32.mxu1 %v7196_v63  ;;  %v1603_v56 = vld [vmem:[#allocation4 + $0xb10] sm:$0xff] }
 0x3a6   : > { %1635 = vmatprep.subr.mxu1 %v1598_v43  ;;  %v1602_v43 = vld [vmem:[#allocation4 + $0xb08] sm:$0xff] }
 0x3a7   : > { %1636 = vmatpush1.msra.mxu1 %v1597_v24  ;;  %v1601_v24 = vld [vmem:[#allocation4 + $0xb00] sm:$0xff] }
 0x3a8   : > { %1637 = vmatprep.subr.mxu1 %v1596_v26  ;;  %v7256_v26 = vld.sshfl [vmem:[%s7189_s29] sm:$0x33 pattern:$0x76325410] }
 0x3a9   : > { %1638 = vmatpush1.msra.mxu1 %v1595_v44 }
 0x3aa   : > { %1639 = vmatprep.subr.mxu1 %v1594_v45 }
 0x3ab   : > { %1640 = vmatpush1.msra.mxu1 %v1593_v46 }
 0x3ac   : > { %1641 = vmatprep.subr.mxu1 %v1592_v47 }
 0x3ad   : > { %1642 = vmatpush1.msra.mxu1 %v1591_v48 }
 0x3ae   : > { %1643 = vmatprep.subr.mxu1 %v1590_v49 }
 0x3af   : > { %1644 = vmatpush1.msra.mxu1 %v1589_v50  ;;  %v5768_v50 = vld [vmem:[%s7641_s1 + $0x28] sm:$0xff] }
 0x3b0   : > { %1645 = vmatprep.subr.mxu1 %v1588_v51  ;;  %v1820_v51 = vld [vmem:[#allocation4 + $0xcf8] sm:$0xff] }
 0x3b1   : > { %1646 = vmatpush1.msra.mxu1 %v1587_v52  ;;  %v1819_v52 = vld [vmem:[#allocation4 + $0xcf0] sm:$0xff] }
 0x3b2   : > { %1647 = vmatprep.subr.mxu1 %v1586_v53  ;;  %v1818_v53 = vld [vmem:[#allocation4 + $0xce8] sm:$0xff] }
 0x3b3   : > { %1648 = vmatpush1.msra.mxu1 %v1585_v54  ;;  %v1815_v54 = vld [vmem:[#allocation4 + $0xcd0] sm:$0xff] }
 0x3b4   : > { %1649 = vmatprep.subr.mxu1 %v1584_v55  ;;  %v1814_v55 = vld [vmem:[#allocation4 + $0xcc8] sm:$0xff] }
 0x3b5   : > { %1650 = vmatpush1.msra.mxu1 %v1583_v57  ;;  %v1813_v57 = vld [vmem:[#allocation4 + $0xcc0] sm:$0xff] }
 0x3b6   : > { %1651 = vmatprep.subr.mxu1 %v1582_v58  ;;  %v1812_v58 = vld [vmem:[#allocation4 + $0xcb8] sm:$0xff] }
 0x3b7   : > { %1652 = vmatpush1.msra.mxu1 %v1581_v59  ;;  %v1811_v59 = vld [vmem:[#allocation4 + $0xcb0] sm:$0xff] }
 0x3b8   : > { %1653 = vmatprep.subr.mxu1 %v1580_v60  ;;  %v1810_v60 = vld [vmem:[#allocation4 + $0xca8] sm:$0xff] }
 0x3b9   : > { %1654 = vmatpush1.msra.mxu1 %v1579_v61  ;;  %v1809_v61 = vld [vmem:[#allocation4 + $0xca0] sm:$0xff] }
 0x3ba   : > { %1655 = vmatprep.subr.mxu1 %v1578_v62  ;;  %v1808_v62 = vld [vmem:[#allocation4 + $0xc98] sm:$0xff] }
 0x3bb   : > { %1656 = vmatpush1.msra.mxu1 %v1577_v0  ;;  %v1807_v0 = vld [vmem:[#allocation4 + $0xc90] sm:$0xff] }
 0x3bc   : > { %1657 = vmatprep.subr.mxu1 %v1576_v1  ;;  %v1806_v1 = vld [vmem:[#allocation4 + $0xc88] sm:$0xff] }
 0x3bd   : > { %1658 = vmatpush1.msra.mxu1 %v1575_v2  ;;  %v1805_v2 = vld [vmem:[#allocation4 + $0xc80] sm:$0xff] }
 0x3be   : > { %1659 = vmatprep.subr.mxu1 %v1574_v3  ;;  %v1804_v3 = vld [vmem:[#allocation4 + $0xc78] sm:$0xff] }
 0x3bf   : > { %1660 = vmatpush1.msra.mxu1 %v1573_v5  ;;  %v1803_v5 = vld [vmem:[#allocation4 + $0xc70] sm:$0xff] }
 0x3c0   : > { %1661 = vmatprep.subr.mxu1 %v1572_v6  ;;  %v1802_v6 = vld [vmem:[#allocation4 + $0xc68] sm:$0xff] }
 0x3c1   : > { %1662 = vmatpush1.msra.mxu1 %v1571_v7  ;;  %v1801_v7 = vld [vmem:[#allocation4 + $0xc60] sm:$0xff] }
 0x3c2   : > { %1663 = vmatprep.subr.mxu1 %v1570_v8  ;;  %v1800_v8 = vld [vmem:[#allocation4 + $0xc58] sm:$0xff] }
 0x3c3   : > { %1664 = vmatpush1.msra.mxu1 %v1569_v9  ;;  %v1799_v9 = vld [vmem:[#allocation4 + $0xc50] sm:$0xff] }
 0x3c4   : > { %1665 = vmatprep.subr.mxu1 %v1632_v10  ;;  %v1798_v10 = vld [vmem:[#allocation4 + $0xc48] sm:$0xff] }
 0x3c5   : > { %1666 = vmatpush2.msra.mxu1 %v1631_v11  ;;  %v1797_v11 = vld [vmem:[#allocation4 + $0xc40] sm:$0xff] }
 0x3c6   : > { %1667 = vmatprep.subr.mxu1 %v1630_v12  ;;  %v1796_v12 = vld [vmem:[#allocation4 + $0xc38] sm:$0xff] }
 0x3c7   : > { %1668 = vmatpush2.msra.mxu1 %v1629_v13  ;;  %v1795_v13 = vld [vmem:[#allocation4 + $0xc30] sm:$0xff] }
 0x3c8   : > { %1669 = vmatprep.subr.mxu1 %v1628_v14  ;;  %v1794_v14 = vld [vmem:[#allocation4 + $0xc28] sm:$0xff] }
 0x3c9   : > { %1670 = vmatpush2.msra.mxu1 %v1627_v15  ;;  %v1793_v15 = vld [vmem:[#allocation4 + $0xc20] sm:$0xff] }
 0x3ca   : > { %1671 = vmatprep.subr.mxu1 %v1626_v16  ;;  %v1792_v16 = vld [vmem:[#allocation4 + $0xc18] sm:$0xff] }
 0x3cb   : > { %1672 = vmatpush2.msra.mxu1 %v1625_v17  ;;  %v1791_v17 = vld [vmem:[#allocation4 + $0xc10] sm:$0xff] }
 0x3cc   : > { %1673 = vmatprep.subr.mxu1 %v1624_v18  ;;  %v1790_v18 = vld [vmem:[#allocation4 + $0xc08] sm:$0xff] }
 0x3cd   : > { %1674 = vmatpush2.msra.mxu1 %v1623_v19  ;;  %v1789_v19 = vld [vmem:[#allocation4 + $0xc00] sm:$0xff] }
 0x3ce   : > { %1675 = vmatprep.subr.mxu1 %v1622_v20  ;;  %v1852_v20 = vld [vmem:[#allocation4 + $0xdf8] sm:$0xff] }
 0x3cf   : > { %1676 = vmatpush2.msra.mxu1 %v1621_v21  ;;  %v1851_v21 = vld [vmem:[#allocation4 + $0xdf0] sm:$0xff] }
 0x3d0   : > { %1677 = vmatprep.subr.mxu1 %v1620_v22  ;;  %v1850_v22 = vld [vmem:[#allocation4 + $0xde8] sm:$0xff] }
 0x3d1   : > { %1678 = vmatpush2.msra.mxu1 %v1619_v23  ;;  %v1849_v23 = vld [vmem:[#allocation4 + $0xde0] sm:$0xff] }
 0x3d2   : > { %1679 = vmatprep.subr.mxu1 %v1618_v25  ;;  %v1848_v25 = vld [vmem:[#allocation4 + $0xdd8] sm:$0xff] }
 0x3d3   : > { %1680 = vmatpush2.msra.mxu1 %v1617_v27  ;;  %v1847_v27 = vld [vmem:[#allocation4 + $0xdd0] sm:$0xff] }
 0x3d4   : > { %1681 = vmatprep.subr.mxu1 %v1616_v28  ;;  %v1846_v28 = vld [vmem:[#allocation4 + $0xdc8] sm:$0xff] }
 0x3d5   : > { %1682 = vmatpush2.msra.mxu1 %v1615_v29  ;;  %v1845_v29 = vld [vmem:[#allocation4 + $0xdc0] sm:$0xff] }
 0x3d6   : > { %1683 = vmatprep.subr.mxu1 %v1614_v30  ;;  %v1844_v30 = vld [vmem:[#allocation4 + $0xdb8] sm:$0xff] }
 0x3d7   : > { %1684 = vmatpush2.msra.mxu1 %v1613_v31  ;;  %v1843_v31 = vld [vmem:[#allocation4 + $0xdb0] sm:$0xff] }
 0x3d8   : > { %1685 = vmatprep.subr.mxu1 %v1612_v32  ;;  %v1842_v32 = vld [vmem:[#allocation4 + $0xda8] sm:$0xff] }
 0x3d9   : > { %1686 = vmatpush2.msra.mxu1 %v1611_v33  ;;  %v1841_v33 = vld [vmem:[#allocation4 + $0xda0] sm:$0xff] }
 0x3da   : > { %1687 = vmatprep.subr.mxu1 %v1610_v34  ;;  %v1840_v34 = vld [vmem:[#allocation4 + $0xd98] sm:$0xff] }
 0x3db   : > { %1688 = vmatpush2.msra.mxu1 %v1609_v35  ;;  %v1839_v35 = vld [vmem:[#allocation4 + $0xd90] sm:$0xff] }
 0x3dc   : > { %1689 = vmatprep.subr.mxu1 %v1608_v37  ;;  %v1838_v37 = vld [vmem:[#allocation4 + $0xd88] sm:$0xff] }
 0x3dd   : > { %1690 = vmatpush2.msra.mxu1 %v1607_v39  ;;  %v1837_v39 = vld [vmem:[#allocation4 + $0xd80] sm:$0xff] }
 0x3de   : > { %1691 = vmatprep.subr.mxu1 %v1606_v40  ;;  %v1836_v40 = vld [vmem:[#allocation4 + $0xd78] sm:$0xff] }
 0x3df   : > { %1692 = vmatpush2.msra.mxu1 %v1605_v41  ;;  %v1835_v41 = vld [vmem:[#allocation4 + $0xd70] sm:$0xff] }
 0x3e0   : > { %1693 = vmatprep.subr.mxu1 %v1604_v42  ;;  %v1834_v42 = vld [vmem:[#allocation4 + $0xd68] sm:$0xff] }
 0x3e1   : > { %1694 = vmatpush2.msra.mxu1 %v1603_v56  ;;  %v1833_v56 = vld [vmem:[#allocation4 + $0xd60] sm:$0xff] }
 0x3e2   : > { %1695 = vmatprep.subr.mxu1 %v1602_v43  ;;  %v1832_v43 = vld [vmem:[#allocation4 + $0xd58] sm:$0xff] }
 0x3e3   : > { %1696 = vmatpush2.msra.mxu1 %v1601_v24  ;;  %v1831_v24 = vld [vmem:[#allocation4 + $0xd50] sm:$0xff] }
 0x3e4   : > { %1698 = vmatmul.mubr.f32.vlgmr.msra.gmra.mxu1 %v7256_v26 }
 0x3e5   : > { %1999 = vmatprep.mubr.f32.mxu1 %v7010_v4 }
 0x464   : > { %v1561_v44 = vpop.f32.mrf.mxu1 }
 0x465   : > { %v7261_v45 = vadd.f32 %v1561_v44, %v7243_v36  ;;  %v1817_v36 = vld [vmem:[#allocation4 + $0xce0] sm:$0xff]  ;;  %v1830_v44 = vld [vmem:[#allocation4 + $0xd48] sm:$0xff] }
 0x466   : > { %v1563_v46 = vpop.f32.mrf.mxu1 }
 0x467   : > { %v7264_v47 = vadd.f32 %v1563_v46, %v7246_v38  ;;  %v1816_v38 = vld [vmem:[#allocation4 + $0xcd8] sm:$0xff]  ;;  %v1829_v46 = vld [vmem:[#allocation4 + $0xd40] sm:$0xff] }
 0x4a4   : > { %v1699_v48 = vpop.f32.mrf.mxu1 }
 0x4a6   : > { %v1701_v49 = vpop.f32.mrf.mxu1 }
 0x4a7   : > { %5769 = vmatprep.subr.msk.mxu0 %vm750_vm0, %v1701_v49  ;;  %v1827_v49 = vld [vmem:[#allocation4 + $0xd30] sm:$0xff] }
 0x4a8   : > { %5770 = vmatpush1.msk.msra.mxu0 %vm750_vm0, %v1699_v48  ;;  %v1828_v48 = vld [vmem:[#allocation4 + $0xd38] sm:$0xff] }
 0x4a9   : > { %5771 = vmatmul.mubr.msk.f32.vlgmr.msra.gmra.mxu0 %vm746_vm1, %v5768_v50  ;;  %1853 = vmatprep.subr.mxu0 %v1820_v51  ;;  %v1826_v50 = vld [vmem:[#allocation4 + $0xd28] sm:$0xff]  ;;  %v1825_v51 = vld [vmem:[#allocation4 + $0xd20] sm:$0xff] }
 0x4aa   : > { %1854 = vmatpush1.msra.mxu0 %v1819_v52  ;;  %1917 = vmatprep.mubr.f32.mxu0 %v7196_v63  ;;  %v1824_v52 = vld [vmem:[#allocation4 + $0xd18] sm:$0xff] }
 0x4ab   : > { %1855 = vmatprep.subr.mxu0 %v1818_v53  ;;  %v1823_v53 = vld [vmem:[#allocation4 + $0xd10] sm:$0xff] }
 0x4ac   : > { %1856 = vmatpush1.msra.mxu0 %v1817_v36  ;;  %v1822_v36 = vld [vmem:[#allocation4 + $0xd08] sm:$0xff] }
 0x4ad   : > { %1857 = vmatprep.subr.mxu0 %v1816_v38  ;;  %v1821_v38 = vld [vmem:[#allocation4 + $0xd00] sm:$0xff] }
 0x4ae   : > { %1858 = vmatpush1.msra.mxu0 %v1815_v54 }
 0x4af   : > { %1859 = vmatprep.subr.mxu0 %v1814_v55 }
 0x4b0   : > { %1860 = vmatpush1.msra.mxu0 %v1813_v57 }
 0x4b1   : > { %1861 = vmatprep.subr.mxu0 %v1812_v58 }
 0x4b2   : > { %1862 = vmatpush1.msra.mxu0 %v1811_v59 }
 0x4b3   : > { %1863 = vmatprep.subr.mxu0 %v1810_v60 }
 0x4b4   : > { %1864 = vmatpush1.msra.mxu0 %v1809_v61  ;;  %v5772_v61 = vld [vmem:[%s7641_s1 + $0x30] sm:$0xff] }
 0x4b5   : > { %1865 = vmatprep.subr.mxu0 %v1808_v62  ;;  %v2040_v62 = vld [vmem:[#allocation4 + $0xef8] sm:$0xff] }
 0x4b6   : > { %1866 = vmatpush1.msra.mxu0 %v1807_v0  ;;  %v2039_v0 = vld [vmem:[#allocation4 + $0xef0] sm:$0xff] }
 0x4b7   : > { %1867 = vmatprep.subr.mxu0 %v1806_v1  ;;  %v2038_v1 = vld [vmem:[#allocation4 + $0xee8] sm:$0xff] }
 0x4b8   : > { %1868 = vmatpush1.msra.mxu0 %v1805_v2  ;;  %v2035_v2 = vld [vmem:[#allocation4 + $0xed0] sm:$0xff] }
 0x4b9   : > { %1869 = vmatprep.subr.mxu0 %v1804_v3  ;;  %v2034_v3 = vld [vmem:[#allocation4 + $0xec8] sm:$0xff] }
 0x4ba   : > { %1870 = vmatpush1.msra.mxu0 %v1803_v5  ;;  %v2033_v5 = vld [vmem:[#allocation4 + $0xec0] sm:$0xff] }
 0x4bb   : > { %1871 = vmatprep.subr.mxu0 %v1802_v6  ;;  %v2032_v6 = vld [vmem:[#allocation4 + $0xeb8] sm:$0xff] }
 0x4bc   : > { %1872 = vmatpush1.msra.mxu0 %v1801_v7  ;;  %v2031_v7 = vld [vmem:[#allocation4 + $0xeb0] sm:$0xff] }
 0x4bd   : > { %1873 = vmatprep.subr.mxu0 %v1800_v8  ;;  %v2030_v8 = vld [vmem:[#allocation4 + $0xea8] sm:$0xff] }
 0x4be   : > { %1874 = vmatpush1.msra.mxu0 %v1799_v9  ;;  %v2029_v9 = vld [vmem:[#allocation4 + $0xea0] sm:$0xff] }
 0x4bf   : > { %1875 = vmatprep.subr.mxu0 %v1798_v10  ;;  %v2028_v10 = vld [vmem:[#allocation4 + $0xe98] sm:$0xff] }
 0x4c0   : > { %1876 = vmatpush1.msra.mxu0 %v1797_v11  ;;  %v2027_v11 = vld [vmem:[#allocation4 + $0xe90] sm:$0xff] }
 0x4c1   : > { %1877 = vmatprep.subr.mxu0 %v1796_v12  ;;  %v2026_v12 = vld [vmem:[#allocation4 + $0xe88] sm:$0xff] }
 0x4c2   : > { %1878 = vmatpush1.msra.mxu0 %v1795_v13  ;;  %v2025_v13 = vld [vmem:[#allocation4 + $0xe80] sm:$0xff] }
 0x4c3   : > { %1879 = vmatprep.subr.mxu0 %v1794_v14  ;;  %v2024_v14 = vld [vmem:[#allocation4 + $0xe78] sm:$0xff] }
 0x4c4   : > { %1880 = vmatpush1.msra.mxu0 %v1793_v15  ;;  %v2023_v15 = vld [vmem:[#allocation4 + $0xe70] sm:$0xff] }
 0x4c5   : > { %1881 = vmatprep.subr.mxu0 %v1792_v16  ;;  %v2022_v16 = vld [vmem:[#allocation4 + $0xe68] sm:$0xff] }
 0x4c6   : > { %1882 = vmatpush1.msra.mxu0 %v1791_v17  ;;  %v2021_v17 = vld [vmem:[#allocation4 + $0xe60] sm:$0xff] }
 0x4c7   : > { %1883 = vmatprep.subr.mxu0 %v1790_v18  ;;  %v2020_v18 = vld [vmem:[#allocation4 + $0xe58] sm:$0xff] }
 0x4c8   : > { %1884 = vmatpush1.msra.mxu0 %v1789_v19  ;;  %v2019_v19 = vld [vmem:[#allocation4 + $0xe50] sm:$0xff] }
 0x4c9   : > { %1885 = vmatprep.subr.mxu0 %v1852_v20  ;;  %v2018_v20 = vld [vmem:[#allocation4 + $0xe48] sm:$0xff] }
 0x4ca   : > { %1886 = vmatpush2.msra.mxu0 %v1851_v21  ;;  %v2017_v21 = vld [vmem:[#allocation4 + $0xe40] sm:$0xff] }
 0x4cb   : > { %1887 = vmatprep.subr.mxu0 %v1850_v22  ;;  %v2016_v22 = vld [vmem:[#allocation4 + $0xe38] sm:$0xff] }
 0x4cc   : > { %1888 = vmatpush2.msra.mxu0 %v1849_v23  ;;  %v2015_v23 = vld [vmem:[#allocation4 + $0xe30] sm:$0xff] }
 0x4cd   : > { %1889 = vmatprep.subr.mxu0 %v1848_v25  ;;  %v2014_v25 = vld [vmem:[#allocation4 + $0xe28] sm:$0xff] }
 0x4ce   : > { %1890 = vmatpush2.msra.mxu0 %v1847_v27  ;;  %v2013_v27 = vld [vmem:[#allocation4 + $0xe20] sm:$0xff] }
 0x4cf   : > { %1891 = vmatprep.subr.mxu0 %v1846_v28  ;;  %v2012_v28 = vld [vmem:[#allocation4 + $0xe18] sm:$0xff] }
 0x4d0   : > { %1892 = vmatpush2.msra.mxu0 %v1845_v29  ;;  %v2011_v29 = vld [vmem:[#allocation4 + $0xe10] sm:$0xff] }
 0x4d1   : > { %1893 = vmatprep.subr.mxu0 %v1844_v30  ;;  %v2010_v30 = vld [vmem:[#allocation4 + $0xe08] sm:$0xff] }
 0x4d2   : > { %1894 = vmatpush2.msra.mxu0 %v1843_v31  ;;  %v2009_v31 = vld [vmem:[#allocation4 + $0xe00] sm:$0xff] }
 0x4d3   : > { %1895 = vmatprep.subr.mxu0 %v1842_v32  ;;  %v2072_v32 = vld [vmem:[#allocation4 + $0xff8] sm:$0xff] }
 0x4d4   : > { %1896 = vmatpush2.msra.mxu0 %v1841_v33  ;;  %v2071_v33 = vld [vmem:[#allocation4 + $0xff0] sm:$0xff] }
 0x4d5   : > { %1897 = vmatprep.subr.mxu0 %v1840_v34  ;;  %v2070_v34 = vld [vmem:[#allocation4 + $0xfe8] sm:$0xff] }
 0x4d6   : > { %1898 = vmatpush2.msra.mxu0 %v1839_v35  ;;  %v2069_v35 = vld [vmem:[#allocation4 + $0xfe0] sm:$0xff] }
 0x4d7   : > { %1899 = vmatprep.subr.mxu0 %v1838_v37  ;;  %v2068_v37 = vld [vmem:[#allocation4 + $0xfd8] sm:$0xff] }
 0x4d8   : > { %1900 = vmatpush2.msra.mxu0 %v1837_v39  ;;  %v2067_v39 = vld [vmem:[#allocation4 + $0xfd0] sm:$0xff] }
 0x4d9   : > { %1901 = vmatprep.subr.mxu0 %v1836_v40  ;;  %v2066_v40 = vld [vmem:[#allocation4 + $0xfc8] sm:$0xff] }
 0x4da   : > { %1902 = vmatpush2.msra.mxu0 %v1835_v41  ;;  %v2065_v41 = vld [vmem:[#allocation4 + $0xfc0] sm:$0xff] }
 0x4db   : > { %1903 = vmatprep.subr.mxu0 %v1834_v42  ;;  %v2064_v42 = vld [vmem:[#allocation4 + $0xfb8] sm:$0xff] }
 0x4dc   : > { %1904 = vmatpush2.msra.mxu0 %v1833_v56  ;;  %v2063_v56 = vld [vmem:[#allocation4 + $0xfb0] sm:$0xff] }
 0x4dd   : > { %1905 = vmatprep.subr.mxu0 %v1832_v43  ;;  %v2062_v43 = vld [vmem:[#allocation4 + $0xfa8] sm:$0xff] }
 0x4de   : > { %1906 = vmatpush2.msra.mxu0 %v1831_v24  ;;  %v2061_v24 = vld [vmem:[#allocation4 + $0xfa0] sm:$0xff] }
 0x4df   : > { %1907 = vmatprep.subr.mxu0 %v1830_v44  ;;  %v2060_v44 = vld [vmem:[#allocation4 + $0xf98] sm:$0xff] }
 0x4e0   : > { %1908 = vmatpush2.msra.mxu0 %v1829_v46  ;;  %v2059_v46 = vld [vmem:[#allocation4 + $0xf90] sm:$0xff] }
 0x4e1   : > { %1909 = vmatprep.subr.mxu0 %v1828_v48  ;;  %v2058_v48 = vld [vmem:[#allocation4 + $0xf88] sm:$0xff] }
 0x4e2   : > { %1910 = vmatpush2.msra.mxu0 %v1827_v49  ;;  %v2057_v49 = vld [vmem:[#allocation4 + $0xf80] sm:$0xff] }
 0x4e3   : > { %1911 = vmatprep.subr.mxu0 %v1826_v50  ;;  %v2056_v50 = vld [vmem:[#allocation4 + $0xf78] sm:$0xff] }
 0x4e4   : > { %1912 = vmatpush2.msra.mxu0 %v1825_v51  ;;  %v2055_v51 = vld [vmem:[#allocation4 + $0xf70] sm:$0xff] }
 0x4e5   : > { %1913 = vmatprep.subr.mxu0 %v1824_v52  ;;  %v2054_v52 = vld [vmem:[#allocation4 + $0xf68] sm:$0xff] }
 0x4e6   : > { %1914 = vmatpush2.msra.mxu0 %v1823_v53  ;;  %v2053_v53 = vld [vmem:[#allocation4 + $0xf60] sm:$0xff] }
 0x4e7   : > { %1915 = vmatprep.subr.mxu0 %v1822_v36  ;;  %v2052_v36 = vld [vmem:[#allocation4 + $0xf58] sm:$0xff] }
 0x4e8   : > { %1916 = vmatpush2.msra.mxu0 %v1821_v38  ;;  %v2051_v38 = vld [vmem:[#allocation4 + $0xf50] sm:$0xff] }
 0x4e9   : > { %1918 = vmatmul.mubr.f32.vlgmr.msra.gmra.mxu0 %v7256_v26 }
 0x4ea   : > { %2219 = vmatprep.mubr.f32.mxu0 %v7010_v4 }
 0x569   : > { %v1781_v54 = vpop.f32.mrf.mxu0 }
 0x56a   : > { %v7276_v55 = vadd.f32 %v1781_v54, %v7261_v45  ;;  %v2037_v45 = vld [vmem:[#allocation4 + $0xee0] sm:$0xff]  ;;  %v2050_v54 = vld [vmem:[#allocation4 + $0xf48] sm:$0xff] }
 0x56b   : > { %v1783_v57 = vpop.f32.mrf.mxu0 }
 0x56c   : > { %v7279_v58 = vadd.f32 %v1783_v57, %v7264_v47  ;;  %v2036_v47 = vld [vmem:[#allocation4 + $0xed8] sm:$0xff]  ;;  %v2049_v57 = vld [vmem:[#allocation4 + $0xf40] sm:$0xff] }
 0x5a9   : > { %v1919_v59 = vpop.f32.mrf.mxu0 }
 0x5ab   : > { %v1921_v60 = vpop.f32.mrf.mxu0 }
 0x5ac   : > { %5773 = vmatprep.subr.msk.mxu1 %vm750_vm0, %v1921_v60  ;;  %v2047_v60 = vld [vmem:[#allocation4 + $0xf30] sm:$0xff] }
 0x5ad   : > { %5774 = vmatpush1.msk.msra.mxu1 %vm750_vm0, %v1919_v59  ;;  %v2048_v59 = vld [vmem:[#allocation4 + $0xf38] sm:$0xff] }
 0x5ae   : > { %5775 = vmatmul.mubr.msk.f32.vlgmr.msra.gmra.mxu1 %vm746_vm1, %v5772_v61  ;;  %2073 = vmatprep.subr.mxu1 %v2040_v62  ;;  %v2046_v61 = vld [vmem:[#allocation4 + $0xf28] sm:$0xff]  ;;  %v2045_v62 = vld [vmem:[#allocation4 + $0xf20] sm:$0xff] }
 0x5af   : > { %2074 = vmatpush1.msra.mxu1 %v2039_v0  ;;  %2137 = vmatprep.mubr.f32.mxu1 %v7196_v63  ;;  %v2044_v0 = vld [vmem:[#allocation4 + $0xf18] sm:$0xff] }
 0x5b0   : > { %2075 = vmatprep.subr.mxu1 %v2038_v1  ;;  %v2043_v1 = vld [vmem:[#allocation4 + $0xf10] sm:$0xff] }
 0x5b1   : > { %2076 = vmatpush1.msra.mxu1 %v2037_v45  ;;  %v2042_v45 = vld [vmem:[#allocation4 + $0xf08] sm:$0xff] }
 0x5b2   : > { %2077 = vmatprep.subr.mxu1 %v2036_v47  ;;  %v2041_v47 = vld [vmem:[#allocation4 + $0xf00] sm:$0xff] }
 0x5b3   : > { %2078 = vmatpush1.msra.mxu1 %v2035_v2 }
 0x5b4   : > { %2079 = vmatprep.subr.mxu1 %v2034_v3 }
 0x5b5   : > { %2080 = vmatpush1.msra.mxu1 %v2033_v5 }
 0x5b6   : > { %2081 = vmatprep.subr.mxu1 %v2032_v6 }
 0x5b7   : > { %2082 = vmatpush1.msra.mxu1 %v2031_v7 }
 0x5b8   : > { %2083 = vmatprep.subr.mxu1 %v2030_v8 }
 0x5b9   : > { %2084 = vmatpush1.msra.mxu1 %v2029_v9  ;;  %v5776_v9 = vld [vmem:[%s7641_s1 + $0x38] sm:$0xff] }
 0x5ba   : > { %2085 = vmatprep.subr.mxu1 %v2028_v10  ;;  %v2260_v10 = vld [vmem:[#allocation4 + $0x10f8] sm:$0xff] }
 0x5bb   : > { %2086 = vmatpush1.msra.mxu1 %v2027_v11  ;;  %v2259_v11 = vld [vmem:[#allocation4 + $0x10f0] sm:$0xff] }
 0x5bc   : > { %2087 = vmatprep.subr.mxu1 %v2026_v12  ;;  %v2258_v12 = vld [vmem:[#allocation4 + $0x10e8] sm:$0xff] }
 0x5bd   : > { %2088 = vmatpush1.msra.mxu1 %v2025_v13  ;;  %v2255_v13 = vld [vmem:[#allocation4 + $0x10d0] sm:$0xff] }
 0x5be   : > { %2089 = vmatprep.subr.mxu1 %v2024_v14  ;;  %v2254_v14 = vld [vmem:[#allocation4 + $0x10c8] sm:$0xff] }
 0x5bf   : > { %2090 = vmatpush1.msra.mxu1 %v2023_v15  ;;  %v2253_v15 = vld [vmem:[#allocation4 + $0x10c0] sm:$0xff] }
 0x5c0   : > { %2091 = vmatprep.subr.mxu1 %v2022_v16  ;;  %v2252_v16 = vld [vmem:[#allocation4 + $0x10b8] sm:$0xff] }
 0x5c1   : > { %2092 = vmatpush1.msra.mxu1 %v2021_v17  ;;  %v2251_v17 = vld [vmem:[#allocation4 + $0x10b0] sm:$0xff] }
 0x5c2   : > { %2093 = vmatprep.subr.mxu1 %v2020_v18  ;;  %v2250_v18 = vld [vmem:[#allocation4 + $0x10a8] sm:$0xff] }
 0x5c3   : > { %2094 = vmatpush1.msra.mxu1 %v2019_v19  ;;  %v2249_v19 = vld [vmem:[#allocation4 + $0x10a0] sm:$0xff] }
 0x5c4   : > { %2095 = vmatprep.subr.mxu1 %v2018_v20  ;;  %v2248_v20 = vld [vmem:[#allocation4 + $0x1098] sm:$0xff] }
 0x5c5   : > { %2096 = vmatpush1.msra.mxu1 %v2017_v21  ;;  %v2247_v21 = vld [vmem:[#allocation4 + $0x1090] sm:$0xff] }
 0x5c6   : > { %2097 = vmatprep.subr.mxu1 %v2016_v22  ;;  %v2245_v22 = vld [vmem:[#allocation4 + $0x1080] sm:$0xff] }
 0x5c7   : > { %2098 = vmatpush1.msra.mxu1 %v2015_v23  ;;  %v2244_v23 = vld [vmem:[#allocation4 + $0x1078] sm:$0xff] }
 0x5c8   : > { %2099 = vmatprep.subr.mxu1 %v2014_v25  ;;  %v2243_v25 = vld [vmem:[#allocation4 + $0x1070] sm:$0xff] }
 0x5c9   : > { %2100 = vmatpush1.msra.mxu1 %v2013_v27  ;;  %v2242_v27 = vld [vmem:[#allocation4 + $0x1068] sm:$0xff] }
 0x5ca   : > { %2101 = vmatprep.subr.mxu1 %v2012_v28  ;;  %v2241_v28 = vld [vmem:[#allocation4 + $0x1060] sm:$0xff] }
 0x5cb   : > { %2102 = vmatpush1.msra.mxu1 %v2011_v29  ;;  %v2240_v29 = vld [vmem:[#allocation4 + $0x1058] sm:$0xff] }
 0x5cc   : > { %2103 = vmatprep.subr.mxu1 %v2010_v30  ;;  %v2239_v30 = vld [vmem:[#allocation4 + $0x1050] sm:$0xff] }
 0x5cd   : > { %2104 = vmatpush1.msra.mxu1 %v2009_v31  ;;  %v2238_v31 = vld [vmem:[#allocation4 + $0x1048] sm:$0xff] }
 0x5ce   : > { %2105 = vmatprep.subr.mxu1 %v2072_v32  ;;  %v2237_v32 = vld [vmem:[#allocation4 + $0x1040] sm:$0xff] }
 0x5cf   : > { %2106 = vmatpush2.msra.mxu1 %v2071_v33  ;;  %v2236_v33 = vld [vmem:[#allocation4 + $0x1038] sm:$0xff] }
 0x5d0   : > { %2107 = vmatprep.subr.mxu1 %v2070_v34  ;;  %v2235_v34 = vld [vmem:[#allocation4 + $0x1030] sm:$0xff] }
 0x5d1   : > { %2108 = vmatpush2.msra.mxu1 %v2069_v35  ;;  %v2234_v35 = vld [vmem:[#allocation4 + $0x1028] sm:$0xff] }
 0x5d2   : > { %2109 = vmatprep.subr.mxu1 %v2068_v37  ;;  %v2233_v37 = vld [vmem:[#allocation4 + $0x1020] sm:$0xff] }
 0x5d3   : > { %2110 = vmatpush2.msra.mxu1 %v2067_v39  ;;  %v2232_v39 = vld [vmem:[#allocation4 + $0x1018] sm:$0xff] }
 0x5d4   : > { %2111 = vmatprep.subr.mxu1 %v2066_v40  ;;  %v2231_v40 = vld [vmem:[#allocation4 + $0x1010] sm:$0xff] }
 0x5d5   : > { %2112 = vmatpush2.msra.mxu1 %v2065_v41  ;;  %v2230_v41 = vld [vmem:[#allocation4 + $0x1008] sm:$0xff] }
 0x5d6   : > { %2113 = vmatprep.subr.mxu1 %v2064_v42  ;;  %v2229_v42 = vld [vmem:[#allocation4 + $0x1000] sm:$0xff] }
 0x5d7   : > { %2114 = vmatpush2.msra.mxu1 %v2063_v56  ;;  %v2292_v56 = vld [vmem:[#allocation4 + $0x11f8] sm:$0xff] }
 0x5d8   : > { %2115 = vmatprep.subr.mxu1 %v2062_v43  ;;  %v2291_v43 = vld [vmem:[#allocation4 + $0x11f0] sm:$0xff] }
 0x5d9   : > { %2116 = vmatpush2.msra.mxu1 %v2061_v24  ;;  %v2290_v24 = vld [vmem:[#allocation4 + $0x11e8] sm:$0xff] }
 0x5da   : > { %2117 = vmatprep.subr.mxu1 %v2060_v44  ;;  %v2289_v44 = vld [vmem:[#allocation4 + $0x11e0] sm:$0xff] }
 0x5db   : > { %2118 = vmatpush2.msra.mxu1 %v2059_v46  ;;  %v2288_v46 = vld [vmem:[#allocation4 + $0x11d8] sm:$0xff] }
 0x5dc   : > { %2119 = vmatprep.subr.mxu1 %v2058_v48  ;;  %v2287_v48 = vld [vmem:[#allocation4 + $0x11d0] sm:$0xff] }
 0x5dd   : > { %2120 = vmatpush2.msra.mxu1 %v2057_v49  ;;  %v2286_v49 = vld [vmem:[#allocation4 + $0x11c8] sm:$0xff] }
 0x5de   : > { %2121 = vmatprep.subr.mxu1 %v2056_v50  ;;  %v2285_v50 = vld [vmem:[#allocation4 + $0x11c0] sm:$0xff] }
 0x5df   : > { %2122 = vmatpush2.msra.mxu1 %v2055_v51  ;;  %v2284_v51 = vld [vmem:[#allocation4 + $0x11b8] sm:$0xff] }
 0x5e0   : > { %2123 = vmatprep.subr.mxu1 %v2054_v52  ;;  %v2283_v52 = vld [vmem:[#allocation4 + $0x11b0] sm:$0xff] }
 0x5e1   : > { %2124 = vmatpush2.msra.mxu1 %v2053_v53  ;;  %v2282_v53 = vld [vmem:[#allocation4 + $0x11a8] sm:$0xff] }
 0x5e2   : > { %2125 = vmatprep.subr.mxu1 %v2052_v36  ;;  %v2281_v36 = vld [vmem:[#allocation4 + $0x11a0] sm:$0xff] }
 0x5e3   : > { %2126 = vmatpush2.msra.mxu1 %v2051_v38  ;;  %v2280_v38 = vld [vmem:[#allocation4 + $0x1198] sm:$0xff] }
 0x5e4   : > { %2127 = vmatprep.subr.mxu1 %v2050_v54  ;;  %v2279_v54 = vld [vmem:[#allocation4 + $0x1190] sm:$0xff] }
 0x5e5   : > { %2128 = vmatpush2.msra.mxu1 %v2049_v57  ;;  %v2278_v57 = vld [vmem:[#allocation4 + $0x1188] sm:$0xff] }
 0x5e6   : > { %2129 = vmatprep.subr.mxu1 %v2048_v59  ;;  %v2277_v59 = vld [vmem:[#allocation4 + $0x1180] sm:$0xff] }
 0x5e7   : > { %2130 = vmatpush2.msra.mxu1 %v2047_v60  ;;  %v2276_v60 = vld [vmem:[#allocation4 + $0x1178] sm:$0xff] }
 0x5e8   : > { %2131 = vmatprep.subr.mxu1 %v2046_v61  ;;  %v2275_v61 = vld [vmem:[#allocation4 + $0x1170] sm:$0xff] }
 0x5e9   : > { %2132 = vmatpush2.msra.mxu1 %v2045_v62  ;;  %v2274_v62 = vld [vmem:[#allocation4 + $0x1168] sm:$0xff] }
 0x5ea   : > { %2133 = vmatprep.subr.mxu1 %v2044_v0  ;;  %v2273_v0 = vld [vmem:[#allocation4 + $0x1160] sm:$0xff] }
 0x5eb   : > { %2134 = vmatpush2.msra.mxu1 %v2043_v1  ;;  %v2272_v1 = vld [vmem:[#allocation4 + $0x1158] sm:$0xff] }
 0x5ec   : > { %2135 = vmatprep.subr.mxu1 %v2042_v45  ;;  %v2271_v45 = vld [vmem:[#allocation4 + $0x1150] sm:$0xff] }
 0x5ed   : > { %2136 = vmatpush2.msra.mxu1 %v2041_v47  ;;  %v2270_v47 = vld [vmem:[#allocation4 + $0x1148] sm:$0xff] }
 0x5ee   : > { %2138 = vmatmul.mubr.f32.vlgmr.msra.gmra.mxu1 %v7256_v26 }
 0x5ef   : > { %2439 = vmatprep.mubr.f32.mxu1 %v7010_v4 }
 0x66e   : > { %v2001_v2 = vpop.f32.mrf.mxu1 }
 0x66f   : > { %v7291_v3 = vadd.f32 %v2001_v2, %v7276_v55  ;;  %v2257_v55 = vld [vmem:[#allocation4 + $0x10e0] sm:$0xff] }
 0x670   : > { %v2003_v5 = vpop.f32.mrf.mxu1  ;;  %v2269_v2 = vld [vmem:[#allocation4 + $0x1140] sm:$0xff] }
 0x671   : > { %v7294_v6 = vadd.f32 %v2003_v5, %v7279_v58  ;;  %v2256_v58 = vld [vmem:[#allocation4 + $0x10d8] sm:$0xff] }
 0x672   : > { %v2268_v5 = vld [vmem:[#allocation4 + $0x1138] sm:$0xff] }
 0x6ae   : > { %v2139_v7 = vpop.f32.mrf.mxu1 }
 0x6b0   : > { %v2141_v8 = vpop.f32.mrf.mxu1 }
 0x6b1   : > { %5777 = vmatprep.subr.msk.mxu0 %vm750_vm0, %v2141_v8  ;;  %v2266_v8 = vld [vmem:[#allocation4 + $0x1128] sm:$0xff] }
 0x6b2   : > { %5778 = vmatpush1.msk.msra.mxu0 %vm750_vm0, %v2139_v7  ;;  %v2267_v7 = vld [vmem:[#allocation4 + $0x1130] sm:$0xff] }
 0x6b3   : > { %5779 = vmatmul.mubr.msk.f32.vlgmr.msra.gmra.mxu0 %vm746_vm1, %v5776_v9  ;;  %2293 = vmatprep.subr.mxu0 %v2260_v10  ;;  %v2265_v9 = vld [vmem:[#allocation4 + $0x1120] sm:$0xff]  ;;  %v2264_v10 = vld [vmem:[#allocation4 + $0x1118] sm:$0xff] }
 0x6b4   : > { %2294 = vmatpush1.msra.mxu0 %v2259_v11  ;;  %2357 = vmatprep.mubr.f32.mxu0 %v7196_v63  ;;  %v2246_v63 = vld [vmem:[#allocation4 + $0x1088] sm:$0xff]  ;;  %v2263_v11 = vld [vmem:[#allocation4 + $0x1110] sm:$0xff] }
 0x6b5   : > { %2295 = vmatprep.subr.mxu0 %v2258_v12  ;;  %v2262_v12 = vld [vmem:[#allocation4 + $0x1108] sm:$0xff] }
 0x6b6   : > { %2296 = vmatpush1.msra.mxu0 %v2257_v55  ;;  %v2261_v55 = vld [vmem:[#allocation4 + $0x1100] sm:$0xff] }
 0x6b7   : > { %2297 = vmatprep.subr.mxu0 %v2256_v58  ;;  %v2448_v58 = vld [vmem:[%s7642_s2] sm:$0xff] }
 0x6b8   : > { %2298 = vmatpush1.msra.mxu0 %v2255_v13  ;;  %v7011_v13 = vmov 0  }
 0x6b9   : > { %2299 = vmatprep.subr.mxu0 %v2254_v14  ;;  %6270 = vset.pattern.permute.xlu0 %v7011_v13  ;;  %v4044_v14 = vld [vmem:[%s7644_s4] sm:$0xff] }
 0x6ba   : > { %2300 = vmatpush1.msra.mxu0 %v2253_v15  ;;  %6271 = vset.pattern.permute.xlu1 %v7011_v13  ;;  %v2650_v13 = vld [vmem:[#allocation6 + $0x68] sm:$0xff] }
 0x6bb   : > { %2301 = vmatprep.subr.mxu0 %v2252_v16  ;;  %2451 = vperm.xlu0 %6270, %v2448_v58   ;;  %v2651_v58 = vld [vmem:[#allocation6 + $0x70] sm:$0xff] }
 0x6bc   : > { %2302 = vmatpush1.msra.mxu0 %v2251_v17 }
 0x6bd   : > { %2303 = vmatprep.subr.mxu0 %v2250_v18 }
 0x6be   : > { %2304 = vmatpush1.msra.mxu0 %v2249_v19 }
 0x6bf   : > { %2305 = vmatprep.subr.mxu0 %v2248_v20  ;;  %4048 = vperm.xlu0 %6270, %v4044_v14   ;;  %v5780_v20 = vld [vmem:[%s7641_s1 + $0x40] sm:$0xff]  ;;  %v2649_v14 = vld [vmem:[#allocation6 + $0x60] sm:$0xff] }
 0x6c0   : > { %2306 = vmatpush1.msra.mxu0 %v2247_v21  ;;  %v2489_v21 = vld [vmem:[#allocation7 + $0xf8] sm:$0xff] }
 0x6c1   : > { %2307 = vmatprep.subr.mxu0 %v2246_v63  ;;  %v2473_v63 = vld [vmem:[#allocation7 + $0x78] sm:$0xff] }
 0x6c2   : > { %2308 = vmatpush1.msra.mxu0 %v2245_v22  ;;  %v2488_v22 = vld [vmem:[#allocation7 + $0xf0] sm:$0xff] }
 0x6c3   : > { %2309 = vmatprep.subr.mxu0 %v2244_v23  ;;  %v2471_v23 = vld [vmem:[#allocation7 + $0x68] sm:$0xff] }
 0x6c4   : > { %2310 = vmatpush1.msra.mxu0 %v2243_v25  ;;  %v2486_v25 = vld [vmem:[#allocation7 + $0xe0] sm:$0xff] }
 0x6c5   : > { %2311 = vmatprep.subr.mxu0 %v2242_v27  ;;  %v2470_v27 = vld [vmem:[#allocation7 + $0x60] sm:$0xff] }
 0x6c6   : > { %2312 = vmatpush1.msra.mxu0 %v2241_v28  ;;  %v2485_v28 = vld [vmem:[#allocation7 + $0xd8] sm:$0xff] }
 0x6c7   : > { %2313 = vmatprep.subr.mxu0 %v2240_v29  ;;  %v2469_v29 = vld [vmem:[#allocation7 + $0x58] sm:$0xff] }
 0x6c8   : > { %2314 = vmatpush1.msra.mxu0 %v2239_v30  ;;  %v2484_v30 = vld [vmem:[#allocation7 + $0xd0] sm:$0xff] }
 0x6c9   : > { %2315 = vmatprep.subr.mxu0 %v2238_v31  ;;  %v2468_v31 = vld [vmem:[#allocation7 + $0x50] sm:$0xff] }
 0x6ca   : > { %2316 = vmatpush1.msra.mxu0 %v2237_v32  ;;  %v2483_v32 = vld [vmem:[#allocation7 + $0xc8] sm:$0xff] }
 0x6cb   : > { %2317 = vmatprep.subr.mxu0 %v2236_v33  ;;  %v2467_v33 = vld [vmem:[#allocation7 + $0x48] sm:$0xff] }
 0x6cc   : > { %2318 = vmatpush1.msra.mxu0 %v2235_v34  ;;  %v2482_v34 = vld [vmem:[#allocation7 + $0xc0] sm:$0xff] }
 0x6cd   : > { %2319 = vmatprep.subr.mxu0 %v2234_v35  ;;  %v2466_v35 = vld [vmem:[#allocation7 + $0x40] sm:$0xff] }
 0x6ce   : > { %2320 = vmatpush1.msra.mxu0 %v2233_v37  ;;  %v2481_v37 = vld [vmem:[#allocation7 + $0xb8] sm:$0xff] }
 0x6cf   : > { %2321 = vmatprep.subr.mxu0 %v2232_v39  ;;  %v2465_v39 = vld [vmem:[#allocation7 + $0x38] sm:$0xff] }
 0x6d0   : > { %2322 = vmatpush1.msra.mxu0 %v2231_v40  ;;  %v2480_v40 = vld [vmem:[#allocation7 + $0xb0] sm:$0xff] }
 0x6d1   : > { %2323 = vmatprep.subr.mxu0 %v2230_v41  ;;  %v2464_v41 = vld [vmem:[#allocation7 + $0x30] sm:$0xff] }
 0x6d2   : > { %2324 = vmatpush1.msra.mxu0 %v2229_v42  ;;  %v2479_v42 = vld [vmem:[#allocation7 + $0xa8] sm:$0xff] }
 0x6d3   : > { %2325 = vmatprep.subr.mxu0 %v2292_v56  ;;  %v2463_v56 = vld [vmem:[#allocation7 + $0x28] sm:$0xff] }
 0x6d4   : > { %2326 = vmatpush2.msra.mxu0 %v2291_v43  ;;  %v2478_v43 = vld [vmem:[#allocation7 + $0xa0] sm:$0xff] }
 0x6d5   : > { %2327 = vmatprep.subr.mxu0 %v2290_v24  ;;  %v2462_v24 = vld [vmem:[#allocation7 + $0x20] sm:$0xff] }
 0x6d6   : > { %2328 = vmatpush2.msra.mxu0 %v2289_v44  ;;  %v2477_v44 = vld [vmem:[#allocation7 + $0x98] sm:$0xff] }
 0x6d7   : > { %2329 = vmatprep.subr.mxu0 %v2288_v46  ;;  %v2461_v46 = vld [vmem:[#allocation7 + $0x18] sm:$0xff] }
 0x6d8   : > { %2330 = vmatpush2.msra.mxu0 %v2287_v48  ;;  %v2476_v48 = vld [vmem:[#allocation7 + $0x90] sm:$0xff] }
 0x6d9   : > { %2331 = vmatprep.subr.mxu0 %v2286_v49  ;;  %v2460_v49 = vld [vmem:[#allocation7 + $0x10] sm:$0xff] }
 0x6da   : > { %2332 = vmatpush2.msra.mxu0 %v2285_v50  ;;  %v2475_v50 = vld [vmem:[#allocation7 + $0x88] sm:$0xff] }
 0x6db   : > { %2333 = vmatprep.subr.mxu0 %v2284_v51  ;;  %v2459_v51 = vld [vmem:[#allocation7 + $0x8] sm:$0xff] }
 0x6dc   : > { %2334 = vmatpush2.msra.mxu0 %v2283_v52  ;;  %v2474_v52 = vld [vmem:[#allocation7 + $0x80] sm:$0xff] }
 0x6dd   : > { %2335 = vmatprep.subr.mxu0 %v2282_v53  ;;  %v2458_v53 = vld [vmem:[#allocation7] sm:$0xff] }
 0x6de   : > { %2336 = vmatpush2.msra.mxu0 %v2281_v36 }
 0x6df   : > { %2337 = vmatprep.subr.mxu0 %v2280_v38 }
 0x6e0   : > { %2338 = vmatpush2.msra.mxu0 %v2279_v54 }
 0x6e1   : > { %2339 = vmatprep.subr.mxu0 %v2278_v57 }
 0x6e2   : > { %2340 = vmatpush2.msra.mxu0 %v2277_v59 }
 0x6e3   : > { %2341 = vmatprep.subr.mxu0 %v2276_v60 }
 0x6e4   : > { %2342 = vmatpush2.msra.mxu0 %v2275_v61 }
 0x6e5   : > { %2343 = vmatprep.subr.mxu0 %v2274_v62 }
 0x6e6   : > { %2344 = vmatpush2.msra.mxu0 %v2273_v0 }
 0x6e7   : > { %2345 = vmatprep.subr.mxu0 %v2272_v1  ;;  %v2567_v1 = vld [vmem:[#allocation6 + $0x38] sm:$0xff] }
 0x6e8   : > { %2346 = vmatpush2.msra.mxu0 %v2271_v45  ;;  %v2566_v45 = vld [vmem:[#allocation6 + $0x30] sm:$0xff] }
 0x6e9   : > { %2347 = vmatprep.subr.mxu0 %v2270_v47  ;;  %v2565_v47 = vld [vmem:[#allocation6 + $0x28] sm:$0xff] }
 0x6ea   : > { %2348 = vmatpush2.msra.mxu0 %v2269_v2  ;;  %v2564_v2 = vld [vmem:[#allocation6 + $0x20] sm:$0xff] }
 0x6eb   : > { %2349 = vmatprep.subr.mxu0 %v2268_v5  ;;  %v2563_v5 = vld [vmem:[#allocation6 + $0x18] sm:$0xff] }
 0x6ec   : > { %2350 = vmatpush2.msra.mxu0 %v2267_v7  ;;  %v2562_v7 = vld [vmem:[#allocation6 + $0x10] sm:$0xff] }
 0x6ed   : > { %2351 = vmatprep.subr.mxu0 %v2266_v8  ;;  %v2561_v8 = vld [vmem:[#allocation6 + $0x8] sm:$0xff] }
 0x6ee   : > { %2352 = vmatpush2.msra.mxu0 %v2265_v9  ;;  %v2560_v9 = vld [vmem:[#allocation6] sm:$0xff] }
 0x6ef   : > { %2353 = vmatprep.subr.mxu0 %v2264_v10 }
 0x6f0   : > { %2354 = vmatpush2.msra.mxu0 %v2263_v11 }
 0x6f1   : > { %2355 = vmatprep.subr.mxu0 %v2262_v12 }
 0x6f2   : > { %2356 = vmatpush2.msra.mxu0 %v2261_v55  ;;  %v2652_v55 = vld [vmem:[#allocation6 + $0x78] sm:$0xff] }
 0x6f3   : > { %2358 = vmatmul.mubr.f32.vlgmr.msra.gmra.mxu0 %v7256_v26 }
 0x736   : > { %v2452_v57 = vpop.permute.xlu0 %2451 }
 0x773   : > { %v2221_v15 = vpop.f32.mrf.mxu0 }
 0x774   : > { %v7311_v16 = vadd.f32 %v2221_v15, %v7291_v3  ;;  %v2472_v3 = vld [vmem:[#allocation7 + $0x70] sm:$0xff]  ;;  %v2648_v15 = vld [vmem:[#allocation6 + $0x58] sm:$0xff] }
 0x775   : > { %v2223_v17 = vpop.f32.mrf.mxu0 }
 0x776   : > { %v7314_v26 = vadd.f32 %v2223_v17, %v7294_v6  ;;  %v2487_v6 = vld [vmem:[#allocation7 + $0xe8] sm:$0xff] }
 0x777   : > { %v2646_v17 = vld [vmem:[#allocation6 + $0x48] sm:$0xff] }
 0x7b3   : > { %v2359_v18 = vpop.f32.mrf.mxu0 }
 0x7b5   : > { %v2361_v19 = vpop.f32.mrf.mxu0 }
 0x7b6   : > { %5781 = vmatprep.subr.msk.mxu1 %vm750_vm0, %v2361_v19  ;;  %v2896_v19 = vld [vmem:[#allocation6 + $0xb0] sm:$0xff] }
 0x7b7   : > { %5782 = vmatpush1.msk.msra.mxu1 %vm750_vm0, %v2359_v18  ;;  %v2897_v18 = vld [vmem:[#allocation6 + $0xb8] sm:$0xff] }
 0x7b8   : > { %5783 = vmatmul.mubr.msk.f32.vlgmr.msra.gmra.mxu1 %vm746_vm1, %v5780_v20  ;;  %5843 = vmatprep.subr.mxu1 %v2489_v21  ;;  %v2895_v20 = vld [vmem:[#allocation6 + $0xa8] sm:$0xff]  ;;  %v2894_v21 = vld [vmem:[#allocation6 + $0xa0] sm:$0xff] }
 0x7b9   : > { %5844 = vmatpush3.msra.mxu1 %v2473_v63  ;;  %v2893_v63 = vld [vmem:[#allocation6 + $0x98] sm:$0xff] }
 0x7ba   : > { %5845 = vmatprep.subr.mxu1 %v2488_v22  ;;  %v2892_v22 = vld [vmem:[#allocation6 + $0x90] sm:$0xff] }
 0x7bb   : > { %5846 = vmatpush3.msra.mxu1 %v2472_v3  ;;  %v2891_v3 = vld [vmem:[#allocation6 + $0x88] sm:$0xff] }
 0x7bc   : > { %5847 = vmatprep.subr.mxu1 %v2487_v6  ;;  %v2890_v6 = vld [vmem:[#allocation6 + $0x80] sm:$0xff] }
 0x7bd   : > { %5848 = vmatpush3.msra.mxu1 %v2471_v23  ;;  %v3062_v23 = vld [vmem:[#allocation6 + $0xf8] sm:$0xff] }
 0x7be   : > { %5849 = vmatprep.subr.mxu1 %v2486_v25  ;;  %v3061_v25 = vld [vmem:[#allocation6 + $0xf0] sm:$0xff] }
 0x7bf   : > { %5850 = vmatpush3.msra.mxu1 %v2470_v27  ;;  %v3060_v27 = vld [vmem:[#allocation6 + $0xe8] sm:$0xff] }
 0x7c0   : > { %5851 = vmatprep.subr.mxu1 %v2485_v28  ;;  %v3059_v28 = vld [vmem:[#allocation6 + $0xe0] sm:$0xff] }
 0x7c1   : > { %5852 = vmatpush3.msra.mxu1 %v2469_v29  ;;  %v3058_v29 = vld [vmem:[#allocation6 + $0xd8] sm:$0xff] }
 0x7c2   : > { %5853 = vmatprep.subr.mxu1 %v2484_v30  ;;  %v3057_v30 = vld [vmem:[#allocation6 + $0xd0] sm:$0xff] }
 0x7c3   : > { %5854 = vmatpush3.msra.mxu1 %v2468_v31  ;;  %v3056_v31 = vld [vmem:[#allocation6 + $0xc8] sm:$0xff] }
 0x7c4   : > { %5855 = vmatprep.subr.mxu1 %v2483_v32  ;;  %v3055_v32 = vld [vmem:[#allocation6 + $0xc0] sm:$0xff] }
 0x7c5   : > { %5856 = vmatpush3.msra.mxu1 %v2467_v33  ;;  %v5786_v33 = vld [vmem:[%s7643_s3 + $0x10] sm:$0xff] }
 0x7c6   : > { %5857 = vmatprep.subr.mxu1 %v2482_v34  ;;  %6026 = vmatprep.mubr.msk.f32.mxu0 %vm2726_vm4, %v5786_v33  ;;  %v5798_v34 = vld [vmem:[%s7643_s3 + $0x30] sm:$0xff]  ;;  %v3555_v33 = vld [vmem:[#allocation6 + $0x1a8] sm:$0xff] }
 0x7c7   : > { %5858 = vmatpush3.msra.mxu1 %v2466_v35 }
 0x7c8   : > { %5859 = vmatprep.subr.mxu1 %v2481_v37 }
 0x7c9   : > { %5860 = vmatpush3.msra.mxu1 %v2465_v39 }
 0x7ca   : > { %5861 = vmatprep.subr.mxu1 %v2480_v40  ;;  %v5787_v40 = vld [vmem:[%s7643_s3 + $0x18] sm:$0xff] }
 0x7cb   : > { %5862 = vmatpush3.msra.mxu1 %v2464_v41  ;;  %v2642_v41 = vld [vmem:[%s7643_s3] sm:$0xff] }
 0x7cc   : > { %5863 = vmatprep.subr.mxu1 %v2479_v42 }
 0x7cd   : > { %5864 = vmatpush3.msra.mxu1 %v2463_v56  ;;  %v2643_v56 = vld [vmem:[%s7643_s3 + $0x8] sm:$0xff] }
 0x7ce   : > { %5865 = vmatprep.subr.mxu1 %v2478_v43  ;;  %v5793_v43 = vld [vmem:[%s7643_s3 + $0x20] sm:$0xff] }
 0x7cf   : > { %5866 = vmatpush3.msra.mxu1 %v2462_v24 }
 0x7d0   : > { %5867 = vmatprep.subr.mxu1 %v2477_v44  ;;  %v5794_v44 = vld [vmem:[%s7643_s3 + $0x28] sm:$0xff] }
 0x7d1   : > { %5868 = vmatpush3.msra.mxu1 %v2461_v46 }
 0x7d2   : > { %5869 = vmatprep.subr.mxu1 %v2476_v48 }
 0x7d3   : > { %5870 = vmatpush3.msra.mxu1 %v2460_v49  ;;  %v5799_v49 = vld [vmem:[%s7643_s3 + $0x38] sm:$0xff] }
 0x7d4   : > { %5871 = vmatprep.subr.mxu1 %v2475_v50  ;;  %v3227_v50 = vld [vmem:[#allocation6 + $0x138] sm:$0xff] }
 0x7d5   : > { %5872 = vmatpush3.msra.mxu1 %v2459_v51 }
 0x7d6   : > { %5873 = vmatprep.subr.mxu1 %v2474_v52  ;;  %v3226_v52 = vld [vmem:[#allocation6 + $0x130] sm:$0xff] }
 0x7d7   : > { %5874 = vmatpush3.msra.mxu1 %v2458_v53  ;;  %v3225_v53 = vld [vmem:[#allocation6 + $0x128] sm:$0xff] }
 0x7d8   : > { %5986 = vmatprep.subr.mxu1 %v7010_v4 }
 0x878   : > { %v2441_v36 = vpop.f32.mrf.mxu1 }
 0x879   : > { %v2446_v38 = vadd.f32 %v2441_v36, %v7311_v16  ;;  %v2647_v16 = vld [vmem:[#allocation6 + $0x50] sm:$0xff]  ;;  %v3224_v36 = vld [vmem:[#allocation6 + $0x120] sm:$0xff] }
 0x87a   : > { %v2443_v54 = vpop.f32.mrf.mxu1 }
 0x87b   : > { %v2447_v59 = vadd.f32 %v2443_v54, %v7314_v26  ;;  %v2454_v60 = vadd.f32 %v2452_v57, %v2446_v38  ;;  %v2645_v26 = vld [vmem:[#allocation6 + $0x40] sm:$0xff]  ;;  %v3223_v38 = vld [vmem:[#allocation6 + $0x118] sm:$0xff]  ;;  %v3222_v54 = vld [vmem:[#allocation6 + $0x110] sm:$0xff] }
 0x87d   : > { %v2455_v61 = vadd.f32 %v2452_v57, %v2447_v59  ;;  %v7327_v0 = vmax.f32 %v2454_v60, 0.0  ;;  %v3221_v57 = vld [vmem:[#allocation6 + $0x108] sm:$0xff]  ;;  %v3220_v59 = vld [vmem:[#allocation6 + $0x100] sm:$0xff] }
 0x87e   : > { %v5803_v60 = vld [vmem:[%s7643_s3 + $0x40] sm:$0xff] }
 0x87f   : > { %v7325_v62 = vmax.f32 %v2455_v61, 0.0 }
 0x881   : > { %2554 = vmatprep.mubr.f32.mxu1 %v7325_v62 }
 0x882   : > { %2555 = vmatmul.mubr.f32.vlgmr.msra.gmra.mxu1 %v7327_v0 }
 0x883   : > { %5987 = vmatpush3.msra.mxu1 %v2567_v1  ;;  %6002 = vmatprep.mubr.msk.f32.mxu1 %vm7012_vm2, %v7010_v4 }
 0x884   : > { %5988 = vmatprep.subr.mxu1 %v7010_v4 }
 0x885   : > { %5989 = vmatpush3.msra.mxu1 %v2566_v45 }
 0x886   : > { %5990 = vmatprep.subr.mxu1 %v7010_v4 }
 0x887   : > { %5991 = vmatpush3.msra.mxu1 %v2565_v47 }
 0x888   : > { %5992 = vmatprep.subr.mxu1 %v7010_v4 }
 0x889   : > { %5993 = vmatpush3.msra.mxu1 %v2564_v2 }
 0x88a   : > { %5994 = vmatprep.subr.mxu1 %v7010_v4 }
 0x88b   : > { %5995 = vmatpush3.msra.mxu1 %v2563_v5 }
 0x88c   : > { %5996 = vmatprep.subr.mxu1 %v7010_v4 }
 0x88d   : > { %5997 = vmatpush3.msra.mxu1 %v2562_v7 }
 0x88e   : > { %5998 = vmatprep.subr.mxu1 %v7010_v4 }
 0x88f   : > { %5999 = vmatpush3.msra.mxu1 %v2561_v8 }
 0x890   : > { %6000 = vmatprep.subr.mxu1 %v7010_v4 }
 0x891   : > { %6001 = vmatpush3.msra.mxu1 %v2560_v9 }
 0x892   : > { %6005 = vmatprep.subr.mxu1 %v7010_v4 }
 0x942   : > { %v5875_v10 = vpop.f32.mrf.mxu1 }
 0x944   : > { %v5876_v11 = vpop.f32.mrf.mxu1 }
 0x945   : > { %v7341_v12 = vadd.f32 %v5876_v11, %v5875_v10 }
 0x947   : > { %6003 = vmatmul.mubr.msk.f32.vlgmr.msra.gmra.mxu1 %vm2568_vm3, %v7341_v12 }
 0x948   : > { %6006 = vmatpush3.msra.mxu1 %v2652_v55  ;;  %6021 = vmatprep.mubr.msk.f32.mxu1 %vm7012_vm2, %v7010_v4 }
 0x949   : > { %6007 = vmatprep.subr.mxu1 %v7010_v4 }
 0x94a   : > { %6008 = vmatpush3.msra.mxu1 %v2651_v58 }
 0x94b   : > { %6009 = vmatprep.subr.mxu1 %v7010_v4 }
 0x94c   : > { %6010 = vmatpush3.msra.mxu1 %v2650_v13 }
 0x94d   : > { %6011 = vmatprep.subr.mxu1 %v7010_v4 }
 0x94e   : > { %6012 = vmatpush3.msra.mxu1 %v2649_v14 }
 0x94f   : > { %6013 = vmatprep.subr.mxu1 %v7010_v4 }
 0x950   : > { %6014 = vmatpush3.msra.mxu1 %v2648_v15  ;;  %v5804_v15 = vld [vmem:[%s7643_s3 + $0x48] sm:$0xff] }
 0x951   : > { %6015 = vmatprep.subr.mxu1 %v7010_v4 }
 0x952   : > { %6016 = vmatpush3.msra.mxu1 %v2647_v16  ;;  %v3392_v16 = vld [vmem:[#allocation6 + $0x178] sm:$0xff] }
 0x953   : > { %6017 = vmatprep.subr.mxu1 %v7010_v4 }
 0x954   : > { %6018 = vmatpush3.msra.mxu1 %v2646_v17 }
 0x955   : > { %6019 = vmatprep.subr.mxu1 %v7010_v4 }
 0x956   : > { %6020 = vmatpush3.msra.mxu1 %v2645_v26  ;;  %v3391_v26 = vld [vmem:[#allocation6 + $0x170] sm:$0xff] }
 0x957   : > { %6022 = vmatmul.mubr.msk.f32.vlgmr.msra.gmra.mxu1 %vm2568_vm3, %v7341_v12  ;;  %6034 = vmatprep.subr.mxu1 %v7010_v4 }
 0x958   : > { %6035 = vmatpush3.msra.mxu1 %v2897_v18  ;;  %6050 = vmatprep.mubr.msk.f32.mxu1 %vm7012_vm2, %v7010_v4  ;;  %v3390_v18 = vld [vmem:[#allocation6 + $0x168] sm:$0xff] }
 0x959   : > { %6036 = vmatprep.subr.mxu1 %v7010_v4 }
 0x95a   : > { %6037 = vmatpush3.msra.mxu1 %v2896_v19  ;;  %v3389_v19 = vld [vmem:[#allocation6 + $0x160] sm:$0xff] }
 0x95b   : > { %6038 = vmatprep.subr.mxu1 %v7010_v4 }
 0x95c   : > { %6039 = vmatpush3.msra.mxu1 %v2895_v20  ;;  %v3388_v20 = vld [vmem:[#allocation6 + $0x158] sm:$0xff] }
 0x95d   : > { %6040 = vmatprep.subr.mxu1 %v7010_v4 }
 0x95e   : > { %6041 = vmatpush3.msra.mxu1 %v2894_v21  ;;  %v3387_v21 = vld [vmem:[#allocation6 + $0x150] sm:$0xff] }
 0x95f   : > { %6042 = vmatprep.subr.mxu1 %v7010_v4 }
 0x960   : > { %6043 = vmatpush3.msra.mxu1 %v2893_v63  ;;  %v3386_v63 = vld [vmem:[#allocation6 + $0x148] sm:$0xff] }
 0x961   : > { %6044 = vmatprep.subr.mxu1 %v7010_v4 }
 0x962   : > { %6045 = vmatpush3.msra.mxu1 %v2892_v22  ;;  %v3385_v22 = vld [vmem:[#allocation6 + $0x140] sm:$0xff] }
 0x963   : > { %6046 = vmatprep.subr.mxu1 %v7010_v4 }
 0x964   : > { %6047 = vmatpush3.msra.mxu1 %v2891_v3  ;;  %v5808_v3 = vld [vmem:[%s7643_s3 + $0x50] sm:$0xff] }
 0x965   : > { %6048 = vmatprep.subr.mxu1 %v7010_v4 }
 0x966   : > { %6049 = vmatpush3.msra.mxu1 %v2890_v6 }
 0x967   : > { %6051 = vmatmul.mubr.msk.f32.vlgmr.msra.gmra.mxu1 %vm2568_vm3, %v7341_v12  ;;  %6058 = vmatprep.subr.mxu1 %v7010_v4 }
 0x968   : > { %6059 = vmatpush3.msra.mxu1 %v3062_v23  ;;  %6074 = vmatprep.mubr.msk.f32.mxu1 %vm7012_vm2, %v7010_v4 }
 0x969   : > { %6060 = vmatprep.subr.mxu1 %v7010_v4 }
 0x96a   : > { %6061 = vmatpush3.msra.mxu1 %v3061_v25 }
 0x96b   : > { %6062 = vmatprep.subr.mxu1 %v7010_v4 }
 0x96c   : > { %6063 = vmatpush3.msra.mxu1 %v3060_v27 }
 0x96d   : > { %6064 = vmatprep.subr.mxu1 %v7010_v4 }
 0x96e   : > { %6065 = vmatpush3.msra.mxu1 %v3059_v28 }
 0x96f   : > { %6066 = vmatprep.subr.mxu1 %v7010_v4 }
 0x970   : > { %6067 = vmatpush3.msra.mxu1 %v3058_v29  ;;  %v5809_v29 = vld [vmem:[%s7643_s3 + $0x58] sm:$0xff] }
 0x971   : > { %6068 = vmatprep.subr.mxu1 %v7010_v4 }
 0x972   : > { %6069 = vmatpush3.msra.mxu1 %v3057_v30  ;;  %v3557_v30 = vld [vmem:[#allocation6 + $0x1b8] sm:$0xff] }
 0x973   : > { %6070 = vmatprep.subr.mxu1 %v7010_v4 }
 0x974   : > { %6071 = vmatpush3.msra.mxu1 %v3056_v31 }
 0x975   : > { %6072 = vmatprep.subr.mxu1 %v7010_v4 }
 0x976   : > { %6073 = vmatpush3.msra.mxu1 %v3055_v32  ;;  %v3556_v32 = vld [vmem:[#allocation6 + $0x1b0] sm:$0xff] }
 0x977   : > { %6075 = vmatmul.mubr.msk.f32.vlgmr.msra.gmra.mxu1 %vm2568_vm3, %v7341_v12 }
 0x978   : > { %6079 = vmatprep.mubr.msk.f32.mxu1 %vm2726_vm4, %v5798_v34  ;;  %v3554_v34 = vld [vmem:[#allocation6 + $0x1a0] sm:$0xff] }
 0xa07   : > { %v2638_v35 = vpop.f32.mrf.mxu1 }
 0xa09   : > { %v6004_v37 = vpop.f32.mrf.mxu1 }
 0xa0a   : > { %v3552_v37 = vld [vmem:[#allocation6 + $0x190] sm:$0xff] }
 0xa17   : > { %v2719_v39 = vpop.f32.mrf.mxu1 }
 0xa18   : > { %6024 = vmatprep.subr.mxu0 %v2719_v39 }
 0xa19   : > { %v6023_v42 = vpop.f32.mrf.mxu1  ;;  %6025 = vmatpush3.msra.mxu0 %v2719_v39  ;;  %v3551_v39 = vld [vmem:[#allocation6 + $0x188] sm:$0xff] }
 0xa1a   : > { %6029 = vmatprep.subr.mxu0 %v2638_v35  ;;  %6027 = vmatmul.mubr.msk.f32.vlgmr.msra.gmra.mxu0 %vm2726_vm4, %v5787_v40  ;;  %v3550_v40 = vld [vmem:[#allocation6 + $0x180] sm:$0xff] }
 0xa1b   : > { %6030 = vmatpush3.msra.mxu0 %v2638_v35  ;;  %6031 = vmatprep.mubr.msk.f32.mxu0 %vm2726_vm4, %v2642_v41  ;;  %v3553_v35 = vld [vmem:[#allocation6 + $0x198] sm:$0xff]  ;;  %v5813_v41 = vld [vmem:[%s7643_s3 + $0x60] sm:$0xff] }
 0xa1e   : > { %6032 = vmatmul.mubr.msk.f32.vlgmr.msra.gmra.mxu0 %vm2726_vm4, %v2643_v56 }
 0xa1f   : > { %6055 = vmatprep.mubr.msk.f32.mxu0 %vm2726_vm4, %v5793_v43 }
 0xa27   : > { %v2964_v24 = vpop.f32.mrf.mxu1 }
 0xa28   : > { %6053 = vmatprep.subr.mxu0 %v2964_v24 }
 0xa29   : > { %v6052_v46 = vpop.f32.mrf.mxu1  ;;  %6054 = vmatpush3.msra.mxu0 %v2964_v24 }
 0xa2a   : > { %6056 = vmatmul.mubr.msk.f32.vlgmr.msra.gmra.mxu0 %vm2726_vm4, %v5794_v44  ;;  %v5814_v46 = vld [vmem:[%s7643_s3 + $0x68] sm:$0xff] }
 0xa2b   : > { %6103 = vmatprep.mubr.msk.f32.mxu0 %vm2726_vm4, %v5803_v60 }
 0xa37   : > { %v3129_v48 = vpop.f32.mrf.mxu1 }
 0xa38   : > { %6077 = vmatprep.subr.mxu1 %v3129_v48 }
 0xa39   : > { %v6076_v51 = vpop.f32.mrf.mxu1  ;;  %6078 = vmatpush3.msra.mxu1 %v3129_v48  ;;  %v3722_v48 = vld [vmem:[#allocation6 + $0x1f8] sm:$0xff] }
 0xa3a   : > { %6080 = vmatmul.mubr.msk.f32.vlgmr.msra.gmra.mxu1 %vm2726_vm4, %v5799_v49  ;;  %6082 = vmatprep.subr.mxu1 %v7010_v4  ;;  %v3720_v51 = vld [vmem:[#allocation6 + $0x1e8] sm:$0xff] }
 0xa3b   : > { %6083 = vmatpush3.msra.mxu1 %v3227_v50  ;;  %6098 = vmatprep.mubr.msk.f32.mxu1 %vm7012_vm2, %v7010_v4  ;;  %v3721_v50 = vld [vmem:[#allocation6 + $0x1f0] sm:$0xff] }
 0xa3c   : > { %6084 = vmatprep.subr.mxu1 %v7010_v4 }
 0xa3d   : > { %6085 = vmatpush3.msra.mxu1 %v3226_v52  ;;  %v3719_v52 = vld [vmem:[#allocation6 + $0x1e0] sm:$0xff] }
 0xa3e   : > { %6086 = vmatprep.subr.mxu1 %v7010_v4 }
 0xa3f   : > { %6087 = vmatpush3.msra.mxu1 %v3225_v53  ;;  %v3718_v53 = vld [vmem:[#allocation6 + $0x1d8] sm:$0xff] }
 0xa40   : > { %6088 = vmatprep.subr.mxu1 %v7010_v4 }
 0xa41   : > { %6089 = vmatpush3.msra.mxu1 %v3224_v36  ;;  %v3717_v36 = vld [vmem:[#allocation6 + $0x1d0] sm:$0xff] }
 0xa42   : > { %6090 = vmatprep.subr.mxu1 %v7010_v4 }
 0xa43   : > { %6091 = vmatpush3.msra.mxu1 %v3223_v38  ;;  %v3716_v38 = vld [vmem:[#allocation6 + $0x1c8] sm:$0xff] }
 0xa44   : > { %6092 = vmatprep.subr.mxu1 %v7010_v4 }
 0xa45   : > { %6093 = vmatpush3.msra.mxu1 %v3222_v54  ;;  %v3715_v54 = vld [vmem:[#allocation6 + $0x1c0] sm:$0xff] }
 0xa46   : > { %6094 = vmatprep.subr.mxu1 %v7010_v4 }
 0xa47   : > { %6095 = vmatpush3.msra.mxu1 %v3221_v57  ;;  %v5818_v57 = vld [vmem:[%s7643_s3 + $0x70] sm:$0xff] }
 0xa48   : > { %6096 = vmatprep.subr.mxu1 %v7010_v4 }
 0xa49   : > { %6097 = vmatpush3.msra.mxu1 %v3220_v59 }
 0xa4a   : > { %6099 = vmatmul.mubr.msk.f32.vlgmr.msra.gmra.mxu1 %vm2568_vm3, %v7341_v12 }
 0xa4b   : > { %6127 = vmatprep.mubr.msk.f32.mxu1 %vm2726_vm4, %v5808_v3  ;;  %v6286_v3 = vld [vmem:[#allocation4 + $0x90] sm:$0xff] }
 0xada   : > { %v6028_v61 = vpop.f32.mrf.mxu0 }
 0xadc   : > { %v2799_v1 = vpop.f32.mrf.mxu0 }
 0xade   : > { %v6033_v45 = vpop.f32.mrf.mxu0 }
 0xadf   : > { %v2886_v47 = vadd.f32 %v6033_v45, %v6028_v61 }
 0xae0   : > { %v2880_v2 = vpop.f32.mrf.mxu0 }
 0xae1   : > { %v2881_v5 = vadd.f32 %v2880_v2, %v2799_v1  ;;  %v3887_v2 = vld [vmem:[#allocation6 + $0x238] sm:$0xff] }
 0xaea   : > { %v6057_v7 = vpop.f32.mrf.mxu0 }
 0xaeb   : > { %v3053_v8 = vadd.f32 %v6057_v7, %v2886_v47  ;;  %v5819_v47 = vld [vmem:[%s7643_s3 + $0x78] sm:$0xff]  ;;  %v3886_v7 = vld [vmem:[#allocation6 + $0x230] sm:$0xff] }
 0xaec   : > { %v3043_v9 = vpop.f32.mrf.mxu0 }
 0xaed   : > { %v3052_v10 = vadd.f32 %v3043_v9, %v2881_v5  ;;  %v3884_v9 = vld [vmem:[#allocation6 + $0x220] sm:$0xff] }
 0xafa   : > { %v6081_v11 = vpop.f32.mrf.mxu1 }
 0xafb   : > { %v3218_v55 = vadd.f32 %v6081_v11, %v3053_v8  ;;  %v3885_v8 = vld [vmem:[#allocation6 + $0x228] sm:$0xff]  ;;  %v3882_v11 = vld [vmem:[#allocation6 + $0x210] sm:$0xff] }
 0xafc   : > { %v3208_v58 = vpop.f32.mrf.mxu1 }
 0xafd   : > { %v3217_v13 = vadd.f32 %v3208_v58, %v3052_v10  ;;  %v3883_v10 = vld [vmem:[#allocation6 + $0x218] sm:$0xff]  ;;  %v3880_v58 = vld [vmem:[#allocation6 + $0x200] sm:$0xff] }
 0xb0a   : > { %v3294_v14 = vpop.f32.mrf.mxu1 }
 0xb0b   : > { %6101 = vmatprep.subr.mxu0 %v3294_v14 }
 0xb0c   : > { %v6100_v17 = vpop.f32.mrf.mxu1  ;;  %6102 = vmatpush3.msra.mxu0 %v3294_v14  ;;  %v6274_v14 = vld [vmem:[#allocation4 + $0xf0] sm:$0xff] }
 0xb0d   : > { %6104 = vmatmul.mubr.msk.f32.vlgmr.msra.gmra.mxu0 %vm2726_vm4, %v5804_v15  ;;  %6106 = vmatprep.subr.mxu0 %v7010_v4  ;;  %v6275_v15 = vld [vmem:[#allocation4 + $0xe8] sm:$0xff]  ;;  %v6277_v17 = vld [vmem:[#allocation4 + $0xd8] sm:$0xff] }
 0xb0e   : > { %6107 = vmatpush3.msra.mxu0 %v3392_v16  ;;  %6122 = vmatprep.mubr.msk.f32.mxu0 %vm7012_vm2, %v7010_v4  ;;  %v6276_v16 = vld [vmem:[#allocation4 + $0xe0] sm:$0xff] }
 0xb0f   : > { %6108 = vmatprep.subr.mxu0 %v7010_v4 }
 0xb10   : > { %6109 = vmatpush3.msra.mxu0 %v3391_v26  ;;  %v6278_v26 = vld [vmem:[#allocation4 + $0xd0] sm:$0xff] }
 0xb11   : > { %6110 = vmatprep.subr.mxu0 %v7010_v4 }
 0xb12   : > { %6111 = vmatpush3.msra.mxu0 %v3390_v18  ;;  %v6279_v18 = vld [vmem:[#allocation4 + $0xc8] sm:$0xff] }
 0xb13   : > { %6112 = vmatprep.subr.mxu0 %v7010_v4 }
 0xb14   : > { %6113 = vmatpush3.msra.mxu0 %v3389_v19  ;;  %v6280_v19 = vld [vmem:[#allocation4 + $0xc0] sm:$0xff] }
 0xb15   : > { %6114 = vmatprep.subr.mxu0 %v7010_v4 }
 0xb16   : > { %6115 = vmatpush3.msra.mxu0 %v3388_v20  ;;  %v6281_v20 = vld [vmem:[#allocation4 + $0xb8] sm:$0xff] }
 0xb17   : > { %6116 = vmatprep.subr.mxu0 %v7010_v4 }
 0xb18   : > { %6117 = vmatpush3.msra.mxu0 %v3387_v21  ;;  %v6282_v21 = vld [vmem:[#allocation4 + $0xb0] sm:$0xff] }
 0xb19   : > { %6118 = vmatprep.subr.mxu0 %v7010_v4 }
 0xb1a   : > { %6119 = vmatpush3.msra.mxu0 %v3386_v63  ;;  %v6284_v63 = vld [vmem:[#allocation4 + $0xa0] sm:$0xff] }
 0xb1b   : > { %6120 = vmatprep.subr.mxu0 %v7010_v4 }
 0xb1c   : > { %6121 = vmatpush3.msra.mxu0 %v3385_v22  ;;  %v6285_v22 = vld [vmem:[#allocation4 + $0x98] sm:$0xff] }
 0xb1d   : > { %6123 = vmatmul.mubr.msk.f32.vlgmr.msra.gmra.mxu0 %vm2568_vm3, %v7341_v12 }
 0xb1e   : > { %6151 = vmatprep.mubr.msk.f32.mxu0 %vm2726_vm4, %v5813_v41  ;;  %v6302_v41 = vld [vmem:[#allocation4 + $0x10] sm:$0xff] }
 0xbcd   : > { %v6105_v6 = vpop.f32.mrf.mxu0 }
 0xbce   : > { %v3383_v23 = vadd.f32 %v6105_v6, %v3218_v55  ;;  %v3881_v55 = vld [vmem:[#allocation6 + $0x208] sm:$0xff] }
 0xbcf   : > { %v3373_v25 = vpop.f32.mrf.mxu0  ;;  %v6287_v6 = vld [vmem:[#allocation4 + $0x88] sm:$0xff] }
 0xbd0   : > { %v3382_v27 = vadd.f32 %v3373_v25, %v3217_v13  ;;  %v6273_v13 = vld [vmem:[#allocation4 + $0xf8] sm:$0xff] }
 0xbd1   : > { %v6289_v25 = vld [vmem:[#allocation4 + $0x78] sm:$0xff] }
 0xbdd   : > { %v3459_v28 = vpop.f32.mrf.mxu0 }
 0xbde   : > { %6125 = vmatprep.subr.mxu1 %v3459_v28 }
 0xbdf   : > { %v6124_v31 = vpop.f32.mrf.mxu0  ;;  %6126 = vmatpush3.msra.mxu1 %v3459_v28  ;;  %v6291_v28 = vld [vmem:[#allocation4 + $0x68] sm:$0xff] }
 0xbe0   : > { %6128 = vmatmul.mubr.msk.f32.vlgmr.msra.gmra.mxu1 %vm2726_vm4, %v5809_v29  ;;  %6130 = vmatprep.subr.mxu1 %v7010_v4  ;;  %v6292_v29 = vld [vmem:[#allocation4 + $0x60] sm:$0xff]  ;;  %v6294_v31 = vld [vmem:[#allocation4 + $0x50] sm:$0xff] }
 0xbe1   : > { %6131 = vmatpush3.msra.mxu1 %v3557_v30  ;;  %6146 = vmatprep.mubr.msk.f32.mxu1 %vm7012_vm2, %v7010_v4  ;;  %v6293_v30 = vld [vmem:[#allocation4 + $0x58] sm:$0xff] }
 0xbe2   : > { %6132 = vmatprep.subr.mxu1 %v7010_v4 }
 0xbe3   : > { %6133 = vmatpush3.msra.mxu1 %v3556_v32  ;;  %v6295_v32 = vld [vmem:[#allocation4 + $0x48] sm:$0xff] }
 0xbe4   : > { %6134 = vmatprep.subr.mxu1 %v7010_v4 }
 0xbe5   : > { %6135 = vmatpush3.msra.mxu1 %v3555_v33  ;;  %v6296_v33 = vld [vmem:[#allocation4 + $0x40] sm:$0xff] }
 0xbe6   : > { %6136 = vmatprep.subr.mxu1 %v7010_v4 }
 0xbe7   : > { %6137 = vmatpush3.msra.mxu1 %v3554_v34  ;;  %v6297_v34 = vld [vmem:[#allocation4 + $0x38] sm:$0xff] }
 0xbe8   : > { %6138 = vmatprep.subr.mxu1 %v7010_v4 }
 0xbe9   : > { %6139 = vmatpush3.msra.mxu1 %v3553_v35  ;;  %v6298_v35 = vld [vmem:[#allocation4 + $0x30] sm:$0xff] }
 0xbea   : > { %6140 = vmatprep.subr.mxu1 %v7010_v4 }
 0xbeb   : > { %6141 = vmatpush3.msra.mxu1 %v3552_v37  ;;  %v6299_v37 = vld [vmem:[#allocation4 + $0x28] sm:$0xff] }
 0xbec   : > { %6142 = vmatprep.subr.mxu1 %v7010_v4 }
 0xbed   : > { %6143 = vmatpush3.msra.mxu1 %v3551_v39  ;;  %v6300_v39 = vld [vmem:[#allocation4 + $0x20] sm:$0xff] }
 0xbee   : > { %6144 = vmatprep.subr.mxu1 %v7010_v4 }
 0xbef   : > { %6145 = vmatpush3.msra.mxu1 %v3550_v40  ;;  %v6301_v40 = vld [vmem:[#allocation4 + $0x18] sm:$0xff] }
 0xbf0   : > { %6147 = vmatmul.mubr.msk.f32.vlgmr.msra.gmra.mxu1 %vm2568_vm3, %v7341_v12 }
 0xbf1   : > { %6175 = vmatprep.mubr.msk.f32.mxu1 %vm2726_vm4, %v5818_v57  ;;  %v6318_v57 = vld [vmem:[#allocation4 + $0x190] sm:$0xff] }
 0xca0   : > { %v6129_v42 = vpop.f32.mrf.mxu1 }
 0xca1   : > { %v3548_v56 = vadd.f32 %v6129_v42, %v3383_v23  ;;  %v6288_v23 = vld [vmem:[#allocation4 + $0x80] sm:$0xff]  ;;  %v6303_v42 = vld [vmem:[#allocation4 + $0x8] sm:$0xff] }
 0xca2   : > { %v3538_v43 = vpop.f32.mrf.mxu1 }
 0xca3   : > { %v3547_v24 = vadd.f32 %v3538_v43, %v3382_v27  ;;  %v6290_v27 = vld [vmem:[#allocation4 + $0x70] sm:$0xff]  ;;  %v6305_v43 = vld [vmem:[#allocation4 + $0x1f8] sm:$0xff] }
 0xcb0   : > { %v3624_v44 = vpop.f32.mrf.mxu1 }
 0xcb1   : > { %6149 = vmatprep.subr.mxu0 %v3624_v44 }
 0xcb2   : > { %v6148_v49 = vpop.f32.mrf.mxu1  ;;  %6150 = vmatpush3.msra.mxu0 %v3624_v44  ;;  %v6307_v44 = vld [vmem:[#allocation4 + $0x1e8] sm:$0xff] }
 0xcb3   : > { %6152 = vmatmul.mubr.msk.f32.vlgmr.msra.gmra.mxu0 %vm2726_vm4, %v5814_v46  ;;  %6154 = vmatprep.subr.mxu0 %v7010_v4  ;;  %v6308_v46 = vld [vmem:[#allocation4 + $0x1e0] sm:$0xff]  ;;  %v6310_v49 = vld [vmem:[#allocation4 + $0x1d0] sm:$0xff] }
 0xcb4   : > { %6155 = vmatpush3.msra.mxu0 %v3722_v48  ;;  %6170 = vmatprep.mubr.msk.f32.mxu0 %vm7012_vm2, %v7010_v4  ;;  %v6309_v48 = vld [vmem:[#allocation4 + $0x1d8] sm:$0xff] }
 0xcb5   : > { %6156 = vmatprep.subr.mxu0 %v7010_v4 }
 0xcb6   : > { %6157 = vmatpush3.msra.mxu0 %v3721_v50  ;;  %v6311_v50 = vld [vmem:[#allocation4 + $0x1c8] sm:$0xff] }
 0xcb7   : > { %6158 = vmatprep.subr.mxu0 %v7010_v4 }
 0xcb8   : > { %6159 = vmatpush3.msra.mxu0 %v3720_v51  ;;  %v6312_v51 = vld [vmem:[#allocation4 + $0x1c0] sm:$0xff] }
 0xcb9   : > { %6160 = vmatprep.subr.mxu0 %v7010_v4 }
 0xcba   : > { %6161 = vmatpush3.msra.mxu0 %v3719_v52  ;;  %v6313_v52 = vld [vmem:[#allocation4 + $0x1b8] sm:$0xff] }
 0xcbb   : > { %6162 = vmatprep.subr.mxu0 %v7010_v4 }
 0xcbc   : > { %6163 = vmatpush3.msra.mxu0 %v3718_v53  ;;  %v6314_v53 = vld [vmem:[#allocation4 + $0x1b0] sm:$0xff] }
 0xcbd   : > { %6164 = vmatprep.subr.mxu0 %v7010_v4 }
 0xcbe   : > { %6165 = vmatpush3.msra.mxu0 %v3717_v36  ;;  %v6315_v36 = vld [vmem:[#allocation4 + $0x1a8] sm:$0xff] }
 0xcbf   : > { %6166 = vmatprep.subr.mxu0 %v7010_v4 }
 0xcc0   : > { %6167 = vmatpush3.msra.mxu0 %v3716_v38  ;;  %v6316_v38 = vld [vmem:[#allocation4 + $0x1a0] sm:$0xff] }
 0xcc1   : > { %6168 = vmatprep.subr.mxu0 %v7010_v4 }
 0xcc2   : > { %6169 = vmatpush3.msra.mxu0 %v3715_v54  ;;  %v6317_v54 = vld [vmem:[#allocation4 + $0x198] sm:$0xff] }
 0xcc3   : > { %6171 = vmatmul.mubr.msk.f32.vlgmr.msra.gmra.mxu0 %vm2568_vm3, %v7341_v12 }
 0xd73   : > { %v6153_v59 = vpop.f32.mrf.mxu0 }
 0xd74   : > { %v7488_v60 = vadd.f32 %v6153_v59, %v3548_v56  ;;  %v6304_v56 = vld [vmem:[#allocation4] sm:$0xff]  ;;  %v6319_v59 = vld [vmem:[#allocation4 + $0x188] sm:$0xff] }
 0xd75   : > { %v3703_v61 = vpop.f32.mrf.mxu0 }
 0xd76   : > { %v7490_v1 = vadd.f32 %v3703_v61, %v3547_v24  ;;  %v6306_v24 = vld [vmem:[#allocation4 + $0x1f0] sm:$0xff]  ;;  %v6320_v61 = vld [vmem:[#allocation4 + $0x180] sm:$0xff] }
 0xd83   : > { %v3789_v45 = vpop.f32.mrf.mxu0 }
 0xd84   : > { %6173 = vmatprep.subr.mxu1 %v3789_v45 }
 0xd85   : > { %v6172_v5 = vpop.f32.mrf.mxu0  ;;  %6174 = vmatpush3.msra.mxu1 %v3789_v45  ;;  %v6321_v45 = vld [vmem:[#allocation4 + $0x178] sm:$0xff] }
 0xd86   : > { %6176 = vmatmul.mubr.msk.f32.vlgmr.msra.gmra.mxu1 %vm2726_vm4, %v5819_v47  ;;  %6178 = vmatprep.subr.mxu1 %v7010_v4  ;;  %v6322_v47 = vld [vmem:[#allocation4 + $0x170] sm:$0xff]  ;;  %v6324_v5 = vld [vmem:[#allocation4 + $0x160] sm:$0xff] }
 0xd87   : > { %6179 = vmatpush3.msra.mxu1 %v3887_v2  ;;  %6194 = vmatprep.mubr.msk.f32.mxu1 %vm7012_vm2, %v7010_v4  ;;  %v6323_v2 = vld [vmem:[#allocation4 + $0x168] sm:$0xff] }
 0xd88   : > { %6180 = vmatprep.subr.mxu1 %v7010_v4 }
 0xd89   : > { %6181 = vmatpush3.msra.mxu1 %v3886_v7  ;;  %v6325_v7 = vld [vmem:[#allocation4 + $0x158] sm:$0xff] }
 0xd8a   : > { %6182 = vmatprep.subr.mxu1 %v7010_v4 }
 0xd8b   : > { %6183 = vmatpush3.msra.mxu1 %v3885_v8  ;;  %v6326_v8 = vld [vmem:[#allocation4 + $0x150] sm:$0xff] }
 0xd8c   : > { %6184 = vmatprep.subr.mxu1 %v7010_v4 }
 0xd8d   : > { %6185 = vmatpush3.msra.mxu1 %v3884_v9  ;;  %v6327_v9 = vld [vmem:[#allocation4 + $0x148] sm:$0xff] }
 0xd8e   : > { %6186 = vmatprep.subr.mxu1 %v7010_v4 }
 0xd8f   : > { %6187 = vmatpush3.msra.mxu1 %v3883_v10  ;;  %v6328_v10 = vld [vmem:[#allocation4 + $0x140] sm:$0xff] }
 0xd90   : > { %6188 = vmatprep.subr.mxu1 %v7010_v4 }
 0xd91   : > { %6189 = vmatpush3.msra.mxu1 %v3882_v11  ;;  %v6329_v11 = vld [vmem:[#allocation4 + $0x138] sm:$0xff] }
 0xd92   : > { %6190 = vmatprep.subr.mxu1 %v7010_v4 }
 0xd93   : > { %6191 = vmatpush3.msra.mxu1 %v3881_v55  ;;  %v6330_v55 = vld [vmem:[#allocation4 + $0x130] sm:$0xff] }
 0xd94   : > { %6192 = vmatprep.subr.mxu1 %v7010_v4 }
 0xd95   : > { %6193 = vmatpush3.msra.mxu1 %v3880_v58  ;;  %v6331_v58 = vld [vmem:[#allocation4 + $0x128] sm:$0xff] }
 0xd96   : > { %6195 = vmatmul.mubr.msk.f32.vlgmr.msra.gmra.mxu1 %vm2568_vm3, %v7341_v12  ;;  %4159 = vmatprep.subr.mxu1 %v6273_v13  ;;  %v6283_v12 = vld [vmem:[#allocation4 + $0xa8] sm:$0xff]  ;;  %v6332_v13 = vld [vmem:[#allocation4 + $0x120] sm:$0xff] }
 0xd97   : > { %4160 = vmatpush1.msra.mxu1 %v6274_v14  ;;  %v6333_v14 = vld [vmem:[#allocation4 + $0x118] sm:$0xff] }
 0xd98   : > { %4161 = vmatprep.subr.mxu1 %v6275_v15  ;;  %v6334_v15 = vld [vmem:[#allocation4 + $0x110] sm:$0xff] }
 0xd99   : > { %4162 = vmatpush1.msra.mxu1 %v6276_v16  ;;  %v6335_v16 = vld [vmem:[#allocation4 + $0x108] sm:$0xff] }
 0xd9a   : > { %4163 = vmatprep.subr.mxu1 %v6277_v17  ;;  %v6336_v17 = vld [vmem:[#allocation4 + $0x100] sm:$0xff] }
 0xd9b   : > { %4164 = vmatpush1.msra.mxu1 %v6278_v26  ;;  %v5823_v26 = vld [vmem:[%s7643_s3 + $0x80] sm:$0xff] }
 0xd9c   : > { %4165 = vmatprep.subr.mxu1 %v6279_v18  ;;  %6199 = vmatprep.mubr.msk.f32.mxu0 %vm2726_vm4, %v5823_v26  ;;  %v4045_v18 = vld [vmem:[%s7644_s4 + $0x8] sm:$0xff] }
 0xd9d   : > { %4166 = vmatpush1.msra.mxu1 %v6280_v19  ;;  %4053 = vperm.xlu1 %6271, %v4045_v18   ;;  %v5604_v19 = vld [vmem:[%s7646_s6] sm:$0x3]  ;;  %v6362_v26 = vld [vmem:[#allocation4 + $0x230] sm:$0xff] }
 0xd9e   : > { %4167 = vmatprep.subr.mxu1 %v6281_v20  ;;  %v6363_v18 = vld [vmem:[#allocation4 + $0x228] sm:$0xff] }
 0xd9f   : > { %4168 = vmatpush1.msra.mxu1 %v6282_v21 }
 0xda0   : > { %4169 = vmatprep.subr.mxu1 %v6283_v12 }
 0xda1   : > { %4170 = vmatpush1.msra.mxu1 %v6284_v63  ;;  %5607 = vperm.xlu1 %6271, %v5604_v19   ;;  %v6364_v19 = vld [vmem:[#allocation4 + $0x220] sm:$0xff] }
 0xda2   : > { %4171 = vmatprep.subr.mxu1 %v6285_v22 }
 0xda3   : > { %4172 = vmatpush1.msra.mxu1 %v6286_v3  ;;  %v5824_v3 = vld [vmem:[%s7643_s3 + $0x88] sm:$0xff] }
 0xda4   : > { %4173 = vmatprep.subr.mxu1 %v6287_v6  ;;  %v4075_v6 = vld [vmem:[#allocation9 + $0x78] sm:$0xff] }
 0xda5   : > { %4174 = vmatpush1.msra.mxu1 %v6288_v23  ;;  %v4074_v23 = vld [vmem:[#allocation9 + $0x70] sm:$0xff] }
 0xda6   : > { %4175 = vmatprep.subr.mxu1 %v6289_v25 }
 0xda7   : > { %4176 = vmatpush1.msra.mxu1 %v6290_v27  ;;  %v4073_v27 = vld [vmem:[#allocation9 + $0x68] sm:$0xff] }
 0xda8   : > { %4177 = vmatprep.subr.mxu1 %v6291_v28  ;;  %v4072_v28 = vld [vmem:[#allocation9 + $0x60] sm:$0xff] }
 0xda9   : > { %4178 = vmatpush1.msra.mxu1 %v6292_v29  ;;  %v4069_v29 = vld [vmem:[#allocation9 + $0x48] sm:$0xff] }
 0xdaa   : > { %4179 = vmatprep.subr.mxu1 %v6293_v30  ;;  %v4068_v30 = vld [vmem:[#allocation9 + $0x40] sm:$0xff] }
 0xdab   : > { %4180 = vmatpush1.msra.mxu1 %v6294_v31  ;;  %v4067_v31 = vld [vmem:[#allocation9 + $0x38] sm:$0xff] }
 0xdac   : > { %4181 = vmatprep.subr.mxu1 %v6295_v32  ;;  %v4066_v32 = vld [vmem:[#allocation9 + $0x30] sm:$0xff] }
 0xdad   : > { %4182 = vmatpush1.msra.mxu1 %v6296_v33  ;;  %v4065_v33 = vld [vmem:[#allocation9 + $0x28] sm:$0xff] }
 0xdae   : > { %4183 = vmatprep.subr.mxu1 %v6297_v34  ;;  %v4064_v34 = vld [vmem:[#allocation9 + $0x20] sm:$0xff] }
 0xdaf   : > { %4184 = vmatpush1.msra.mxu1 %v6298_v35  ;;  %v4063_v35 = vld [vmem:[#allocation9 + $0x18] sm:$0xff] }
 0xdb0   : > { %4185 = vmatprep.subr.mxu1 %v6299_v37  ;;  %v4062_v37 = vld [vmem:[#allocation9 + $0x10] sm:$0xff] }
 0xdb1   : > { %4186 = vmatpush1.msra.mxu1 %v6300_v39  ;;  %v4061_v39 = vld [vmem:[#allocation9 + $0x8] sm:$0xff] }
 0xdb2   : > { %4187 = vmatprep.subr.mxu1 %v6301_v40  ;;  %v4060_v40 = vld [vmem:[#allocation9] sm:$0xff] }
 0xdb3   : > { %4188 = vmatpush1.msra.mxu1 %v6302_v41  ;;  %v6337_v41 = vld [vmem:[#allocation4 + $0x2f8] sm:$0xff] }
 0xdb4   : > { %4189 = vmatprep.subr.mxu1 %v6303_v42 }
 0xdb5   : > { %4190 = vmatpush1.msra.mxu1 %v6304_v56 }
 0xdb6   : > { %4191 = vmatprep.subr.mxu1 %v6305_v43 }
 0xdb7   : > { %4192 = vmatpush2.msra.mxu1 %v6306_v24 }
 0xdb8   : > { %4193 = vmatprep.subr.mxu1 %v6307_v44  ;;  %v4049_v44 = vpop.permute.xlu0 %4048 }
 0xdb9   : > { %4194 = vmatpush2.msra.mxu1 %v6308_v46 }
 0xdba   : > { %4195 = vmatprep.subr.mxu1 %v6309_v48 }
 0xdbb   : > { %4196 = vmatpush2.msra.mxu1 %v6310_v49 }
 0xdbc   : > { %4197 = vmatprep.subr.mxu1 %v6311_v50 }
 0xdbd   : > { %4198 = vmatpush2.msra.mxu1 %v6312_v51  ;;  %v6338_v51 = vld [vmem:[#allocation4 + $0x2f0] sm:$0xff] }
 0xdbe   : > { %4199 = vmatprep.subr.mxu1 %v6313_v52 }
 0xdbf   : > { %4200 = vmatpush2.msra.mxu1 %v6314_v53  ;;  %v6339_v53 = vld [vmem:[#allocation4 + $0x2e8] sm:$0xff] }
 0xdc0   : > { %4201 = vmatprep.subr.mxu1 %v6315_v36  ;;  %v6340_v36 = vld [vmem:[#allocation4 + $0x2e0] sm:$0xff] }
 0xdc1   : > { %4202 = vmatpush2.msra.mxu1 %v6316_v38  ;;  %v6341_v38 = vld [vmem:[#allocation4 + $0x2d8] sm:$0xff] }
 0xdc2   : > { %4203 = vmatprep.subr.mxu1 %v6317_v54  ;;  %v6342_v54 = vld [vmem:[#allocation4 + $0x2d0] sm:$0xff] }
 0xdc3   : > { %4204 = vmatpush2.msra.mxu1 %v6318_v57  ;;  %v6343_v57 = vld [vmem:[#allocation4 + $0x2c8] sm:$0xff] }
 0xdc4   : > { %4205 = vmatprep.subr.mxu1 %v6319_v59  ;;  %v6344_v59 = vld [vmem:[#allocation4 + $0x2c0] sm:$0xff] }
 0xdc5   : > { %4206 = vmatpush2.msra.mxu1 %v6320_v61  ;;  %v6345_v61 = vld [vmem:[#allocation4 + $0x2b8] sm:$0xff] }
 0xdc6   : > { %4207 = vmatprep.subr.mxu1 %v6321_v45  ;;  %v6346_v45 = vld [vmem:[#allocation4 + $0x2b0] sm:$0xff] }
 0xdc7   : > { %4208 = vmatpush2.msra.mxu1 %v6322_v47  ;;  %v6347_v47 = vld [vmem:[#allocation4 + $0x2a8] sm:$0xff] }
 0xdc8   : > { %4209 = vmatprep.subr.mxu1 %v6323_v2  ;;  %v6348_v2 = vld [vmem:[#allocation4 + $0x2a0] sm:$0xff] }
 0xdc9   : > { %4210 = vmatpush2.msra.mxu1 %v6324_v5  ;;  %v6349_v5 = vld [vmem:[#allocation4 + $0x298] sm:$0xff] }
 0xdca   : > { %4211 = vmatprep.subr.mxu1 %v6325_v7  ;;  %v6350_v7 = vld [vmem:[#allocation4 + $0x290] sm:$0xff] }
 0xdcb   : > { %4212 = vmatpush2.msra.mxu1 %v6326_v8  ;;  %v6351_v8 = vld [vmem:[#allocation4 + $0x288] sm:$0xff] }
 0xdcc   : > { %4213 = vmatprep.subr.mxu1 %v6327_v9  ;;  %v6352_v9 = vld [vmem:[#allocation4 + $0x280] sm:$0xff] }
 0xdcd   : > { %4214 = vmatpush2.msra.mxu1 %v6328_v10  ;;  %v6353_v10 = vld [vmem:[#allocation4 + $0x278] sm:$0xff] }
 0xdce   : > { %4215 = vmatprep.subr.mxu1 %v6329_v11  ;;  %v6354_v11 = vld [vmem:[#allocation4 + $0x270] sm:$0xff] }
 0xdcf   : > { %4216 = vmatpush2.msra.mxu1 %v6330_v55  ;;  %v6355_v55 = vld [vmem:[#allocation4 + $0x268] sm:$0xff] }
 0xdd0   : > { %4217 = vmatprep.subr.mxu1 %v6331_v58  ;;  %v6356_v58 = vld [vmem:[#allocation4 + $0x260] sm:$0xff] }
 0xdd1   : > { %4218 = vmatpush2.msra.mxu1 %v6332_v13  ;;  %v6357_v13 = vld [vmem:[#allocation4 + $0x258] sm:$0xff] }
 0xdd2   : > { %4219 = vmatprep.subr.mxu1 %v6333_v14  ;;  %v6358_v14 = vld [vmem:[#allocation4 + $0x250] sm:$0xff] }
 0xdd3   : > { %4220 = vmatpush2.msra.mxu1 %v6334_v15  ;;  %v6359_v15 = vld [vmem:[#allocation4 + $0x248] sm:$0xff] }
 0xdd4   : > { %4221 = vmatprep.subr.mxu1 %v6335_v16  ;;  %v6360_v16 = vld [vmem:[#allocation4 + $0x240] sm:$0xff] }
 0xdd5   : > { %4222 = vmatpush2.msra.mxu1 %v6336_v17  ;;  %v6361_v17 = vld [vmem:[#allocation4 + $0x238] sm:$0xff] }
 0xe18   : > { %v4054_v46 = vpop.permute.xlu1 %4053 }
 0xe46   : > { %v6177_v20 = vpop.f32.mrf.mxu1 }
 0xe47   : > { %v3878_v21 = vadd.f32 %v6177_v20, %v7488_v60  ;;  %v4071_v60 = vld [vmem:[#allocation9 + $0x58] sm:$0xff] }
 0xe48   : > { %v3868_v12 = vpop.f32.mrf.mxu1  ;;  %v6365_v20 = vld [vmem:[#allocation4 + $0x218] sm:$0xff] }
 0xe49   : > { %v3877_v63 = vadd.f32 %v3868_v12, %v7490_v1  ;;  %v4070_v1 = vld [vmem:[#allocation9 + $0x50] sm:$0xff]  ;;  %v6367_v12 = vld [vmem:[#allocation4 + $0x208] sm:$0xff] }
 0xe56   : > { %v3954_v22 = vpop.f32.mrf.mxu1 }
 0xe57   : > { %6197 = vmatprep.subr.mxu0 %v3954_v22 }
 0xe58   : > { %v6196_v25 = vpop.f32.mrf.mxu1  ;;  %6198 = vmatpush3.msra.mxu0 %v3954_v22  ;;  %v6369_v22 = vld [vmem:[#allocation4 + $0x3f8] sm:$0xff] }
 0xe59   : > { %6200 = vmatmul.mubr.msk.f32.vlgmr.msra.gmra.mxu0 %vm2726_vm4, %v5824_v3  ;;  %4098 = vmatprep.subr.mxu0 %v4075_v6  ;;  %v6370_v3 = vld [vmem:[#allocation4 + $0x3f0] sm:$0xff]  ;;  %v6371_v6 = vld [vmem:[#allocation4 + $0x3e8] sm:$0xff]  ;;  %v6373_v25 = vld [vmem:[#allocation4 + $0x3d8] sm:$0xff] }
 0xe5a   : > { %4099 = vmatpush1.msra.mxu0 %v4074_v23  ;;  %4146 = vmatprep.mubr.f32.mxu0 %v7010_v4  ;;  %v6372_v23 = vld [vmem:[#allocation4 + $0x3e0] sm:$0xff] }
 0xe5b   : > { %4100 = vmatprep.subr.mxu0 %v4073_v27  ;;  %v6374_v27 = vld [vmem:[#allocation4 + $0x3d0] sm:$0xff] }
 0xe5c   : > { %4101 = vmatpush1.msra.mxu0 %v4072_v28  ;;  %v6375_v28 = vld [vmem:[#allocation4 + $0x3c8] sm:$0xff] }
 0xe5d   : > { %4102 = vmatprep.subr.mxu0 %v4071_v60  ;;  %v6376_v60 = vld [vmem:[#allocation4 + $0x3c0] sm:$0xff] }
 0xe5e   : > { %4103 = vmatpush1.msra.mxu0 %v4070_v1  ;;  %v6377_v1 = vld [vmem:[#allocation4 + $0x3b8] sm:$0xff] }
 0xe5f   : > { %4104 = vmatprep.subr.mxu0 %v4069_v29  ;;  %v6378_v29 = vld [vmem:[#allocation4 + $0x3b0] sm:$0xff] }
 0xe60   : > { %4105 = vmatpush1.msra.mxu0 %v4068_v30  ;;  %v6379_v30 = vld [vmem:[#allocation4 + $0x3a8] sm:$0xff] }
 0xe61   : > { %4106 = vmatprep.subr.mxu0 %v4067_v31  ;;  %v6380_v31 = vld [vmem:[#allocation4 + $0x3a0] sm:$0xff] }
 0xe62   : > { %4107 = vmatpush1.msra.mxu0 %v4066_v32  ;;  %v6381_v32 = vld [vmem:[#allocation4 + $0x398] sm:$0xff] }
 0xe63   : > { %4108 = vmatprep.subr.mxu0 %v4065_v33  ;;  %v6382_v33 = vld [vmem:[#allocation4 + $0x390] sm:$0xff] }
 0xe64   : > { %4109 = vmatpush1.msra.mxu0 %v4064_v34  ;;  %v6383_v34 = vld [vmem:[#allocation4 + $0x388] sm:$0xff] }
 0xe65   : > { %4110 = vmatprep.subr.mxu0 %v4063_v35  ;;  %v6384_v35 = vld [vmem:[#allocation4 + $0x380] sm:$0xff] }
 0xe66   : > { %4111 = vmatpush1.msra.mxu0 %v4062_v37  ;;  %v6385_v37 = vld [vmem:[#allocation4 + $0x378] sm:$0xff] }
 0xe67   : > { %4112 = vmatprep.subr.mxu0 %v4061_v39  ;;  %v6386_v39 = vld [vmem:[#allocation4 + $0x370] sm:$0xff] }
 0xe68   : > { %4113 = vmatpush1.msra.mxu0 %v4060_v40  ;;  %v6387_v40 = vld [vmem:[#allocation4 + $0x368] sm:$0xff] }
 0xe69   : > { %4243 = vmatprep.subr.mxu0 %v6337_v41  ;;  %v6388_v41 = vld [vmem:[#allocation4 + $0x360] sm:$0xff] }
 0xf19   : > { %v6201_v42 = vpop.f32.mrf.mxu0 }
 0xf1a   : > { %v4043_v43 = vadd.f32 %v6201_v42, %v3878_v21  ;;  %v6366_v21 = vld [vmem:[#allocation4 + $0x210] sm:$0xff]  ;;  %v6389_v42 = vld [vmem:[#allocation4 + $0x358] sm:$0xff] }
 0xf1b   : > { %v4033_v56 = vpop.f32.mrf.mxu0 }
 0xf1c   : > { %v4042_v24 = vadd.f32 %v4033_v56, %v3877_v63  ;;  %v4057_v49 = vadd.f32 %v4054_v46, %v4043_v43  ;;  %v6368_v63 = vld [vmem:[#allocation4 + $0x200] sm:$0xff]  ;;  %v6390_v56 = vld [vmem:[#allocation4 + $0x350] sm:$0xff]  ;;  %v6391_v43 = vld [vmem:[#allocation4 + $0x348] sm:$0xff] }
 0xf1d   : > { %v6394_v46 = vld [vmem:[#allocation4 + $0x330] sm:$0xff] }
 0xf1e   : > { %v4056_v48 = vadd.f32 %v4049_v44, %v4042_v24  ;;  %v4059_v52 = vmax.f32 %v4057_v49, 0.0  ;;  %v6392_v24 = vld [vmem:[#allocation4 + $0x340] sm:$0xff]  ;;  %v6393_v44 = vld [vmem:[#allocation4 + $0x338] sm:$0xff] }
 0xf1f   : > { %v6396_v49 = vld [vmem:[#allocation4 + $0x320] sm:$0xff] }
 0xf20   : > { %v4058_v50 = vmax.f32 %v4056_v48, 0.0  ;;  %v6395_v48 = vld [vmem:[#allocation4 + $0x328] sm:$0xff] }
 0xf22   : > { %5827 = vmatmul.mubr.msk.f32.vlgmr.msra.gmra.mxu0 %vm2568_vm3, %v4058_v50  ;;  %v6397_v50 = vld [vmem:[#allocation4 + $0x318] sm:$0xff] }
 0xf23   : > { %4152 = vmatprep.mubr.f32.mxu0 %v7010_v4  ;;  %4244 = vmatpush1.msra.mxu0 %v6338_v51  ;;  %v6398_v51 = vld [vmem:[#allocation4 + $0x310] sm:$0xff] }
 0xf24   : > { %4245 = vmatprep.subr.mxu0 %v6339_v53  ;;  %v6400_v53 = vld [vmem:[#allocation4 + $0x300] sm:$0xff] }
 0xf25   : > { %4246 = vmatpush1.msra.mxu0 %v6340_v36  ;;  %v6401_v36 = vld [vmem:[#allocation4 + $0x4f8] sm:$0xff] }
 0xf26   : > { %5828 = vmatmul.mubr.msk.f32.gmra.mxu0 %vm2568_vm3, %v4059_v52  ;;  %4247 = vmatprep.subr.mxu0 %v6341_v38  ;;  %v6399_v52 = vld [vmem:[#allocation4 + $0x308] sm:$0xff] }
 0xf27   : > { %4248 = vmatpush1.msra.mxu0 %v6342_v54 }
 0xf28   : > { %4249 = vmatprep.subr.mxu0 %v6343_v57 }
 0xf29   : > { %4250 = vmatpush1.msra.mxu0 %v6344_v59  ;;  %v6402_v59 = vld [vmem:[#allocation4 + $0x4f0] sm:$0xff] }
 0xf2a   : > { %4251 = vmatprep.subr.mxu0 %v6345_v61  ;;  %v6403_v61 = vld [vmem:[#allocation4 + $0x4e8] sm:$0xff] }
 0xf2b   : > { %4252 = vmatpush1.msra.mxu0 %v6346_v45 }
 0xf2c   : > { %4253 = vmatprep.subr.mxu0 %v6347_v47  ;;  %v6404_v47 = vld [vmem:[#allocation4 + $0x4e0] sm:$0xff] }
 0xf2d   : > { %4254 = vmatpush1.msra.mxu0 %v6348_v2  ;;  %v6405_v2 = vld [vmem:[#allocation4 + $0x4d8] sm:$0xff] }
 0xf2e   : > { %4255 = vmatprep.subr.mxu0 %v6349_v5  ;;  %v6406_v5 = vld [vmem:[#allocation4 + $0x4d0] sm:$0xff] }
 0xf2f   : > { %4256 = vmatpush1.msra.mxu0 %v6350_v7  ;;  %v6407_v7 = vld [vmem:[#allocation4 + $0x4c8] sm:$0xff] }
 0xf30   : > { %4257 = vmatprep.subr.mxu0 %v6351_v8  ;;  %v6408_v8 = vld [vmem:[#allocation4 + $0x4c0] sm:$0xff] }
 0xf31   : > { %4258 = vmatpush1.msra.mxu0 %v6352_v9  ;;  %v6409_v9 = vld [vmem:[#allocation4 + $0x4b8] sm:$0xff] }
 0xf32   : > { %4259 = vmatprep.subr.mxu0 %v6353_v10  ;;  %v6410_v10 = vld [vmem:[#allocation4 + $0x4b0] sm:$0xff] }
 0xf33   : > { %4260 = vmatpush1.msra.mxu0 %v6354_v11  ;;  %v6411_v11 = vld [vmem:[#allocation4 + $0x4a8] sm:$0xff] }
 0xf34   : > { %4261 = vmatprep.subr.mxu0 %v6355_v55  ;;  %v6412_v55 = vld [vmem:[#allocation4 + $0x4a0] sm:$0xff] }
 0xf35   : > { %4262 = vmatpush1.msra.mxu0 %v6356_v58  ;;  %v6413_v58 = vld [vmem:[#allocation4 + $0x498] sm:$0xff] }
 0xf36   : > { %4263 = vmatprep.subr.mxu0 %v6357_v13  ;;  %v6414_v13 = vld [vmem:[#allocation4 + $0x490] sm:$0xff] }
 0xf37   : > { %4264 = vmatpush1.msra.mxu0 %v6358_v14  ;;  %v6415_v14 = vld [vmem:[#allocation4 + $0x488] sm:$0xff] }
 0xf38   : > { %4265 = vmatprep.subr.mxu0 %v6359_v15  ;;  %v6416_v15 = vld [vmem:[#allocation4 + $0x480] sm:$0xff] }
 0xf39   : > { %4266 = vmatpush1.msra.mxu0 %v6360_v16  ;;  %v6417_v16 = vld [vmem:[#allocation4 + $0x478] sm:$0xff] }
 0xf3a   : > { %4267 = vmatprep.subr.mxu0 %v6361_v17  ;;  %v6418_v17 = vld [vmem:[#allocation4 + $0x470] sm:$0xff] }
 0xf3b   : > { %4268 = vmatpush1.msra.mxu0 %v6362_v26  ;;  %v6419_v26 = vld [vmem:[#allocation4 + $0x468] sm:$0xff] }
 0xf3c   : > { %4269 = vmatprep.subr.mxu0 %v6363_v18  ;;  %v6420_v18 = vld [vmem:[#allocation4 + $0x460] sm:$0xff] }
 0xf3d   : > { %4270 = vmatpush1.msra.mxu0 %v6364_v19  ;;  %v6421_v19 = vld [vmem:[#allocation4 + $0x458] sm:$0xff] }
 0xf3e   : > { %4271 = vmatprep.subr.mxu0 %v6365_v20  ;;  %v6422_v20 = vld [vmem:[#allocation4 + $0x450] sm:$0xff] }
 0xf3f   : > { %4272 = vmatpush1.msra.mxu0 %v6366_v21  ;;  %v6423_v21 = vld [vmem:[#allocation4 + $0x448] sm:$0xff] }
 0xf40   : > { %4273 = vmatprep.subr.mxu0 %v6367_v12  ;;  %v6424_v12 = vld [vmem:[#allocation4 + $0x440] sm:$0xff] }
 0xf41   : > { %4274 = vmatpush1.msra.mxu0 %v6368_v63  ;;  %v6425_v63 = vld [vmem:[#allocation4 + $0x438] sm:$0xff] }
 0xf42   : > { %4275 = vmatprep.subr.mxu0 %v6369_v22  ;;  %v6426_v22 = vld [vmem:[#allocation4 + $0x430] sm:$0xff] }
 0xf43   : > { %4276 = vmatpush2.msra.mxu0 %v6370_v3  ;;  %v6427_v3 = vld [vmem:[#allocation4 + $0x428] sm:$0xff] }
 0xf44   : > { %4277 = vmatprep.subr.mxu0 %v6371_v6  ;;  %v6428_v6 = vld [vmem:[#allocation4 + $0x420] sm:$0xff] }
 0xf45   : > { %4278 = vmatpush2.msra.mxu0 %v6372_v23  ;;  %v6429_v23 = vld [vmem:[#allocation4 + $0x418] sm:$0xff] }
 0xf46   : > { %4279 = vmatprep.subr.mxu0 %v6373_v25  ;;  %v6430_v25 = vld [vmem:[#allocation4 + $0x410] sm:$0xff] }
 0xf47   : > { %4280 = vmatpush2.msra.mxu0 %v6374_v27  ;;  %v6431_v27 = vld [vmem:[#allocation4 + $0x408] sm:$0xff] }
 0xf48   : > { %4281 = vmatprep.subr.mxu0 %v6375_v28  ;;  %v6432_v28 = vld [vmem:[#allocation4 + $0x400] sm:$0xff] }
 0xf49   : > { %4282 = vmatpush2.msra.mxu0 %v6376_v60  ;;  %v6433_v60 = vld [vmem:[#allocation4 + $0x5f8] sm:$0xff] }
 0xf4a   : > { %4283 = vmatprep.subr.mxu0 %v6377_v1  ;;  %v6434_v1 = vld [vmem:[#allocation4 + $0x5f0] sm:$0xff] }
 0xf4b   : > { %4284 = vmatpush2.msra.mxu0 %v6378_v29  ;;  %v6435_v29 = vld [vmem:[#allocation4 + $0x5e8] sm:$0xff] }
 0xf4c   : > { %4285 = vmatprep.subr.mxu0 %v6379_v30  ;;  %v6436_v30 = vld [vmem:[#allocation4 + $0x5e0] sm:$0xff] }
 0xf4d   : > { %4286 = vmatpush2.msra.mxu0 %v6380_v31  ;;  %v6437_v31 = vld [vmem:[#allocation4 + $0x5d8] sm:$0xff] }
 0xf4e   : > { %4287 = vmatprep.subr.mxu0 %v6381_v32  ;;  %v6438_v32 = vld [vmem:[#allocation4 + $0x5d0] sm:$0xff] }
 0xf4f   : > { %4288 = vmatpush2.msra.mxu0 %v6382_v33  ;;  %v6439_v33 = vld [vmem:[#allocation4 + $0x5c8] sm:$0xff] }
 0xf50   : > { %4289 = vmatprep.subr.mxu0 %v6383_v34  ;;  %v6440_v34 = vld [vmem:[#allocation4 + $0x5c0] sm:$0xff] }
 0xf51   : > { %4290 = vmatpush2.msra.mxu0 %v6384_v35  ;;  %v6441_v35 = vld [vmem:[#allocation4 + $0x5b8] sm:$0xff] }
 0xf52   : > { %4291 = vmatprep.subr.mxu0 %v6385_v37  ;;  %v6442_v37 = vld [vmem:[#allocation4 + $0x5b0] sm:$0xff] }
 0xf53   : > { %4292 = vmatpush2.msra.mxu0 %v6386_v39  ;;  %v6443_v39 = vld [vmem:[#allocation4 + $0x5a8] sm:$0xff] }
 0xf54   : > { %4293 = vmatprep.subr.mxu0 %v6387_v40  ;;  %v6444_v40 = vld [vmem:[#allocation4 + $0x5a0] sm:$0xff] }
 0xf55   : > { %4294 = vmatpush2.msra.mxu0 %v6388_v41  ;;  %v6445_v41 = vld [vmem:[#allocation4 + $0x598] sm:$0xff] }
 0xf56   : > { %4295 = vmatprep.subr.mxu0 %v6389_v42  ;;  %v6446_v42 = vld [vmem:[#allocation4 + $0x590] sm:$0xff] }
 0xf57   : > { %4296 = vmatpush2.msra.mxu0 %v6390_v56  ;;  %v6447_v56 = vld [vmem:[#allocation4 + $0x588] sm:$0xff] }
 0xf58   : > { %4297 = vmatprep.subr.mxu0 %v6391_v43  ;;  %v6448_v43 = vld [vmem:[#allocation4 + $0x580] sm:$0xff] }
 0xf59   : > { %4298 = vmatpush2.msra.mxu0 %v6392_v24  ;;  %v6449_v24 = vld [vmem:[#allocation4 + $0x578] sm:$0xff] }
 0xf5a   : > { %4299 = vmatprep.subr.mxu0 %v6393_v44  ;;  %v6450_v44 = vld [vmem:[#allocation4 + $0x570] sm:$0xff] }
 0xf5b   : > { %4300 = vmatpush2.msra.mxu0 %v6394_v46  ;;  %v6451_v46 = vld [vmem:[#allocation4 + $0x568] sm:$0xff] }
 0xf5c   : > { %4301 = vmatprep.subr.mxu0 %v6395_v48  ;;  %v6452_v48 = vld [vmem:[#allocation4 + $0x560] sm:$0xff] }
 0xf5d   : > { %4302 = vmatpush2.msra.mxu0 %v6396_v49  ;;  %v6453_v49 = vld [vmem:[#allocation4 + $0x558] sm:$0xff] }
 0xf5e   : > { %4303 = vmatprep.subr.mxu0 %v6397_v50  ;;  %v6454_v50 = vld [vmem:[#allocation4 + $0x550] sm:$0xff] }
 0xf5f   : > { %4304 = vmatpush2.msra.mxu0 %v6398_v51  ;;  %v6455_v51 = vld [vmem:[#allocation4 + $0x548] sm:$0xff] }
 0xf60   : > { %4305 = vmatprep.subr.mxu0 %v6399_v52  ;;  %v6456_v52 = vld [vmem:[#allocation4 + $0x540] sm:$0xff] }
 0xf61   : > { %4306 = vmatpush2.msra.mxu0 %v6400_v53  ;;  %v6457_v53 = vld [vmem:[#allocation4 + $0x538] sm:$0xff] }
 0xf62   : > { %4477 = vmatprep.subr.mxu0 %v6401_v36  ;;  %v6458_v36 = vld [vmem:[#allocation4 + $0x530] sm:$0xff] }
 0xfe2   : > { %v7528_v38 = vpop.f32.mrf.mxu0 }
 0xfe4   : > { %v7530_v54 = vpop.f32.mrf.mxu0 }
 0xfe5   : > { %4223 = vmatprep.mubr.f32.mxu1 %v7530_v54  ;;  %4307 = vmatprep.mubr.f32.mxu0 %v7530_v54 }
 0xfe6   : > { %v7534_v57 = vpop.f32.mrf.mxu0  ;;  %4224 = vmatmul.mubr.f32.vlgmr.msra.gmra.mxu1 %v7528_v38  ;;  %4308 = vmatmul.mubr.f32.vlgmr.msra.gmra.mxu0 %v7528_v38 }
 0xfe7   : > { %4478 = vmatpush1.msra.mxu0 %v6402_v59  ;;  %v6459_v59 = vld [vmem:[#allocation4 + $0x528] sm:$0xff] }
 0xfe8   : > { %4479 = vmatprep.subr.mxu0 %v6403_v61  ;;  %v7538_v45 = vpop.f32.mrf.mxu0  ;;  %v6460_v61 = vld [vmem:[#allocation4 + $0x520] sm:$0xff] }
 0xfe9   : > { %4480 = vmatpush1.msra.mxu0 %v6404_v47  ;;  %4229 = vmatprep.mubr.f32.mxu1 %v7538_v45  ;;  %v6461_v47 = vld [vmem:[#allocation4 + $0x518] sm:$0xff] }
 0xfea   : > { %4313 = vmatprep.mubr.f32.mxu0 %v7538_v45  ;;  %4481 = vmatprep.subr.mxu0 %v6405_v2  ;;  %v6462_v2 = vld [vmem:[#allocation4 + $0x510] sm:$0xff] }
 0xfeb   : > { %4230 = vmatmul.mubr.f32.gmra.mxu1 %v7534_v57  ;;  %4314 = vmatmul.mubr.f32.gmra.mxu0 %v7534_v57 }
 0xfec   : > { %4482 = vmatpush1.msra.mxu0 %v6406_v5  ;;  %4235 = vmatprep.mubr.f32.mxu1 %v7325_v62  ;;  %v6463_v5 = vld [vmem:[#allocation4 + $0x508] sm:$0xff] }
 0xfed   : > { %4319 = vmatprep.mubr.f32.mxu0 %v7325_v62  ;;  %4483 = vmatprep.subr.mxu0 %v6407_v7  ;;  %v6464_v7 = vld [vmem:[#allocation4 + $0x500] sm:$0xff] }
 0xfee   : > { %4484 = vmatpush1.msra.mxu0 %v6408_v8  ;;  %v6465_v8 = vld [vmem:[#allocation4 + $0x8f8] sm:$0xff] }
 0xfef   : > { %4485 = vmatprep.subr.mxu0 %v6409_v9  ;;  %4236 = vmatmul.mubr.f32.gmra.mxu1 %v7327_v0  ;;  %v6466_v9 = vld [vmem:[#allocation4 + $0x8f0] sm:$0xff] }
 0xff0   : > { %4320 = vmatmul.mubr.f32.gmra.mxu0 %v7327_v0  ;;  %4396 = vmatprep.mubr.f32.mxu1 %v7010_v4 }
 0xff1   : > { %4486 = vmatpush1.msra.mxu0 %v6410_v10  ;;  %4541 = vmatprep.mubr.f32.mxu0 %v7530_v54  ;;  %v6467_v10 = vld [vmem:[#allocation4 + $0x8e8] sm:$0xff] }
 0xff2   : > { %4487 = vmatprep.subr.mxu0 %v6411_v11  ;;  %v6468_v11 = vld [vmem:[#allocation4 + $0x8e0] sm:$0xff] }
 0xff3   : > { %4488 = vmatpush1.msra.mxu0 %v6412_v55  ;;  %v6469_v55 = vld [vmem:[#allocation4 + $0x8d8] sm:$0xff] }
 0xff4   : > { %4489 = vmatprep.subr.mxu0 %v6413_v58  ;;  %v6470_v58 = vld [vmem:[#allocation4 + $0x8d0] sm:$0xff] }
 0xff5   : > { %4490 = vmatpush1.msra.mxu0 %v6414_v13  ;;  %v6471_v13 = vld [vmem:[#allocation4 + $0x8c8] sm:$0xff] }
 0xff6   : > { %4491 = vmatprep.subr.mxu0 %v6415_v14  ;;  %v6472_v14 = vld [vmem:[#allocation4 + $0x8c0] sm:$0xff] }
 0xff7   : > { %4492 = vmatpush1.msra.mxu0 %v6416_v15  ;;  %v6473_v15 = vld [vmem:[#allocation4 + $0x8b8] sm:$0xff] }
 0xff8   : > { %4493 = vmatprep.subr.mxu0 %v6417_v16  ;;  %v6474_v16 = vld [vmem:[#allocation4 + $0x8b0] sm:$0xff] }
 0xff9   : > { %4494 = vmatpush1.msra.mxu0 %v6418_v17  ;;  %v6475_v17 = vld [vmem:[#allocation4 + $0x8a8] sm:$0xff] }
 0xffa   : > { %4495 = vmatprep.subr.mxu0 %v6419_v26  ;;  %v6476_v26 = vld [vmem:[#allocation4 + $0x8a0] sm:$0xff] }
 0xffb   : > { %4496 = vmatpush1.msra.mxu0 %v6420_v18  ;;  %v6477_v18 = vld [vmem:[#allocation4 + $0x898] sm:$0xff] }
 0xffc   : > { %4497 = vmatprep.subr.mxu0 %v6421_v19  ;;  %v6478_v19 = vld [vmem:[#allocation4 + $0x890] sm:$0xff] }
 0xffd   : > { %4498 = vmatpush1.msra.mxu0 %v6422_v20  ;;  %v6479_v20 = vld [vmem:[#allocation4 + $0x888] sm:$0xff] }
 0xffe   : > { %4499 = vmatprep.subr.mxu0 %v6423_v21  ;;  %v6480_v21 = vld [vmem:[#allocation4 + $0x880] sm:$0xff] }
 0xfff   : > { %4500 = vmatpush1.msra.mxu0 %v6424_v12  ;;  %v6481_v12 = vld [vmem:[#allocation4 + $0x878] sm:$0xff] }
0x1000   : > { %4501 = vmatprep.subr.mxu0 %v6425_v63  ;;  %v6482_v63 = vld [vmem:[#allocation4 + $0x870] sm:$0xff] }
0x1001   : > { %4502 = vmatpush1.msra.mxu0 %v6426_v22  ;;  %v6483_v22 = vld [vmem:[#allocation4 + $0x868] sm:$0xff] }
0x1002   : > { %4503 = vmatprep.subr.mxu0 %v6427_v3  ;;  %v6484_v3 = vld [vmem:[#allocation4 + $0x860] sm:$0xff] }
0x1003   : > { %4504 = vmatpush1.msra.mxu0 %v6428_v6  ;;  %v6485_v6 = vld [vmem:[#allocation4 + $0x858] sm:$0xff] }
0x1004   : > { %4505 = vmatprep.subr.mxu0 %v6429_v23  ;;  %v6486_v23 = vld [vmem:[#allocation4 + $0x850] sm:$0xff] }
0x1005   : > { %4506 = vmatpush1.msra.mxu0 %v6430_v25  ;;  %v6487_v25 = vld [vmem:[#allocation4 + $0x848] sm:$0xff] }
0x1006   : > { %4507 = vmatprep.subr.mxu0 %v6431_v27  ;;  %v6488_v27 = vld [vmem:[#allocation4 + $0x840] sm:$0xff] }
0x1007   : > { %4508 = vmatpush1.msra.mxu0 %v6432_v28  ;;  %v6489_v28 = vld [vmem:[#allocation4 + $0x838] sm:$0xff] }
0x1008   : > { %4509 = vmatprep.subr.mxu0 %v6433_v60  ;;  %v6490_v60 = vld [vmem:[#allocation4 + $0x830] sm:$0xff] }
0x1009   : > { %4510 = vmatpush2.msra.mxu0 %v6434_v1  ;;  %v6491_v1 = vld [vmem:[#allocation4 + $0x828] sm:$0xff] }
0x100a   : > { %4511 = vmatprep.subr.mxu0 %v6435_v29  ;;  %v6492_v29 = vld [vmem:[#allocation4 + $0x820] sm:$0xff] }
0x100b   : > { %4512 = vmatpush2.msra.mxu0 %v6436_v30  ;;  %v6493_v30 = vld [vmem:[#allocation4 + $0x818] sm:$0xff] }
0x100c   : > { %4513 = vmatprep.subr.mxu0 %v6437_v31  ;;  %v6494_v31 = vld [vmem:[#allocation4 + $0x810] sm:$0xff] }
0x100d   : > { %4514 = vmatpush2.msra.mxu0 %v6438_v32  ;;  %v6495_v32 = vld [vmem:[#allocation4 + $0x808] sm:$0xff] }
0x100e   : > { %4515 = vmatprep.subr.mxu0 %v6439_v33  ;;  %v6496_v33 = vld [vmem:[#allocation4 + $0x800] sm:$0xff] }
0x100f   : > { %4516 = vmatpush2.msra.mxu0 %v6440_v34  ;;  %v6497_v34 = vld [vmem:[#allocation4 + $0x9f8] sm:$0xff] }
0x1010   : > { %4517 = vmatprep.subr.mxu0 %v6441_v35  ;;  %v6498_v35 = vld [vmem:[#allocation4 + $0x9f0] sm:$0xff] }
0x1011   : > { %4518 = vmatpush2.msra.mxu0 %v6442_v37  ;;  %v6499_v37 = vld [vmem:[#allocation4 + $0x9e8] sm:$0xff] }
0x1012   : > { %4519 = vmatprep.subr.mxu0 %v6443_v39  ;;  %v6500_v39 = vld [vmem:[#allocation4 + $0x9e0] sm:$0xff] }
0x1013   : > { %4520 = vmatpush2.msra.mxu0 %v6444_v40  ;;  %v6501_v40 = vld [vmem:[#allocation4 + $0x9d8] sm:$0xff] }
0x1014   : > { %4521 = vmatprep.subr.mxu0 %v6445_v41  ;;  %v6502_v41 = vld [vmem:[#allocation4 + $0x9d0] sm:$0xff] }
0x1015   : > { %4522 = vmatpush2.msra.mxu0 %v6446_v42  ;;  %v6503_v42 = vld [vmem:[#allocation4 + $0x9c8] sm:$0xff] }
0x1016   : > { %4523 = vmatprep.subr.mxu0 %v6447_v56  ;;  %v6504_v56 = vld [vmem:[#allocation4 + $0x9c0] sm:$0xff] }
0x1017   : > { %4524 = vmatpush2.msra.mxu0 %v6448_v43  ;;  %v6505_v43 = vld [vmem:[#allocation4 + $0x9b8] sm:$0xff] }
0x1018   : > { %4525 = vmatprep.subr.mxu0 %v6449_v24  ;;  %v6506_v24 = vld [vmem:[#allocation4 + $0x9b0] sm:$0xff] }
0x1019   : > { %4526 = vmatpush2.msra.mxu0 %v6450_v44  ;;  %v6507_v44 = vld [vmem:[#allocation4 + $0x9a8] sm:$0xff] }
0x101a   : > { %4527 = vmatprep.subr.mxu0 %v6451_v46  ;;  %v6508_v46 = vld [vmem:[#allocation4 + $0x9a0] sm:$0xff] }
0x101b   : > { %4528 = vmatpush2.msra.mxu0 %v6452_v48  ;;  %v6509_v48 = vld [vmem:[#allocation4 + $0x998] sm:$0xff] }
0x101c   : > { %4529 = vmatprep.subr.mxu0 %v6453_v49  ;;  %v6510_v49 = vld [vmem:[#allocation4 + $0x990] sm:$0xff] }
0x101d   : > { %4530 = vmatpush2.msra.mxu0 %v6454_v50  ;;  %v6511_v50 = vld [vmem:[#allocation4 + $0x988] sm:$0xff] }
0x101e   : > { %4531 = vmatprep.subr.mxu0 %v6455_v51  ;;  %v6512_v51 = vld [vmem:[#allocation4 + $0x980] sm:$0xff] }
0x101f   : > { %4532 = vmatpush2.msra.mxu0 %v6456_v52  ;;  %v6513_v52 = vld [vmem:[#allocation4 + $0x978] sm:$0xff] }
0x1020   : > { %4533 = vmatprep.subr.mxu0 %v6457_v53  ;;  %v6514_v53 = vld [vmem:[#allocation4 + $0x970] sm:$0xff] }
0x1021   : > { %4534 = vmatpush2.msra.mxu0 %v6458_v36  ;;  %v6515_v36 = vld [vmem:[#allocation4 + $0x968] sm:$0xff] }
0x1022   : > { %4535 = vmatprep.subr.mxu0 %v6459_v59  ;;  %v6516_v59 = vld [vmem:[#allocation4 + $0x960] sm:$0xff] }
0x1023   : > { %4536 = vmatpush2.msra.mxu0 %v6460_v61  ;;  %v6517_v61 = vld [vmem:[#allocation4 + $0x958] sm:$0xff] }
0x1024   : > { %4537 = vmatprep.subr.mxu0 %v6461_v47  ;;  %v6518_v47 = vld [vmem:[#allocation4 + $0x950] sm:$0xff] }
0x1025   : > { %4538 = vmatpush2.msra.mxu0 %v6462_v2  ;;  %v6519_v2 = vld [vmem:[#allocation4 + $0x948] sm:$0xff] }
0x1026   : > { %4539 = vmatprep.subr.mxu0 %v6463_v5  ;;  %v6520_v5 = vld [vmem:[#allocation4 + $0x940] sm:$0xff] }
0x1027   : > { %4540 = vmatpush2.msra.mxu0 %v6464_v7  ;;  %v6521_v7 = vld [vmem:[#allocation4 + $0x938] sm:$0xff] }
0x1028   : > { %4542 = vmatmul.mubr.f32.vlgmr.msra.gmra.mxu0 %v7528_v38  ;;  %4799 = vmatprep.subr.mxu0 %v6465_v8  ;;  %v6522_v8 = vld [vmem:[#allocation4 + $0x930] sm:$0xff] }
0x1029   : > { %4547 = vmatprep.mubr.f32.mxu0 %v7538_v45  ;;  %4800 = vmatpush1.msra.mxu0 %v6466_v9  ;;  %v6523_v9 = vld [vmem:[#allocation4 + $0x928] sm:$0xff] }
0x102a   : > { %4801 = vmatprep.subr.mxu0 %v6467_v10  ;;  %v6524_v10 = vld [vmem:[#allocation4 + $0x920] sm:$0xff] }
0x102b   : > { %4802 = vmatpush1.msra.mxu0 %v6468_v11  ;;  %v6525_v11 = vld [vmem:[#allocation4 + $0x918] sm:$0xff] }
0x102c   : > { %4548 = vmatmul.mubr.f32.gmra.mxu0 %v7534_v57  ;;  %4803 = vmatprep.subr.mxu0 %v6469_v55  ;;  %v6526_v55 = vld [vmem:[#allocation4 + $0x910] sm:$0xff] }
0x102d   : > { %4553 = vmatprep.mubr.f32.mxu0 %v7325_v62  ;;  %4804 = vmatpush1.msra.mxu0 %v6470_v58  ;;  %v6527_v58 = vld [vmem:[#allocation4 + $0x908] sm:$0xff] }
0x102e   : > { %4805 = vmatprep.subr.mxu0 %v6471_v13  ;;  %v6528_v13 = vld [vmem:[#allocation4 + $0x900] sm:$0xff] }
0x102f   : > { %4806 = vmatpush1.msra.mxu0 %v6472_v14 }
0x1030   : > { %4554 = vmatmul.mubr.f32.gmra.mxu0 %v7327_v0  ;;  %4807 = vmatprep.subr.mxu0 %v6473_v15 }
0x1031   : > { %4808 = vmatpush1.msra.mxu0 %v6474_v16  ;;  %4863 = vmatprep.mubr.f32.mxu0 %v7530_v54 }
0x1032   : > { %4809 = vmatprep.subr.mxu0 %v6475_v17 }
0x1033   : > { %4810 = vmatpush1.msra.mxu0 %v6476_v26 }
0x1034   : > { %4811 = vmatprep.subr.mxu0 %v6477_v18 }
0x1035   : > { %4812 = vmatpush1.msra.mxu0 %v6478_v19 }
0x1036   : > { %4813 = vmatprep.subr.mxu0 %v6479_v20 }
0x1037   : > { %4814 = vmatpush1.msra.mxu0 %v6480_v21 }
0x1038   : > { %4815 = vmatprep.subr.mxu0 %v6481_v12 }
0x1039   : > { %4816 = vmatpush1.msra.mxu0 %v6482_v63 }
0x103a   : > { %4817 = vmatprep.subr.mxu0 %v6483_v22  ;;  %v4327_v22 = vld [vmem:[#allocation2 + $0x2] sm:$0x3] }
0x103b   : > { %4818 = vmatpush1.msra.mxu0 %v6484_v3 }
0x103c   : > { %4819 = vmatprep.subr.mxu0 %v6485_v6  ;;  %v4242_v6 = vld [vmem:[#allocation2] sm:$0x3] }
0x103d   : > { %4820 = vmatpush1.msra.mxu0 %v6486_v23 }
0x103e   : > { %4821 = vmatprep.subr.mxu0 %v6487_v25 }
0x103f   : > { %4822 = vmatpush1.msra.mxu0 %v6488_v27 }
0x1040   : > { %4823 = vmatprep.subr.mxu0 %v6489_v28 }
0x1041   : > { %4824 = vmatpush1.msra.mxu0 %v6490_v60 }
0x1042   : > { %4825 = vmatprep.subr.mxu0 %v6491_v1 }
0x1043   : > { %4826 = vmatpush1.msra.mxu0 %v6492_v29  ;;  %v4561_v29 = vld [vmem:[#allocation2 + $0x4] sm:$0x3] }
0x1044   : > { %4827 = vmatprep.subr.mxu0 %v6493_v30  ;;  %v6529_v30 = vld [vmem:[#allocation4 + $0x6f8] sm:$0xff] }
0x1045   : > { %4828 = vmatpush1.msra.mxu0 %v6494_v31  ;;  %v6530_v31 = vld [vmem:[#allocation4 + $0x6f0] sm:$0xff] }
0x1046   : > { %4829 = vmatprep.subr.mxu0 %v6495_v32  ;;  %v6531_v32 = vld [vmem:[#allocation4 + $0x6e8] sm:$0xff] }
0x1047   : > { %4830 = vmatpush1.msra.mxu0 %v6496_v33  ;;  %v6532_v33 = vld [vmem:[#allocation4 + $0x6e0] sm:$0xff] }
0x1048   : > { %4831 = vmatprep.subr.mxu0 %v6497_v34  ;;  %v6533_v34 = vld [vmem:[#allocation4 + $0x6d8] sm:$0xff] }
0x1049   : > { %4832 = vmatpush2.msra.mxu0 %v6498_v35  ;;  %v6534_v35 = vld [vmem:[#allocation4 + $0x6d0] sm:$0xff] }
0x104a   : > { %4833 = vmatprep.subr.mxu0 %v6499_v37  ;;  %v6535_v37 = vld [vmem:[#allocation4 + $0x6c8] sm:$0xff] }
0x104b   : > { %4834 = vmatpush2.msra.mxu0 %v6500_v39  ;;  %v6536_v39 = vld [vmem:[#allocation4 + $0x6c0] sm:$0xff] }
0x104c   : > { %4835 = vmatprep.subr.mxu0 %v6501_v40  ;;  %v6537_v40 = vld [vmem:[#allocation4 + $0x6b8] sm:$0xff] }
0x104d   : > { %4836 = vmatpush2.msra.mxu0 %v6502_v41  ;;  %v6538_v41 = vld [vmem:[#allocation4 + $0x6b0] sm:$0xff] }
0x104e   : > { %4837 = vmatprep.subr.mxu0 %v6503_v42  ;;  %v6539_v42 = vld [vmem:[#allocation4 + $0x6a8] sm:$0xff] }
0x104f   : > { %4838 = vmatpush2.msra.mxu0 %v6504_v56  ;;  %v6540_v56 = vld [vmem:[#allocation4 + $0x6a0] sm:$0xff] }
0x1050   : > { %4839 = vmatprep.subr.mxu0 %v6505_v43  ;;  %v6541_v43 = vld [vmem:[#allocation4 + $0x698] sm:$0xff] }
0x1051   : > { %4840 = vmatpush2.msra.mxu0 %v6506_v24  ;;  %v6542_v24 = vld [vmem:[#allocation4 + $0x690] sm:$0xff] }
0x1052   : > { %4841 = vmatprep.subr.mxu0 %v6507_v44  ;;  %v6543_v44 = vld [vmem:[#allocation4 + $0x688] sm:$0xff] }
0x1053   : > { %4842 = vmatpush2.msra.mxu0 %v6508_v46  ;;  %v6544_v46 = vld [vmem:[#allocation4 + $0x680] sm:$0xff] }
0x1054   : > { %4843 = vmatprep.subr.mxu0 %v6509_v48  ;;  %v6545_v48 = vld [vmem:[#allocation4 + $0x678] sm:$0xff] }
0x1055   : > { %4844 = vmatpush2.msra.mxu0 %v6510_v49  ;;  %v6546_v49 = vld [vmem:[#allocation4 + $0x670] sm:$0xff] }
0x1056   : > { %4845 = vmatprep.subr.mxu0 %v6511_v50  ;;  %v6547_v50 = vld [vmem:[#allocation4 + $0x668] sm:$0xff] }
0x1057   : > { %4846 = vmatpush2.msra.mxu0 %v6512_v51  ;;  %v6548_v51 = vld [vmem:[#allocation4 + $0x660] sm:$0xff] }
0x1058   : > { %4847 = vmatprep.subr.mxu0 %v6513_v52  ;;  %v6549_v52 = vld [vmem:[#allocation4 + $0x658] sm:$0xff] }
0x1059   : > { %4848 = vmatpush2.msra.mxu0 %v6514_v53  ;;  %v6550_v53 = vld [vmem:[#allocation4 + $0x650] sm:$0xff] }
0x105a   : > { %4849 = vmatprep.subr.mxu0 %v6515_v36  ;;  %v6551_v36 = vld [vmem:[#allocation4 + $0x648] sm:$0xff] }
0x105b   : > { %4850 = vmatpush2.msra.mxu0 %v6516_v59  ;;  %v6552_v59 = vld [vmem:[#allocation4 + $0x640] sm:$0xff] }
0x105c   : > { %4851 = vmatprep.subr.mxu0 %v6517_v61  ;;  %v6553_v61 = vld [vmem:[#allocation4 + $0x638] sm:$0xff] }
0x105d   : > { %4852 = vmatpush2.msra.mxu0 %v6518_v47  ;;  %v6554_v47 = vld [vmem:[#allocation4 + $0x630] sm:$0xff] }
0x105e   : > { %4853 = vmatprep.subr.mxu0 %v6519_v2  ;;  %v6555_v2 = vld [vmem:[#allocation4 + $0x628] sm:$0xff] }
0x105f   : > { %4854 = vmatpush2.msra.mxu0 %v6520_v5  ;;  %v6556_v5 = vld [vmem:[#allocation4 + $0x620] sm:$0xff] }
0x1060   : > { %4855 = vmatprep.subr.mxu0 %v6521_v7  ;;  %v6557_v7 = vld [vmem:[#allocation4 + $0x618] sm:$0xff] }
0x1061   : > { %4856 = vmatpush2.msra.mxu0 %v6522_v8  ;;  %v6558_v8 = vld [vmem:[#allocation4 + $0x610] sm:$0xff] }
0x1062   : > { %4857 = vmatprep.subr.mxu0 %v6523_v9  ;;  %v6559_v9 = vld [vmem:[#allocation4 + $0x608] sm:$0xff] }
0x1063   : > { %4858 = vmatpush2.msra.mxu0 %v6524_v10  ;;  %v6560_v10 = vld [vmem:[#allocation4 + $0x600] sm:$0xff] }
0x1064   : > { %4859 = vmatprep.subr.mxu0 %v6525_v11  ;;  %v6561_v11 = vld [vmem:[#allocation4 + $0x7f8] sm:$0xff] }
0x1065   : > { %4860 = vmatpush2.msra.mxu0 %v6526_v55  ;;  %v6562_v55 = vld [vmem:[#allocation4 + $0x7f0] sm:$0xff] }
0x1066   : > { %4861 = vmatprep.subr.mxu0 %v6527_v58  ;;  %v6563_v58 = vld [vmem:[#allocation4 + $0x7e8] sm:$0xff] }
0x1067   : > { %4862 = vmatpush2.msra.mxu0 %v6528_v13  ;;  %v6564_v13 = vld [vmem:[#allocation4 + $0x7e0] sm:$0xff] }
0x1068   : > { %4864 = vmatmul.mubr.f32.vlgmr.msra.gmra.mxu0 %v7528_v38 }
0x1069   : > { %4869 = vmatprep.mubr.f32.mxu0 %v7538_v45 }
0x106c   : > { %4870 = vmatmul.mubr.f32.gmra.mxu0 %v7534_v57 }
0x106d   : > { %4875 = vmatprep.mubr.f32.mxu0 %v7325_v62 }
0x1070   : > { %4876 = vmatmul.mubr.f32.gmra.mxu0 %v7327_v0 }
0x1071   : > { %5112 = vmatprep.mubr.f32.mxu0 %v7010_v4 }
0x10a6   : > { %v4225_v14 = vpop.f32.mrf.mxu1  ;;  %v4309_v15 = vpop.f32.mrf.mxu0 }
0x10a8   : > { %v4227_v16 = vpop.f32.mrf.mxu1  ;;  %v4311_v17 = vpop.f32.mrf.mxu0 }
0x10ab   : > { %v4315_v26 = vpop.f32.mrf.mxu0  ;;  %v4231_v18 = vpop.f32.mrf.mxu1 }
0x10ad   : > { %v4317_v19 = vpop.f32.mrf.mxu0  ;;  %v4233_v20 = vpop.f32.mrf.mxu1 }
0x10af   : > { %v4237_v63 = vpop.f32.mrf.mxu1 }
0x10b0   : > { %v4321_v21 = vpop.f32.mrf.mxu0 }
0x10b1   : > { %v4239_v3 = vpop.f32.mrf.mxu1 }
0x10b2   : > { %v4323_v12 = vpop.f32.mrf.mxu0 }
0x10b3   : > { %4358 = vmatprep.subr.mxu1 %v4323_v12  ;;  %v6574_v12 = vld [vmem:[#allocation4 + $0x790] sm:$0xff] }
0x10b4   : > { %4359 = vmatpush1.msra.mxu1 %v4321_v21  ;;  %v6573_v21 = vld [vmem:[#allocation4 + $0x798] sm:$0xff] }
0x10b5   : > { %4360 = vmatprep.subr.mxu1 %v4317_v19  ;;  %v6571_v19 = vld [vmem:[#allocation4 + $0x7a8] sm:$0xff] }
0x10b6   : > { %4361 = vmatpush1.msra.mxu1 %v4315_v26  ;;  %v6569_v26 = vld [vmem:[#allocation4 + $0x7b8] sm:$0xff] }
0x10b7   : > { %4362 = vmatprep.subr.mxu1 %v4311_v17  ;;  %v6568_v17 = vld [vmem:[#allocation4 + $0x7c0] sm:$0xff] }
0x10b8   : > { %4363 = vmatpush1.msra.mxu1 %v4309_v15  ;;  %v6566_v15 = vld [vmem:[#allocation4 + $0x7d0] sm:$0xff] }
0x10b9   : > { %4432 = vmatprep.subr.mxu1 %v4239_v3  ;;  %5829 = vmatmul.mubr.msk.f32.vlgmr.msra.gmra.mxu1 %vm4328_vm5, %v4327_v22  ;;  %v6576_v22 = vld [vmem:[#allocation4 + $0x780] sm:$0xff]  ;;  %v6577_v3 = vld [vmem:[#allocation4 + $0x778] sm:$0xff] }
0x10ba   : > { %4433 = vmatpush1.msra.mxu1 %v4237_v63  ;;  %4470 = vmatprep.mubr.f32.mxu1 %v7010_v4  ;;  %v6575_v63 = vld [vmem:[#allocation4 + $0x788] sm:$0xff] }
0x10bb   : > { %4434 = vmatprep.subr.mxu1 %v4233_v20  ;;  %v6572_v20 = vld [vmem:[#allocation4 + $0x7a0] sm:$0xff] }
0x10bc   : > { %4435 = vmatpush1.msra.mxu1 %v4231_v18  ;;  %v6570_v18 = vld [vmem:[#allocation4 + $0x7b0] sm:$0xff] }
0x10bd   : > { %4436 = vmatprep.subr.mxu1 %v4227_v16  ;;  %v6567_v16 = vld [vmem:[#allocation4 + $0x7c8] sm:$0xff] }
0x10be   : > { %4437 = vmatpush1.msra.mxu1 %v4225_v14  ;;  %v6565_v14 = vld [vmem:[#allocation4 + $0x7d8] sm:$0xff] }
0x10bf   : > { %5830 = vmatmul.mubr.msk.f32.vlgmr.msra.gmra.mxu1 %vm4328_vm5, %v4242_v6  ;;  %v6578_v6 = vld [vmem:[#allocation4 + $0x770] sm:$0xff] }
0x10c0   : > { %4629 = vmatprep.mubr.f32.mxu1 %v7010_v4 }
0x10e8   : > { %v4543_v23 = vpop.f32.mrf.mxu0 }
0x10ea   : > { %v4545_v25 = vpop.f32.mrf.mxu0 }
0x10ec   : > { %v4549_v27 = vpop.f32.mrf.mxu0 }
0x10ee   : > { %v4551_v28 = vpop.f32.mrf.mxu0 }
0x10f0   : > { %v4555_v60 = vpop.f32.mrf.mxu0 }
0x10f2   : > { %v4557_v1 = vpop.f32.mrf.mxu0 }
0x10f3   : > { %4591 = vmatprep.subr.mxu1 %v4557_v1  ;;  %v6584_v1 = vld [vmem:[#allocation4 + $0x740] sm:$0xff] }
0x10f4   : > { %4592 = vmatpush1.msra.mxu1 %v4555_v60  ;;  %v6583_v60 = vld [vmem:[#allocation4 + $0x748] sm:$0xff] }
0x10f5   : > { %4593 = vmatprep.subr.mxu1 %v4551_v28  ;;  %v6582_v28 = vld [vmem:[#allocation4 + $0x750] sm:$0xff] }
0x10f6   : > { %4594 = vmatpush1.msra.mxu1 %v4549_v27  ;;  %v6581_v27 = vld [vmem:[#allocation4 + $0x758] sm:$0xff] }
0x10f7   : > { %4595 = vmatprep.subr.mxu1 %v4545_v25  ;;  %v6580_v25 = vld [vmem:[#allocation4 + $0x760] sm:$0xff] }
0x10f8   : > { %4596 = vmatpush1.msra.mxu1 %v4543_v23  ;;  %v6579_v23 = vld [vmem:[#allocation4 + $0x768] sm:$0xff] }
0x10f9   : > { %5831 = vmatmul.mubr.msk.f32.vlgmr.msra.gmra.mxu1 %vm4328_vm5, %v4561_v29  ;;  %4638 = vmatprep.subr.mxu1 %v6529_v30  ;;  %v6585_v29 = vld [vmem:[#allocation4 + $0x738] sm:$0xff]  ;;  %v6586_v30 = vld [vmem:[#allocation4 + $0x730] sm:$0xff] }
0x10fa   : > { %4639 = vmatpush1.msra.mxu1 %v6530_v31  ;;  %4702 = vmatprep.mubr.f32.mxu1 %v7530_v54  ;;  %v6587_v31 = vld [vmem:[#allocation4 + $0x728] sm:$0xff] }
0x10fb   : > { %4640 = vmatprep.subr.mxu1 %v6531_v32  ;;  %v6588_v32 = vld [vmem:[#allocation4 + $0x720] sm:$0xff] }
0x10fc   : > { %4641 = vmatpush1.msra.mxu1 %v6532_v33  ;;  %v6589_v33 = vld [vmem:[#allocation4 + $0x718] sm:$0xff] }
0x10fd   : > { %4642 = vmatprep.subr.mxu1 %v6533_v34  ;;  %v6590_v34 = vld [vmem:[#allocation4 + $0x710] sm:$0xff] }
0x10fe   : > { %4643 = vmatpush1.msra.mxu1 %v6534_v35  ;;  %v6591_v35 = vld [vmem:[#allocation4 + $0x708] sm:$0xff] }
0x10ff   : > { %4644 = vmatprep.subr.mxu1 %v6535_v37  ;;  %v6592_v37 = vld [vmem:[#allocation4 + $0x700] sm:$0xff] }
0x1100   : > { %4645 = vmatpush1.msra.mxu1 %v6536_v39 }
0x1101   : > { %4646 = vmatprep.subr.mxu1 %v6537_v40 }
0x1102   : > { %4647 = vmatpush1.msra.mxu1 %v6538_v41 }
0x1103   : > { %4648 = vmatprep.subr.mxu1 %v6539_v42 }
0x1104   : > { %4649 = vmatpush1.msra.mxu1 %v6540_v56 }
0x1105   : > { %4650 = vmatprep.subr.mxu1 %v6541_v43 }
0x1106   : > { %4651 = vmatpush1.msra.mxu1 %v6542_v24 }
0x1107   : > { %4652 = vmatprep.subr.mxu1 %v6543_v44 }
0x1108   : > { %4653 = vmatpush1.msra.mxu1 %v6544_v46 }
0x1109   : > { %4654 = vmatprep.subr.mxu1 %v6545_v48 }
0x110a   : > { %4655 = vmatpush1.msra.mxu1 %v6546_v49 }
0x110b   : > { %4656 = vmatprep.subr.mxu1 %v6547_v50 }
0x110c   : > { %4657 = vmatpush1.msra.mxu1 %v6548_v51 }
0x110d   : > { %4658 = vmatprep.subr.mxu1 %v6549_v52 }
0x110e   : > { %4659 = vmatpush1.msra.mxu1 %v6550_v53 }
0x110f   : > { %4660 = vmatprep.subr.mxu1 %v6551_v36 }
0x1110   : > { %4661 = vmatpush1.msra.mxu1 %v6552_v59 }
0x1111   : > { %4662 = vmatprep.subr.mxu1 %v6553_v61 }
0x1112   : > { %4663 = vmatpush1.msra.mxu1 %v6554_v47 }
0x1113   : > { %4664 = vmatprep.subr.mxu1 %v6555_v2 }
0x1114   : > { %4665 = vmatpush1.msra.mxu1 %v6556_v5 }
0x1115   : > { %4666 = vmatprep.subr.mxu1 %v6557_v7  ;;  %v4722_v7 = vld [vmem:[#allocation2 + $0x6] sm:$0x3] }
0x1116   : > { %4667 = vmatpush1.msra.mxu1 %v6558_v8 }
0x1117   : > { %4668 = vmatprep.subr.mxu1 %v6559_v9  ;;  %v4883_v9 = vld [vmem:[#allocation2 + $0x8] sm:$0x3] }
0x1118   : > { %4669 = vmatpush1.msra.mxu1 %v6560_v10  ;;  %v6593_v10 = vld [vmem:[#allocation4 + $0xaf8] sm:$0xff] }
0x1119   : > { %4670 = vmatprep.subr.mxu1 %v6561_v11  ;;  %v6594_v11 = vld [vmem:[#allocation4 + $0xaf0] sm:$0xff] }
0x111a   : > { %4671 = vmatpush2.msra.mxu1 %v6562_v55  ;;  %v6595_v55 = vld [vmem:[#allocation4 + $0xae8] sm:$0xff] }
0x111b   : > { %4672 = vmatprep.subr.mxu1 %v6563_v58  ;;  %v6596_v58 = vld [vmem:[#allocation4 + $0xae0] sm:$0xff] }
0x111c   : > { %4673 = vmatpush2.msra.mxu1 %v6564_v13  ;;  %v6597_v13 = vld [vmem:[#allocation4 + $0xad8] sm:$0xff] }
0x111d   : > { %4674 = vmatprep.subr.mxu1 %v6565_v14  ;;  %v6598_v14 = vld [vmem:[#allocation4 + $0xad0] sm:$0xff] }
0x111e   : > { %4675 = vmatpush2.msra.mxu1 %v6566_v15  ;;  %v6599_v15 = vld [vmem:[#allocation4 + $0xac8] sm:$0xff] }
0x111f   : > { %4676 = vmatprep.subr.mxu1 %v6567_v16  ;;  %v6600_v16 = vld [vmem:[#allocation4 + $0xac0] sm:$0xff] }
0x1120   : > { %4677 = vmatpush2.msra.mxu1 %v6568_v17  ;;  %v6601_v17 = vld [vmem:[#allocation4 + $0xab8] sm:$0xff] }
0x1121   : > { %4678 = vmatprep.subr.mxu1 %v6569_v26  ;;  %v6602_v26 = vld [vmem:[#allocation4 + $0xab0] sm:$0xff] }
0x1122   : > { %4679 = vmatpush2.msra.mxu1 %v6570_v18  ;;  %v6603_v18 = vld [vmem:[#allocation4 + $0xaa8] sm:$0xff] }
0x1123   : > { %4680 = vmatprep.subr.mxu1 %v6571_v19  ;;  %v6604_v19 = vld [vmem:[#allocation4 + $0xaa0] sm:$0xff] }
0x1124   : > { %4681 = vmatpush2.msra.mxu1 %v6572_v20  ;;  %v6605_v20 = vld [vmem:[#allocation4 + $0xa98] sm:$0xff] }
0x1125   : > { %4682 = vmatprep.subr.mxu1 %v6573_v21  ;;  %v6606_v21 = vld [vmem:[#allocation4 + $0xa90] sm:$0xff] }
0x1126   : > { %4683 = vmatpush2.msra.mxu1 %v6574_v12  ;;  %v6607_v12 = vld [vmem:[#allocation4 + $0xa88] sm:$0xff] }
0x1127   : > { %4684 = vmatprep.subr.mxu1 %v6575_v63  ;;  %v6608_v63 = vld [vmem:[#allocation4 + $0xa80] sm:$0xff] }
0x1128   : > { %4685 = vmatpush2.msra.mxu1 %v6576_v22  ;;  %v4865_v49 = vpop.f32.mrf.mxu0  ;;  %v6609_v22 = vld [vmem:[#allocation4 + $0xa78] sm:$0xff] }
0x1129   : > { %4686 = vmatprep.subr.mxu1 %v6577_v3  ;;  %v6610_v3 = vld [vmem:[#allocation4 + $0xa70] sm:$0xff] }
0x112a   : > { %4687 = vmatpush2.msra.mxu1 %v6578_v6  ;;  %v4867_v50 = vpop.f32.mrf.mxu0  ;;  %v6611_v6 = vld [vmem:[#allocation4 + $0xa68] sm:$0xff] }
0x112b   : > { %4688 = vmatprep.subr.mxu1 %v6579_v23  ;;  %v6612_v23 = vld [vmem:[#allocation4 + $0xa60] sm:$0xff] }
0x112c   : > { %4689 = vmatpush2.msra.mxu1 %v6580_v25  ;;  %v4871_v53 = vpop.f32.mrf.mxu0  ;;  %v6613_v25 = vld [vmem:[#allocation4 + $0xa58] sm:$0xff] }
0x112d   : > { %4690 = vmatprep.subr.mxu1 %v6581_v27  ;;  %v6614_v27 = vld [vmem:[#allocation4 + $0xa50] sm:$0xff] }
0x112e   : > { %4691 = vmatpush2.msra.mxu1 %v6582_v28  ;;  %v4873_v61 = vpop.f32.mrf.mxu0  ;;  %v6615_v28 = vld [vmem:[#allocation4 + $0xa48] sm:$0xff] }
0x112f   : > { %4692 = vmatprep.subr.mxu1 %v6583_v60  ;;  %v6616_v60 = vld [vmem:[#allocation4 + $0xa40] sm:$0xff] }
0x1130   : > { %4693 = vmatpush2.msra.mxu1 %v6584_v1  ;;  %v4877_v5 = vpop.f32.mrf.mxu0  ;;  %v6617_v1 = vld [vmem:[#allocation4 + $0xa38] sm:$0xff] }
0x1131   : > { %4694 = vmatprep.subr.mxu1 %v6585_v29  ;;  %v6618_v29 = vld [vmem:[#allocation4 + $0xa30] sm:$0xff] }
0x1132   : > { %4695 = vmatpush2.msra.mxu1 %v6586_v30  ;;  %v4879_v8 = vpop.f32.mrf.mxu0  ;;  %v6619_v30 = vld [vmem:[#allocation4 + $0xa28] sm:$0xff] }
0x1133   : > { %4696 = vmatprep.subr.mxu1 %v6587_v31  ;;  %v6620_v31 = vld [vmem:[#allocation4 + $0xa20] sm:$0xff] }
0x1134   : > { %4697 = vmatpush2.msra.mxu1 %v6588_v32  ;;  %v6621_v32 = vld [vmem:[#allocation4 + $0xa18] sm:$0xff] }
0x1135   : > { %4698 = vmatprep.subr.mxu1 %v6589_v33  ;;  %v6622_v33 = vld [vmem:[#allocation4 + $0xa10] sm:$0xff] }
0x1136   : > { %4699 = vmatpush2.msra.mxu1 %v6590_v34  ;;  %v6623_v34 = vld [vmem:[#allocation4 + $0xa08] sm:$0xff] }
0x1137   : > { %4700 = vmatprep.subr.mxu1 %v6591_v35  ;;  %v6624_v35 = vld [vmem:[#allocation4 + $0xa00] sm:$0xff] }
0x1138   : > { %4701 = vmatpush2.msra.mxu1 %v6592_v37  ;;  %v6625_v37 = vld [vmem:[#allocation4 + $0xbf8] sm:$0xff] }
0x1139   : > { %4703 = vmatmul.mubr.f32.vlgmr.msra.gmra.mxu1 %v7528_v38 }
0x113a   : > { %4708 = vmatprep.mubr.f32.mxu1 %v7538_v45 }
0x113d   : > { %4709 = vmatmul.mubr.f32.gmra.mxu1 %v7534_v57 }
0x113e   : > { %4714 = vmatprep.mubr.f32.mxu1 %v7325_v62 }
0x1141   : > { %4715 = vmatmul.mubr.f32.gmra.mxu1 %v7327_v0 }
0x1142   : > { %4790 = vmatprep.mubr.f32.mxu1 %v7010_v4 }
0x1179   : > { %v4398_v39 = vpop.f32.mrf.mxu1 }
0x117b   : > { %v4400_v40 = vpop.f32.mrf.mxu1 }
0x117f   : > { %v4472_v41 = vpop.f32.mrf.mxu1 }
0x1180   : > { %v4473_v42 = vadd.f32 %v4472_v41, %v4398_v39  ;;  %v6626_v39 = vld [vmem:[#allocation4 + $0xbf0] sm:$0xff]  ;;  %v6628_v41 = vld [vmem:[#allocation4 + $0xbe0] sm:$0xff] }
0x1181   : > { %v4474_v56 = vpop.f32.mrf.mxu1 }
0x1182   : > { %v4475_v43 = vadd.f32 %v4474_v56, %v4400_v40  ;;  %v6627_v40 = vld [vmem:[#allocation4 + $0xbe8] sm:$0xff]  ;;  %v6630_v56 = vld [vmem:[#allocation4 + $0xbd0] sm:$0xff] }
0x11b9   : > { %v4631_v24 = vpop.f32.mrf.mxu1 }
0x11ba   : > { %v7574_v44 = vadd.f32 %v4631_v24, %v4473_v42  ;;  %v6629_v42 = vld [vmem:[#allocation4 + $0xbd8] sm:$0xff]  ;;  %v6632_v24 = vld [vmem:[#allocation4 + $0xbc0] sm:$0xff] }
0x11bb   : > { %v4633_v46 = vpop.f32.mrf.mxu1 }
0x11bc   : > { %v7576_v48 = vadd.f32 %v4633_v46, %v4475_v43  ;;  %v6631_v43 = vld [vmem:[#allocation4 + $0xbc8] sm:$0xff]  ;;  %v6633_v46 = vld [vmem:[#allocation4 + $0xbb8] sm:$0xff] }
0x11f9   : > { %v4704_v51 = vpop.f32.mrf.mxu1 }
0x11fb   : > { %v4706_v52 = vpop.f32.mrf.mxu1 }
0x11fd   : > { %v4710_v36 = vpop.f32.mrf.mxu1 }
0x11ff   : > { %v4712_v59 = vpop.f32.mrf.mxu1 }
0x1201   : > { %v4716_v47 = vpop.f32.mrf.mxu1 }
0x1203   : > { %v4718_v2 = vpop.f32.mrf.mxu1 }
0x1204   : > { %4752 = vmatprep.subr.mxu1 %v4718_v2  ;;  %v6643_v2 = vld [vmem:[#allocation4 + $0xb68] sm:$0xff] }
0x1205   : > { %4753 = vmatpush1.msra.mxu1 %v4716_v47  ;;  %v6642_v47 = vld [vmem:[#allocation4 + $0xb70] sm:$0xff] }
0x1206   : > { %4754 = vmatprep.subr.mxu1 %v4712_v59  ;;  %v6640_v59 = vld [vmem:[#allocation4 + $0xb80] sm:$0xff] }
0x1207   : > { %4755 = vmatpush1.msra.mxu1 %v4710_v36  ;;  %v6639_v36 = vld [vmem:[#allocation4 + $0xb88] sm:$0xff] }
0x1208   : > { %4756 = vmatprep.subr.mxu1 %v4706_v52  ;;  %v6637_v52 = vld [vmem:[#allocation4 + $0xb98] sm:$0xff] }
0x1209   : > { %4757 = vmatpush1.msra.mxu1 %v4704_v51  ;;  %v6636_v51 = vld [vmem:[#allocation4 + $0xba0] sm:$0xff] }
0x120a   : > { %5832 = vmatmul.mubr.msk.f32.vlgmr.msra.gmra.mxu1 %vm4328_vm5, %v4722_v7  ;;  %4913 = vmatprep.subr.mxu1 %v4879_v8  ;;  %v6645_v7 = vld [vmem:[#allocation4 + $0xb58] sm:$0xff]  ;;  %v6646_v8 = vld [vmem:[#allocation4 + $0xb50] sm:$0xff] }
0x120b   : > { %4914 = vmatpush1.msra.mxu1 %v4877_v5  ;;  %4951 = vmatprep.mubr.f32.mxu1 %v7010_v4  ;;  %v6644_v5 = vld [vmem:[#allocation4 + $0xb60] sm:$0xff] }
0x120c   : > { %4915 = vmatprep.subr.mxu1 %v4873_v61  ;;  %v6641_v61 = vld [vmem:[#allocation4 + $0xb78] sm:$0xff] }
0x120d   : > { %4916 = vmatpush1.msra.mxu1 %v4871_v53  ;;  %v6638_v53 = vld [vmem:[#allocation4 + $0xb90] sm:$0xff] }
0x120e   : > { %4917 = vmatprep.subr.mxu1 %v4867_v50  ;;  %v6635_v50 = vld [vmem:[#allocation4 + $0xba8] sm:$0xff] }
0x120f   : > { %4918 = vmatpush1.msra.mxu1 %v4865_v49  ;;  %v6634_v49 = vld [vmem:[#allocation4 + $0xbb0] sm:$0xff] }
0x1210   : > { %5833 = vmatmul.mubr.msk.f32.vlgmr.msra.gmra.mxu1 %vm4328_vm5, %v4883_v9  ;;  %4960 = vmatprep.subr.mxu1 %v6593_v10  ;;  %v6647_v9 = vld [vmem:[#allocation4 + $0xb48] sm:$0xff]  ;;  %v6648_v10 = vld [vmem:[#allocation4 + $0xb40] sm:$0xff] }
0x1211   : > { %4961 = vmatpush1.msra.mxu1 %v6594_v11  ;;  %5024 = vmatprep.mubr.f32.mxu1 %v7530_v54  ;;  %v6649_v11 = vld [vmem:[#allocation4 + $0xb38] sm:$0xff] }
0x1212   : > { %4962 = vmatprep.subr.mxu1 %v6595_v55  ;;  %v6650_v55 = vld [vmem:[#allocation4 + $0xb30] sm:$0xff] }
0x1213   : > { %4963 = vmatpush1.msra.mxu1 %v6596_v58  ;;  %v6651_v58 = vld [vmem:[#allocation4 + $0xb28] sm:$0xff] }
0x1214   : > { %4964 = vmatprep.subr.mxu1 %v6597_v13  ;;  %v6652_v13 = vld [vmem:[#allocation4 + $0xb20] sm:$0xff] }
0x1215   : > { %4965 = vmatpush1.msra.mxu1 %v6598_v14  ;;  %v6653_v14 = vld [vmem:[#allocation4 + $0xb18] sm:$0xff] }
0x1216   : > { %4966 = vmatprep.subr.mxu1 %v6599_v15  ;;  %v6654_v15 = vld [vmem:[#allocation4 + $0xb10] sm:$0xff] }
0x1217   : > { %4967 = vmatpush1.msra.mxu1 %v6600_v16  ;;  %v6655_v16 = vld [vmem:[#allocation4 + $0xb08] sm:$0xff] }
0x1218   : > { %4968 = vmatprep.subr.mxu1 %v6601_v17  ;;  %v6656_v17 = vld [vmem:[#allocation4 + $0xb00] sm:$0xff] }
0x1219   : > { %4969 = vmatpush1.msra.mxu1 %v6602_v26 }
0x121a   : > { %4970 = vmatprep.subr.mxu1 %v6603_v18 }
0x121b   : > { %4971 = vmatpush1.msra.mxu1 %v6604_v19 }
0x121c   : > { %4972 = vmatprep.subr.mxu1 %v6605_v20 }
0x121d   : > { %4973 = vmatpush1.msra.mxu1 %v6606_v21 }
0x121e   : > { %4974 = vmatprep.subr.mxu1 %v6607_v12 }
0x121f   : > { %4975 = vmatpush1.msra.mxu1 %v6608_v63 }
0x1220   : > { %4976 = vmatprep.subr.mxu1 %v6609_v22 }
0x1221   : > { %4977 = vmatpush1.msra.mxu1 %v6610_v3 }
0x1222   : > { %4978 = vmatprep.subr.mxu1 %v6611_v6 }
0x1223   : > { %4979 = vmatpush1.msra.mxu1 %v6612_v23 }
0x1224   : > { %4980 = vmatprep.subr.mxu1 %v6613_v25 }
0x1225   : > { %4981 = vmatpush1.msra.mxu1 %v6614_v27 }
0x1226   : > { %4982 = vmatprep.subr.mxu1 %v6615_v28 }
0x1227   : > { %4983 = vmatpush1.msra.mxu1 %v6616_v60  ;;  %v6658_v60 = vld [vmem:[#allocation4 + $0xcf0] sm:$0xff] }
0x1228   : > { %4984 = vmatprep.subr.mxu1 %v6617_v1  ;;  %v6659_v1 = vld [vmem:[#allocation4 + $0xce8] sm:$0xff] }
0x1229   : > { %4985 = vmatpush1.msra.mxu1 %v6618_v29  ;;  %v6660_v29 = vld [vmem:[#allocation4 + $0xce0] sm:$0xff] }
0x122a   : > { %4986 = vmatprep.subr.mxu1 %v6619_v30  ;;  %v6661_v30 = vld [vmem:[#allocation4 + $0xcd8] sm:$0xff] }
0x122b   : > { %4987 = vmatpush1.msra.mxu1 %v6620_v31  ;;  %v6662_v31 = vld [vmem:[#allocation4 + $0xcd0] sm:$0xff] }
0x122c   : > { %4988 = vmatprep.subr.mxu1 %v6621_v32  ;;  %v6663_v32 = vld [vmem:[#allocation4 + $0xcc8] sm:$0xff] }
0x122d   : > { %4989 = vmatpush1.msra.mxu1 %v6622_v33  ;;  %v6664_v33 = vld [vmem:[#allocation4 + $0xcc0] sm:$0xff] }
0x122e   : > { %4990 = vmatprep.subr.mxu1 %v6623_v34  ;;  %v6665_v34 = vld [vmem:[#allocation4 + $0xcb8] sm:$0xff] }
0x122f   : > { %4991 = vmatpush1.msra.mxu1 %v6624_v35  ;;  %v6666_v35 = vld [vmem:[#allocation4 + $0xcb0] sm:$0xff] }
0x1230   : > { %4992 = vmatprep.subr.mxu1 %v6625_v37  ;;  %v6667_v37 = vld [vmem:[#allocation4 + $0xca8] sm:$0xff] }
0x1231   : > { %4993 = vmatpush2.msra.mxu1 %v6626_v39  ;;  %v6668_v39 = vld [vmem:[#allocation4 + $0xca0] sm:$0xff] }
0x1232   : > { %4994 = vmatprep.subr.mxu1 %v6627_v40  ;;  %v6669_v40 = vld [vmem:[#allocation4 + $0xc98] sm:$0xff] }
0x1233   : > { %4995 = vmatpush2.msra.mxu1 %v6628_v41  ;;  %v6670_v41 = vld [vmem:[#allocation4 + $0xc90] sm:$0xff] }
0x1234   : > { %4996 = vmatprep.subr.mxu1 %v6629_v42  ;;  %v6671_v42 = vld [vmem:[#allocation4 + $0xc88] sm:$0xff] }
0x1235   : > { %4997 = vmatpush2.msra.mxu1 %v6630_v56  ;;  %v6672_v56 = vld [vmem:[#allocation4 + $0xc80] sm:$0xff] }
0x1236   : > { %4998 = vmatprep.subr.mxu1 %v6631_v43  ;;  %v6673_v43 = vld [vmem:[#allocation4 + $0xc78] sm:$0xff] }
0x1237   : > { %4999 = vmatpush2.msra.mxu1 %v6632_v24  ;;  %v6674_v24 = vld [vmem:[#allocation4 + $0xc70] sm:$0xff] }
0x1238   : > { %5000 = vmatprep.subr.mxu1 %v6633_v46  ;;  %v6675_v46 = vld [vmem:[#allocation4 + $0xc68] sm:$0xff] }
0x1239   : > { %5001 = vmatpush2.msra.mxu1 %v6634_v49  ;;  %v6676_v49 = vld [vmem:[#allocation4 + $0xc60] sm:$0xff] }
0x123a   : > { %5002 = vmatprep.subr.mxu1 %v6635_v50  ;;  %v6677_v50 = vld [vmem:[#allocation4 + $0xc58] sm:$0xff] }
0x123b   : > { %5003 = vmatpush2.msra.mxu1 %v6636_v51  ;;  %v6678_v51 = vld [vmem:[#allocation4 + $0xc50] sm:$0xff] }
0x123c   : > { %5004 = vmatprep.subr.mxu1 %v6637_v52  ;;  %v6679_v52 = vld [vmem:[#allocation4 + $0xc48] sm:$0xff] }
0x123d   : > { %5005 = vmatpush2.msra.mxu1 %v6638_v53  ;;  %v6680_v53 = vld [vmem:[#allocation4 + $0xc40] sm:$0xff] }
0x123e   : > { %5006 = vmatprep.subr.mxu1 %v6639_v36  ;;  %v6681_v36 = vld [vmem:[#allocation4 + $0xc38] sm:$0xff] }
0x123f   : > { %5007 = vmatpush2.msra.mxu1 %v6640_v59  ;;  %v6682_v59 = vld [vmem:[#allocation4 + $0xc30] sm:$0xff] }
0x1240   : > { %5008 = vmatprep.subr.mxu1 %v6641_v61  ;;  %v6683_v61 = vld [vmem:[#allocation4 + $0xc28] sm:$0xff] }
0x1241   : > { %5009 = vmatpush2.msra.mxu1 %v6642_v47  ;;  %v6684_v47 = vld [vmem:[#allocation4 + $0xc20] sm:$0xff] }
0x1242   : > { %5010 = vmatprep.subr.mxu1 %v6643_v2  ;;  %v6685_v2 = vld [vmem:[#allocation4 + $0xc18] sm:$0xff] }
0x1243   : > { %5011 = vmatpush2.msra.mxu1 %v6644_v5  ;;  %v6686_v5 = vld [vmem:[#allocation4 + $0xc10] sm:$0xff] }
0x1244   : > { %5012 = vmatprep.subr.mxu1 %v6645_v7  ;;  %v6687_v7 = vld [vmem:[#allocation4 + $0xc08] sm:$0xff] }
0x1245   : > { %5013 = vmatpush2.msra.mxu1 %v6646_v8  ;;  %v6688_v8 = vld [vmem:[#allocation4 + $0xc00] sm:$0xff] }
0x1246   : > { %5014 = vmatprep.subr.mxu1 %v6647_v9  ;;  %v6689_v9 = vld [vmem:[#allocation4 + $0xdf8] sm:$0xff] }
0x1247   : > { %5015 = vmatpush2.msra.mxu1 %v6648_v10  ;;  %v6690_v10 = vld [vmem:[#allocation4 + $0xdf0] sm:$0xff] }
0x1248   : > { %5016 = vmatprep.subr.mxu1 %v6649_v11  ;;  %v6691_v11 = vld [vmem:[#allocation4 + $0xde8] sm:$0xff] }
0x1249   : > { %5017 = vmatpush2.msra.mxu1 %v6650_v55  ;;  %v6692_v55 = vld [vmem:[#allocation4 + $0xde0] sm:$0xff] }
0x124a   : > { %5018 = vmatprep.subr.mxu1 %v6651_v58  ;;  %v6693_v58 = vld [vmem:[#allocation4 + $0xdd8] sm:$0xff] }
0x124b   : > { %5019 = vmatpush2.msra.mxu1 %v6652_v13  ;;  %v6694_v13 = vld [vmem:[#allocation4 + $0xdd0] sm:$0xff] }
0x124c   : > { %5020 = vmatprep.subr.mxu1 %v6653_v14  ;;  %v6695_v14 = vld [vmem:[#allocation4 + $0xdc8] sm:$0xff] }
0x124d   : > { %5021 = vmatpush2.msra.mxu1 %v6654_v15  ;;  %v6696_v15 = vld [vmem:[#allocation4 + $0xdc0] sm:$0xff] }
0x124e   : > { %5022 = vmatprep.subr.mxu1 %v6655_v16  ;;  %v6697_v16 = vld [vmem:[#allocation4 + $0xdb8] sm:$0xff] }
0x124f   : > { %5023 = vmatpush2.msra.mxu1 %v6656_v17  ;;  %v6698_v17 = vld [vmem:[#allocation4 + $0xdb0] sm:$0xff] }
0x1250   : > { %5025 = vmatmul.mubr.f32.vlgmr.msra.gmra.mxu1 %v7528_v38 }
0x1251   : > { %5030 = vmatprep.mubr.f32.mxu1 %v7538_v45 }
0x1254   : > { %5031 = vmatmul.mubr.f32.gmra.mxu1 %v7534_v57 }
0x1255   : > { %5036 = vmatprep.mubr.f32.mxu1 %v7325_v62 }
0x1258   : > { %5037 = vmatmul.mubr.f32.gmra.mxu1 %v7327_v0 }
0x1259   : > { %5273 = vmatprep.mubr.f32.mxu1 %v7010_v4 }
0x12ca   : > { %v4792_v26 = vpop.f32.mrf.mxu1 }
0x12cb   : > { %v4797_v18 = vadd.f32 %v4792_v26, %v7574_v44  ;;  %v5044_v44 = vld [vmem:[#allocation2 + $0xa] sm:$0x3]  ;;  %v6699_v26 = vld [vmem:[#allocation4 + $0xda8] sm:$0xff] }
0x12cc   : > { %v4794_v19 = vpop.f32.mrf.mxu1 }
0x12cd   : > { %v4798_v20 = vadd.f32 %v4794_v19, %v7576_v48  ;;  %v6657_v48 = vld [vmem:[#allocation4 + $0xcf8] sm:$0xff] }
0x12ce   : > { %v6701_v19 = vld [vmem:[#allocation4 + $0xd98] sm:$0xff] }
0x12d0   : > { %v4953_v21 = vpop.f32.mrf.mxu1 }
0x12d1   : > { %v7590_v12 = vadd.f32 %v4953_v21, %v4797_v18  ;;  %v6700_v18 = vld [vmem:[#allocation4 + $0xda0] sm:$0xff]  ;;  %v6703_v21 = vld [vmem:[#allocation4 + $0xd88] sm:$0xff] }
0x12d2   : > { %v4955_v63 = vpop.f32.mrf.mxu1 }
0x12d3   : > { %v7592_v22 = vadd.f32 %v4955_v63, %v4798_v20  ;;  %v6702_v20 = vld [vmem:[#allocation4 + $0xd90] sm:$0xff]  ;;  %v6704_v63 = vld [vmem:[#allocation4 + $0xd80] sm:$0xff] }
0x1310   : > { %v5026_v3 = vpop.f32.mrf.mxu1 }
0x1312   : > { %v5028_v6 = vpop.f32.mrf.mxu1 }
0x1314   : > { %v5032_v23 = vpop.f32.mrf.mxu1 }
0x1316   : > { %v5034_v25 = vpop.f32.mrf.mxu1 }
0x1318   : > { %v5038_v27 = vpop.f32.mrf.mxu1 }
0x131a   : > { %v5040_v28 = vpop.f32.mrf.mxu1 }
0x131b   : > { %5074 = vmatprep.subr.mxu0 %v5040_v28  ;;  %v6710_v28 = vld [vmem:[#allocation4 + $0xd50] sm:$0xff] }
0x131c   : > { %5075 = vmatpush1.msra.mxu0 %v5038_v27  ;;  %v6709_v27 = vld [vmem:[#allocation4 + $0xd58] sm:$0xff] }
0x131d   : > { %5076 = vmatprep.subr.mxu0 %v5034_v25  ;;  %v6708_v25 = vld [vmem:[#allocation4 + $0xd60] sm:$0xff] }
0x131e   : > { %5077 = vmatpush1.msra.mxu0 %v5032_v23  ;;  %v6707_v23 = vld [vmem:[#allocation4 + $0xd68] sm:$0xff] }
0x131f   : > { %5078 = vmatprep.subr.mxu0 %v5028_v6  ;;  %v6706_v6 = vld [vmem:[#allocation4 + $0xd70] sm:$0xff] }
0x1320   : > { %5079 = vmatpush1.msra.mxu0 %v5026_v3  ;;  %v6705_v3 = vld [vmem:[#allocation4 + $0xd78] sm:$0xff] }
0x1321   : > { %5834 = vmatmul.mubr.msk.f32.vlgmr.msra.gmra.mxu0 %vm4328_vm5, %v5044_v44  ;;  %5121 = vmatprep.subr.mxu0 %v6657_v48  ;;  %v6711_v44 = vld [vmem:[#allocation4 + $0xd48] sm:$0xff]  ;;  %v6712_v48 = vld [vmem:[#allocation4 + $0xd40] sm:$0xff] }
0x1322   : > { %5122 = vmatpush1.msra.mxu0 %v6658_v60  ;;  %5185 = vmatprep.mubr.f32.mxu0 %v7530_v54  ;;  %v6713_v60 = vld [vmem:[#allocation4 + $0xd38] sm:$0xff] }
0x1323   : > { %5123 = vmatprep.subr.mxu0 %v6659_v1  ;;  %v6714_v1 = vld [vmem:[#allocation4 + $0xd30] sm:$0xff] }
0x1324   : > { %5124 = vmatpush1.msra.mxu0 %v6660_v29  ;;  %v6715_v29 = vld [vmem:[#allocation4 + $0xd28] sm:$0xff] }
0x1325   : > { %5125 = vmatprep.subr.mxu0 %v6661_v30  ;;  %v6716_v30 = vld [vmem:[#allocation4 + $0xd20] sm:$0xff] }
0x1326   : > { %5126 = vmatpush1.msra.mxu0 %v6662_v31  ;;  %v6717_v31 = vld [vmem:[#allocation4 + $0xd18] sm:$0xff] }
0x1327   : > { %5127 = vmatprep.subr.mxu0 %v6663_v32  ;;  %v6718_v32 = vld [vmem:[#allocation4 + $0xd10] sm:$0xff] }
0x1328   : > { %5128 = vmatpush1.msra.mxu0 %v6664_v33  ;;  %v6719_v33 = vld [vmem:[#allocation4 + $0xd08] sm:$0xff] }
0x1329   : > { %5129 = vmatprep.subr.mxu0 %v6665_v34  ;;  %v6720_v34 = vld [vmem:[#allocation4 + $0xd00] sm:$0xff] }
0x132a   : > { %5130 = vmatpush1.msra.mxu0 %v6666_v35 }
0x132b   : > { %5131 = vmatprep.subr.mxu0 %v6667_v37 }
0x132c   : > { %5132 = vmatpush1.msra.mxu0 %v6668_v39 }
0x132d   : > { %5133 = vmatprep.subr.mxu0 %v6669_v40 }
0x132e   : > { %5134 = vmatpush1.msra.mxu0 %v6670_v41 }
0x132f   : > { %5135 = vmatprep.subr.mxu0 %v6671_v42 }
0x1330   : > { %5136 = vmatpush1.msra.mxu0 %v6672_v56 }
0x1331   : > { %5137 = vmatprep.subr.mxu0 %v6673_v43 }
0x1332   : > { %5138 = vmatpush1.msra.mxu0 %v6674_v24 }
0x1333   : > { %5139 = vmatprep.subr.mxu0 %v6675_v46 }
0x1334   : > { %5140 = vmatpush1.msra.mxu0 %v6676_v49  ;;  %v5205_v49 = vld [vmem:[#allocation2 + $0xc] sm:$0x3] }
0x1335   : > { %5141 = vmatprep.subr.mxu0 %v6677_v50  ;;  %v6722_v50 = vld [vmem:[#allocation4 + $0xef0] sm:$0xff] }
0x1336   : > { %5142 = vmatpush1.msra.mxu0 %v6678_v51  ;;  %v6724_v51 = vld [vmem:[#allocation4 + $0xee0] sm:$0xff] }
0x1337   : > { %5143 = vmatprep.subr.mxu0 %v6679_v52  ;;  %v6725_v52 = vld [vmem:[#allocation4 + $0xed8] sm:$0xff] }
0x1338   : > { %5144 = vmatpush1.msra.mxu0 %v6680_v53  ;;  %v6726_v53 = vld [vmem:[#allocation4 + $0xed0] sm:$0xff] }
0x1339   : > { %5145 = vmatprep.subr.mxu0 %v6681_v36  ;;  %v6727_v36 = vld [vmem:[#allocation4 + $0xec8] sm:$0xff] }
0x133a   : > { %5146 = vmatpush1.msra.mxu0 %v6682_v59  ;;  %v6728_v59 = vld [vmem:[#allocation4 + $0xec0] sm:$0xff] }
0x133b   : > { %5147 = vmatprep.subr.mxu0 %v6683_v61  ;;  %v6729_v61 = vld [vmem:[#allocation4 + $0xeb8] sm:$0xff] }
0x133c   : > { %5148 = vmatpush1.msra.mxu0 %v6684_v47  ;;  %v6730_v47 = vld [vmem:[#allocation4 + $0xeb0] sm:$0xff] }
0x133d   : > { %5149 = vmatprep.subr.mxu0 %v6685_v2  ;;  %v6731_v2 = vld [vmem:[#allocation4 + $0xea8] sm:$0xff] }
0x133e   : > { %5150 = vmatpush1.msra.mxu0 %v6686_v5  ;;  %v6732_v5 = vld [vmem:[#allocation4 + $0xea0] sm:$0xff] }
0x133f   : > { %5151 = vmatprep.subr.mxu0 %v6687_v7  ;;  %v6733_v7 = vld [vmem:[#allocation4 + $0xe98] sm:$0xff] }
0x1340   : > { %5152 = vmatpush1.msra.mxu0 %v6688_v8  ;;  %v6734_v8 = vld [vmem:[#allocation4 + $0xe90] sm:$0xff] }
0x1341   : > { %5153 = vmatprep.subr.mxu0 %v6689_v9  ;;  %v6735_v9 = vld [vmem:[#allocation4 + $0xe88] sm:$0xff] }
0x1342   : > { %5154 = vmatpush2.msra.mxu0 %v6690_v10  ;;  %v6736_v10 = vld [vmem:[#allocation4 + $0xe80] sm:$0xff] }
0x1343   : > { %5155 = vmatprep.subr.mxu0 %v6691_v11  ;;  %v6737_v11 = vld [vmem:[#allocation4 + $0xe78] sm:$0xff] }
0x1344   : > { %5156 = vmatpush2.msra.mxu0 %v6692_v55  ;;  %v6738_v55 = vld [vmem:[#allocation4 + $0xe70] sm:$0xff] }
0x1345   : > { %5157 = vmatprep.subr.mxu0 %v6693_v58  ;;  %v6739_v58 = vld [vmem:[#allocation4 + $0xe68] sm:$0xff] }
0x1346   : > { %5158 = vmatpush2.msra.mxu0 %v6694_v13  ;;  %v6740_v13 = vld [vmem:[#allocation4 + $0xe60] sm:$0xff] }
0x1347   : > { %5159 = vmatprep.subr.mxu0 %v6695_v14  ;;  %v6741_v14 = vld [vmem:[#allocation4 + $0xe58] sm:$0xff] }
0x1348   : > { %5160 = vmatpush2.msra.mxu0 %v6696_v15  ;;  %v6742_v15 = vld [vmem:[#allocation4 + $0xe50] sm:$0xff] }
0x1349   : > { %5161 = vmatprep.subr.mxu0 %v6697_v16  ;;  %v6743_v16 = vld [vmem:[#allocation4 + $0xe48] sm:$0xff] }
0x134a   : > { %5162 = vmatpush2.msra.mxu0 %v6698_v17  ;;  %v6744_v17 = vld [vmem:[#allocation4 + $0xe40] sm:$0xff] }
0x134b   : > { %5163 = vmatprep.subr.mxu0 %v6699_v26  ;;  %v6745_v26 = vld [vmem:[#allocation4 + $0xe38] sm:$0xff] }
0x134c   : > { %5164 = vmatpush2.msra.mxu0 %v6700_v18  ;;  %v6746_v18 = vld [vmem:[#allocation4 + $0xe30] sm:$0xff] }
0x134d   : > { %5165 = vmatprep.subr.mxu0 %v6701_v19  ;;  %v6747_v19 = vld [vmem:[#allocation4 + $0xe28] sm:$0xff] }
0x134e   : > { %5166 = vmatpush2.msra.mxu0 %v6702_v20  ;;  %v6748_v20 = vld [vmem:[#allocation4 + $0xe20] sm:$0xff] }
0x134f   : > { %5167 = vmatprep.subr.mxu0 %v6703_v21  ;;  %v6749_v21 = vld [vmem:[#allocation4 + $0xe18] sm:$0xff] }
0x1350   : > { %5168 = vmatpush2.msra.mxu0 %v6704_v63  ;;  %v6750_v63 = vld [vmem:[#allocation4 + $0xe10] sm:$0xff] }
0x1351   : > { %5169 = vmatprep.subr.mxu0 %v6705_v3  ;;  %v6751_v3 = vld [vmem:[#allocation4 + $0xe08] sm:$0xff] }
0x1352   : > { %5170 = vmatpush2.msra.mxu0 %v6706_v6  ;;  %v6752_v6 = vld [vmem:[#allocation4 + $0xe00] sm:$0xff] }
0x1353   : > { %5171 = vmatprep.subr.mxu0 %v6707_v23  ;;  %v6753_v23 = vld [vmem:[#allocation4 + $0xff8] sm:$0xff] }
0x1354   : > { %5172 = vmatpush2.msra.mxu0 %v6708_v25  ;;  %v6754_v25 = vld [vmem:[#allocation4 + $0xff0] sm:$0xff] }
0x1355   : > { %5173 = vmatprep.subr.mxu0 %v6709_v27  ;;  %v6755_v27 = vld [vmem:[#allocation4 + $0xfe8] sm:$0xff] }
0x1356   : > { %5174 = vmatpush2.msra.mxu0 %v6710_v28  ;;  %v6756_v28 = vld [vmem:[#allocation4 + $0xfe0] sm:$0xff] }
0x1357   : > { %5175 = vmatprep.subr.mxu0 %v6711_v44  ;;  %v6757_v44 = vld [vmem:[#allocation4 + $0xfd8] sm:$0xff] }
0x1358   : > { %5176 = vmatpush2.msra.mxu0 %v6712_v48  ;;  %v6758_v48 = vld [vmem:[#allocation4 + $0xfd0] sm:$0xff] }
0x1359   : > { %5177 = vmatprep.subr.mxu0 %v6713_v60  ;;  %v6759_v60 = vld [vmem:[#allocation4 + $0xfc8] sm:$0xff] }
0x135a   : > { %5178 = vmatpush2.msra.mxu0 %v6714_v1  ;;  %v6760_v1 = vld [vmem:[#allocation4 + $0xfc0] sm:$0xff] }
0x135b   : > { %5179 = vmatprep.subr.mxu0 %v6715_v29  ;;  %v6761_v29 = vld [vmem:[#allocation4 + $0xfb8] sm:$0xff] }
0x135c   : > { %5180 = vmatpush2.msra.mxu0 %v6716_v30  ;;  %v6762_v30 = vld [vmem:[#allocation4 + $0xfb0] sm:$0xff] }
0x135d   : > { %5181 = vmatprep.subr.mxu0 %v6717_v31  ;;  %v6763_v31 = vld [vmem:[#allocation4 + $0xfa8] sm:$0xff] }
0x135e   : > { %5182 = vmatpush2.msra.mxu0 %v6718_v32  ;;  %v6764_v32 = vld [vmem:[#allocation4 + $0xfa0] sm:$0xff] }
0x135f   : > { %5183 = vmatprep.subr.mxu0 %v6719_v33  ;;  %v6765_v33 = vld [vmem:[#allocation4 + $0xf98] sm:$0xff] }
0x1360   : > { %5184 = vmatpush2.msra.mxu0 %v6720_v34  ;;  %v6766_v34 = vld [vmem:[#allocation4 + $0xf90] sm:$0xff] }
0x1361   : > { %5186 = vmatmul.mubr.f32.vlgmr.msra.gmra.mxu0 %v7528_v38 }
0x1362   : > { %5191 = vmatprep.mubr.f32.mxu0 %v7538_v45 }
0x1365   : > { %5192 = vmatmul.mubr.f32.gmra.mxu0 %v7534_v57 }
0x1366   : > { %5197 = vmatprep.mubr.f32.mxu0 %v7325_v62 }
0x1369   : > { %5198 = vmatmul.mubr.f32.gmra.mxu0 %v7327_v0 }
0x136a   : > { %5434 = vmatprep.mubr.f32.mxu0 %v7010_v4 }
0x13e1   : > { %v5114_v35 = vpop.f32.mrf.mxu0 }
0x13e2   : > { %v7603_v37 = vadd.f32 %v5114_v35, %v7590_v12  ;;  %v6721_v12 = vld [vmem:[#allocation4 + $0xef8] sm:$0xff]  ;;  %v6767_v35 = vld [vmem:[#allocation4 + $0xf88] sm:$0xff] }
0x13e3   : > { %v5116_v39 = vpop.f32.mrf.mxu0 }
0x13e4   : > { %v7606_v40 = vadd.f32 %v5116_v39, %v7592_v22  ;;  %v6723_v22 = vld [vmem:[#allocation4 + $0xee8] sm:$0xff]  ;;  %v6768_v39 = vld [vmem:[#allocation4 + $0xf80] sm:$0xff] }
0x1421   : > { %v5187_v41 = vpop.f32.mrf.mxu0 }
0x1423   : > { %v5189_v42 = vpop.f32.mrf.mxu0 }
0x1425   : > { %v5193_v56 = vpop.f32.mrf.mxu0 }
0x1427   : > { %v5195_v43 = vpop.f32.mrf.mxu0 }
0x1429   : > { %v5199_v24 = vpop.f32.mrf.mxu0 }
0x142b   : > { %v5201_v46 = vpop.f32.mrf.mxu0 }
0x142c   : > { %5235 = vmatprep.subr.mxu1 %v5201_v46  ;;  %v6774_v46 = vld [vmem:[#allocation4 + $0xf50] sm:$0xff] }
0x142d   : > { %5236 = vmatpush1.msra.mxu1 %v5199_v24  ;;  %v6773_v24 = vld [vmem:[#allocation4 + $0xf58] sm:$0xff] }
0x142e   : > { %5237 = vmatprep.subr.mxu1 %v5195_v43  ;;  %v6772_v43 = vld [vmem:[#allocation4 + $0xf60] sm:$0xff] }
0x142f   : > { %5238 = vmatpush1.msra.mxu1 %v5193_v56  ;;  %v6771_v56 = vld [vmem:[#allocation4 + $0xf68] sm:$0xff] }
0x1430   : > { %5239 = vmatprep.subr.mxu1 %v5189_v42  ;;  %v6770_v42 = vld [vmem:[#allocation4 + $0xf70] sm:$0xff] }
0x1431   : > { %5240 = vmatpush1.msra.mxu1 %v5187_v41  ;;  %v6769_v41 = vld [vmem:[#allocation4 + $0xf78] sm:$0xff] }
0x1432   : > { %5835 = vmatmul.mubr.msk.f32.vlgmr.msra.gmra.mxu1 %vm4328_vm5, %v5205_v49  ;;  %5282 = vmatprep.subr.mxu1 %v6721_v12  ;;  %v6775_v49 = vld [vmem:[#allocation4 + $0xf48] sm:$0xff]  ;;  %v6776_v12 = vld [vmem:[#allocation4 + $0xf40] sm:$0xff] }
0x1433   : > { %5283 = vmatpush1.msra.mxu1 %v6722_v50  ;;  %5346 = vmatprep.mubr.f32.mxu1 %v7530_v54  ;;  %v6777_v50 = vld [vmem:[#allocation4 + $0xf38] sm:$0xff] }
0x1434   : > { %5284 = vmatprep.subr.mxu1 %v6723_v22  ;;  %v6778_v22 = vld [vmem:[#allocation4 + $0xf30] sm:$0xff] }
0x1435   : > { %5285 = vmatpush1.msra.mxu1 %v6724_v51  ;;  %v6779_v51 = vld [vmem:[#allocation4 + $0xf28] sm:$0xff] }
0x1436   : > { %5286 = vmatprep.subr.mxu1 %v6725_v52  ;;  %v6780_v52 = vld [vmem:[#allocation4 + $0xf20] sm:$0xff] }
0x1437   : > { %5287 = vmatpush1.msra.mxu1 %v6726_v53  ;;  %v6781_v53 = vld [vmem:[#allocation4 + $0xf18] sm:$0xff] }
0x1438   : > { %5288 = vmatprep.subr.mxu1 %v6727_v36  ;;  %v6782_v36 = vld [vmem:[#allocation4 + $0xf10] sm:$0xff] }
0x1439   : > { %5289 = vmatpush1.msra.mxu1 %v6728_v59  ;;  %v6783_v59 = vld [vmem:[#allocation4 + $0xf08] sm:$0xff] }
0x143a   : > { %5290 = vmatprep.subr.mxu1 %v6729_v61  ;;  %v6784_v61 = vld [vmem:[#allocation4 + $0xf00] sm:$0xff] }
0x143b   : > { %5291 = vmatpush1.msra.mxu1 %v6730_v47 }
0x143c   : > { %5292 = vmatprep.subr.mxu1 %v6731_v2 }
0x143d   : > { %5293 = vmatpush1.msra.mxu1 %v6732_v5 }
0x143e   : > { %5294 = vmatprep.subr.mxu1 %v6733_v7 }
0x143f   : > { %5295 = vmatpush1.msra.mxu1 %v6734_v8 }
0x1440   : > { %5296 = vmatprep.subr.mxu1 %v6735_v9 }
0x1441   : > { %5297 = vmatpush1.msra.mxu1 %v6736_v10 }
0x1442   : > { %5298 = vmatprep.subr.mxu1 %v6737_v11 }
0x1443   : > { %5299 = vmatpush1.msra.mxu1 %v6738_v55 }
0x1444   : > { %5300 = vmatprep.subr.mxu1 %v6739_v58 }
0x1445   : > { %5301 = vmatpush1.msra.mxu1 %v6740_v13  ;;  %v5366_v13 = vld [vmem:[#allocation2 + $0xe] sm:$0x3] }
0x1446   : > { %5302 = vmatprep.subr.mxu1 %v6741_v14  ;;  %v6788_v14 = vld [vmem:[#allocation4 + $0x10e0] sm:$0xff] }
0x1447   : > { %5303 = vmatpush1.msra.mxu1 %v6742_v15  ;;  %v6789_v15 = vld [vmem:[#allocation4 + $0x10d8] sm:$0xff] }
0x1448   : > { %5304 = vmatprep.subr.mxu1 %v6743_v16  ;;  %v6790_v16 = vld [vmem:[#allocation4 + $0x10d0] sm:$0xff] }
0x1449   : > { %5305 = vmatpush1.msra.mxu1 %v6744_v17  ;;  %v6791_v17 = vld [vmem:[#allocation4 + $0x10c8] sm:$0xff] }
0x144a   : > { %5306 = vmatprep.subr.mxu1 %v6745_v26  ;;  %v6792_v26 = vld [vmem:[#allocation4 + $0x10c0] sm:$0xff] }
0x144b   : > { %5307 = vmatpush1.msra.mxu1 %v6746_v18  ;;  %v6793_v18 = vld [vmem:[#allocation4 + $0x10b8] sm:$0xff] }
0x144c   : > { %5308 = vmatprep.subr.mxu1 %v6747_v19  ;;  %v6794_v19 = vld [vmem:[#allocation4 + $0x10b0] sm:$0xff] }
0x144d   : > { %5309 = vmatpush1.msra.mxu1 %v6748_v20  ;;  %v6795_v20 = vld [vmem:[#allocation4 + $0x10a8] sm:$0xff] }
0x144e   : > { %5310 = vmatprep.subr.mxu1 %v6749_v21  ;;  %v6796_v21 = vld [vmem:[#allocation4 + $0x10a0] sm:$0xff] }
0x144f   : > { %5311 = vmatpush1.msra.mxu1 %v6750_v63  ;;  %v6798_v63 = vld [vmem:[#allocation4 + $0x1090] sm:$0xff] }
0x1450   : > { %5312 = vmatprep.subr.mxu1 %v6751_v3  ;;  %v6799_v3 = vld [vmem:[#allocation4 + $0x1088] sm:$0xff] }
0x1451   : > { %5313 = vmatpush1.msra.mxu1 %v6752_v6  ;;  %v6800_v6 = vld [vmem:[#allocation4 + $0x1080] sm:$0xff] }
0x1452   : > { %5314 = vmatprep.subr.mxu1 %v6753_v23  ;;  %v6801_v23 = vld [vmem:[#allocation4 + $0x1078] sm:$0xff] }
0x1453   : > { %5315 = vmatpush2.msra.mxu1 %v6754_v25  ;;  %v6802_v25 = vld [vmem:[#allocation4 + $0x1070] sm:$0xff] }
0x1454   : > { %5316 = vmatprep.subr.mxu1 %v6755_v27  ;;  %v6803_v27 = vld [vmem:[#allocation4 + $0x1068] sm:$0xff] }
0x1455   : > { %5317 = vmatpush2.msra.mxu1 %v6756_v28  ;;  %v6804_v28 = vld [vmem:[#allocation4 + $0x1060] sm:$0xff] }
0x1456   : > { %5318 = vmatprep.subr.mxu1 %v6757_v44  ;;  %v6805_v44 = vld [vmem:[#allocation4 + $0x1058] sm:$0xff] }
0x1457   : > { %5319 = vmatpush2.msra.mxu1 %v6758_v48  ;;  %v6806_v48 = vld [vmem:[#allocation4 + $0x1050] sm:$0xff] }
0x1458   : > { %5320 = vmatprep.subr.mxu1 %v6759_v60  ;;  %v6807_v60 = vld [vmem:[#allocation4 + $0x1048] sm:$0xff] }
0x1459   : > { %5321 = vmatpush2.msra.mxu1 %v6760_v1  ;;  %v6808_v1 = vld [vmem:[#allocation4 + $0x1040] sm:$0xff] }
0x145a   : > { %5322 = vmatprep.subr.mxu1 %v6761_v29  ;;  %v6809_v29 = vld [vmem:[#allocation4 + $0x1038] sm:$0xff] }
0x145b   : > { %5323 = vmatpush2.msra.mxu1 %v6762_v30  ;;  %v6810_v30 = vld [vmem:[#allocation4 + $0x1030] sm:$0xff] }
0x145c   : > { %5324 = vmatprep.subr.mxu1 %v6763_v31  ;;  %v6811_v31 = vld [vmem:[#allocation4 + $0x1028] sm:$0xff] }
0x145d   : > { %5325 = vmatpush2.msra.mxu1 %v6764_v32  ;;  %v6812_v32 = vld [vmem:[#allocation4 + $0x1020] sm:$0xff] }
0x145e   : > { %5326 = vmatprep.subr.mxu1 %v6765_v33  ;;  %v6813_v33 = vld [vmem:[#allocation4 + $0x1018] sm:$0xff] }
0x145f   : > { %5327 = vmatpush2.msra.mxu1 %v6766_v34  ;;  %v6814_v34 = vld [vmem:[#allocation4 + $0x1010] sm:$0xff] }
0x1460   : > { %5328 = vmatprep.subr.mxu1 %v6767_v35  ;;  %v6815_v35 = vld [vmem:[#allocation4 + $0x1008] sm:$0xff] }
0x1461   : > { %5329 = vmatpush2.msra.mxu1 %v6768_v39  ;;  %v6816_v39 = vld [vmem:[#allocation4 + $0x1000] sm:$0xff] }
0x1462   : > { %5330 = vmatprep.subr.mxu1 %v6769_v41  ;;  %v6817_v41 = vld [vmem:[#allocation4 + $0x11f8] sm:$0xff] }
0x1463   : > { %5331 = vmatpush2.msra.mxu1 %v6770_v42  ;;  %v6818_v42 = vld [vmem:[#allocation4 + $0x11f0] sm:$0xff] }
0x1464   : > { %5332 = vmatprep.subr.mxu1 %v6771_v56  ;;  %v6819_v56 = vld [vmem:[#allocation4 + $0x11e8] sm:$0xff] }
0x1465   : > { %5333 = vmatpush2.msra.mxu1 %v6772_v43  ;;  %v6820_v43 = vld [vmem:[#allocation4 + $0x11e0] sm:$0xff] }
0x1466   : > { %5334 = vmatprep.subr.mxu1 %v6773_v24  ;;  %v6821_v24 = vld [vmem:[#allocation4 + $0x11d8] sm:$0xff] }
0x1467   : > { %5335 = vmatpush2.msra.mxu1 %v6774_v46  ;;  %v6822_v46 = vld [vmem:[#allocation4 + $0x11d0] sm:$0xff] }
0x1468   : > { %5336 = vmatprep.subr.mxu1 %v6775_v49  ;;  %v6823_v49 = vld [vmem:[#allocation4 + $0x11c8] sm:$0xff] }
0x1469   : > { %5337 = vmatpush2.msra.mxu1 %v6776_v12  ;;  %v6824_v12 = vld [vmem:[#allocation4 + $0x11c0] sm:$0xff] }
0x146a   : > { %5338 = vmatprep.subr.mxu1 %v6777_v50  ;;  %v6825_v50 = vld [vmem:[#allocation4 + $0x11b8] sm:$0xff] }
0x146b   : > { %5339 = vmatpush2.msra.mxu1 %v6778_v22  ;;  %v6826_v22 = vld [vmem:[#allocation4 + $0x11b0] sm:$0xff] }
0x146c   : > { %5340 = vmatprep.subr.mxu1 %v6779_v51  ;;  %v6827_v51 = vld [vmem:[#allocation4 + $0x11a8] sm:$0xff] }
0x146d   : > { %5341 = vmatpush2.msra.mxu1 %v6780_v52  ;;  %v6828_v52 = vld [vmem:[#allocation4 + $0x11a0] sm:$0xff] }
0x146e   : > { %5342 = vmatprep.subr.mxu1 %v6781_v53  ;;  %v6829_v53 = vld [vmem:[#allocation4 + $0x1198] sm:$0xff] }
0x146f   : > { %5343 = vmatpush2.msra.mxu1 %v6782_v36  ;;  %v6830_v36 = vld [vmem:[#allocation4 + $0x1190] sm:$0xff] }
0x1470   : > { %5344 = vmatprep.subr.mxu1 %v6783_v59  ;;  %v6831_v59 = vld [vmem:[#allocation4 + $0x1188] sm:$0xff] }
0x1471   : > { %5345 = vmatpush2.msra.mxu1 %v6784_v61  ;;  %v6832_v61 = vld [vmem:[#allocation4 + $0x1180] sm:$0xff] }
0x1472   : > { %5347 = vmatmul.mubr.f32.vlgmr.msra.gmra.mxu1 %v7528_v38 }
0x1473   : > { %5352 = vmatprep.mubr.f32.mxu1 %v7538_v45 }
0x1476   : > { %5353 = vmatmul.mubr.f32.gmra.mxu1 %v7534_v57 }
0x1477   : > { %5358 = vmatprep.mubr.f32.mxu1 %v7325_v62 }
0x147a   : > { %5359 = vmatmul.mubr.f32.gmra.mxu1 %v7327_v0 }
0x147b   : > { %5595 = vmatprep.mubr.f32.mxu1 %v7010_v4  ;;  %v6785_v4 = vld [vmem:[#allocation4 + $0x10f8] sm:$0xff] }
0x14f2   : > { %v5275_v47 = vpop.f32.mrf.mxu1 }
0x14f3   : > { %v7617_v2 = vadd.f32 %v5275_v47, %v7603_v37  ;;  %v6786_v37 = vld [vmem:[#allocation4 + $0x10f0] sm:$0xff]  ;;  %v6833_v47 = vld [vmem:[#allocation4 + $0x1178] sm:$0xff] }
0x14f4   : > { %v5277_v5 = vpop.f32.mrf.mxu1 }
0x14f5   : > { %v7620_v7 = vadd.f32 %v5277_v5, %v7606_v40  ;;  %v6787_v40 = vld [vmem:[#allocation4 + $0x10e8] sm:$0xff]  ;;  %v6834_v5 = vld [vmem:[#allocation4 + $0x1170] sm:$0xff] }
0x1532   : > { %v5348_v8 = vpop.f32.mrf.mxu1 }
0x1534   : > { %v5350_v9 = vpop.f32.mrf.mxu1 }
0x1536   : > { %v5354_v10 = vpop.f32.mrf.mxu1 }
0x1538   : > { %v5356_v11 = vpop.f32.mrf.mxu1 }
0x153a   : > { %v5360_v55 = vpop.f32.mrf.mxu1 }
0x153c   : > { %v5362_v58 = vpop.f32.mrf.mxu1 }
0x153d   : > { %5396 = vmatprep.subr.mxu0 %v5362_v58  ;;  %v6840_v58 = vld [vmem:[#allocation4 + $0x1140] sm:$0xff] }
0x153e   : > { %5397 = vmatpush1.msra.mxu0 %v5360_v55  ;;  %v6839_v55 = vld [vmem:[#allocation4 + $0x1148] sm:$0xff] }
0x153f   : > { %5398 = vmatprep.subr.mxu0 %v5356_v11  ;;  %v6838_v11 = vld [vmem:[#allocation4 + $0x1150] sm:$0xff] }
0x1540   : > { %5399 = vmatpush1.msra.mxu0 %v5354_v10  ;;  %v6837_v10 = vld [vmem:[#allocation4 + $0x1158] sm:$0xff] }
0x1541   : > { %5400 = vmatprep.subr.mxu0 %v5350_v9  ;;  %v6836_v9 = vld [vmem:[#allocation4 + $0x1160] sm:$0xff] }
0x1542   : > { %5401 = vmatpush1.msra.mxu0 %v5348_v8  ;;  %v6835_v8 = vld [vmem:[#allocation4 + $0x1168] sm:$0xff] }
0x1543   : > { %5836 = vmatmul.mubr.msk.f32.vlgmr.msra.gmra.mxu0 %vm4328_vm5, %v5366_v13  ;;  %5443 = vmatprep.subr.mxu0 %v6785_v4  ;;  %v6841_v13 = vld [vmem:[#allocation4 + $0x1138] sm:$0xff]  ;;  %v6842_v4 = vld [vmem:[#allocation4 + $0x1130] sm:$0xff] }
0x1544   : > { %5444 = vmatpush1.msra.mxu0 %v6786_v37  ;;  %5507 = vmatprep.mubr.f32.mxu0 %v7530_v54  ;;  %v6797_v54 = vld [vmem:[#allocation4 + $0x1098] sm:$0xff]  ;;  %v6843_v37 = vld [vmem:[#allocation4 + $0x1128] sm:$0xff] }
0x1545   : > { %5445 = vmatprep.subr.mxu0 %v6787_v40  ;;  %v6844_v40 = vld [vmem:[#allocation4 + $0x1120] sm:$0xff] }
0x1546   : > { %5446 = vmatpush1.msra.mxu0 %v6788_v14  ;;  %v6845_v14 = vld [vmem:[#allocation4 + $0x1118] sm:$0xff] }
0x1547   : > { %5447 = vmatprep.subr.mxu0 %v6789_v15  ;;  %v6846_v15 = vld [vmem:[#allocation4 + $0x1110] sm:$0xff] }
0x1548   : > { %5448 = vmatpush1.msra.mxu0 %v6790_v16  ;;  %v6847_v16 = vld [vmem:[#allocation4 + $0x1108] sm:$0xff] }
0x1549   : > { %5449 = vmatprep.subr.mxu0 %v6791_v17  ;;  %v6848_v17 = vld [vmem:[#allocation4 + $0x1100] sm:$0xff] }
0x154a   : > { %5450 = vmatpush1.msra.mxu0 %v6792_v26 }
0x154b   : > { %5451 = vmatprep.subr.mxu0 %v6793_v18 }
0x154c   : > { %5452 = vmatpush1.msra.mxu0 %v6794_v19 }
0x154d   : > { %5453 = vmatprep.subr.mxu0 %v6795_v20 }
0x154e   : > { %5454 = vmatpush1.msra.mxu0 %v6796_v21 }
0x154f   : > { %5455 = vmatprep.subr.mxu0 %v6797_v54 }
0x1550   : > { %5456 = vmatpush1.msra.mxu0 %v6798_v63 }
0x1551   : > { %5457 = vmatprep.subr.mxu0 %v6799_v3 }
0x1552   : > { %5458 = vmatpush1.msra.mxu0 %v6800_v6 }
0x1553   : > { %5459 = vmatprep.subr.mxu0 %v6801_v23 }
0x1554   : > { %5460 = vmatpush1.msra.mxu0 %v6802_v25 }
0x1555   : > { %5461 = vmatprep.subr.mxu0 %v6803_v27 }
0x1556   : > { %5462 = vmatpush1.msra.mxu0 %v6804_v28 }
0x1557   : > { %5463 = vmatprep.subr.mxu0 %v6805_v44 }
0x1558   : > { %5464 = vmatpush1.msra.mxu0 %v6806_v48 }
0x1559   : > { %5465 = vmatprep.subr.mxu0 %v6807_v60 }
0x155a   : > { %5466 = vmatpush1.msra.mxu0 %v6808_v1 }
0x155b   : > { %5467 = vmatprep.subr.mxu0 %v6809_v29 }
0x155c   : > { %5468 = vmatpush1.msra.mxu0 %v6810_v30 }
0x155d   : > { %5469 = vmatprep.subr.mxu0 %v6811_v31 }
0x155e   : > { %5470 = vmatpush1.msra.mxu0 %v6812_v32 }
0x155f   : > { %5471 = vmatprep.subr.mxu0 %v6813_v33 }
0x1560   : > { %5472 = vmatpush1.msra.mxu0 %v6814_v34 }
0x1561   : > { %5473 = vmatprep.subr.mxu0 %v6815_v35 }
0x1562   : > { %5474 = vmatpush1.msra.mxu0 %v6816_v39 }
0x1563   : > { %5475 = vmatprep.subr.mxu0 %v6817_v41 }
0x1564   : > { %5476 = vmatpush2.msra.mxu0 %v6818_v42 }
0x1565   : > { %5477 = vmatprep.subr.mxu0 %v6819_v56 }
0x1566   : > { %5478 = vmatpush2.msra.mxu0 %v6820_v43 }
0x1567   : > { %5479 = vmatprep.subr.mxu0 %v6821_v24 }
0x1568   : > { %5480 = vmatpush2.msra.mxu0 %v6822_v46 }
0x1569   : > { %5481 = vmatprep.subr.mxu0 %v6823_v49 }
0x156a   : > { %5482 = vmatpush2.msra.mxu0 %v6824_v12 }
0x156b   : > { %5483 = vmatprep.subr.mxu0 %v6825_v50 }
0x156c   : > { %5484 = vmatpush2.msra.mxu0 %v6826_v22 }
0x156d   : > { %5485 = vmatprep.subr.mxu0 %v6827_v51 }
0x156e   : > { %5486 = vmatpush2.msra.mxu0 %v6828_v52 }
0x156f   : > { %5487 = vmatprep.subr.mxu0 %v6829_v53 }
0x1570   : > { %5488 = vmatpush2.msra.mxu0 %v6830_v36 }
0x1571   : > { %5489 = vmatprep.subr.mxu0 %v6831_v59 }
0x1572   : > { %5490 = vmatpush2.msra.mxu0 %v6832_v61 }
0x1573   : > { %5491 = vmatprep.subr.mxu0 %v6833_v47 }
0x1574   : > { %5492 = vmatpush2.msra.mxu0 %v6834_v5 }
0x1575   : > { %5493 = vmatprep.subr.mxu0 %v6835_v8 }
0x1576   : > { %5494 = vmatpush2.msra.mxu0 %v6836_v9 }
0x1577   : > { %5495 = vmatprep.subr.mxu0 %v6837_v10 }
0x1578   : > { %5496 = vmatpush2.msra.mxu0 %v6838_v11 }
0x1579   : > { %5497 = vmatprep.subr.mxu0 %v6839_v55 }
0x157a   : > { %5498 = vmatpush2.msra.mxu0 %v6840_v58 }
0x157b   : > { %5499 = vmatprep.subr.mxu0 %v6841_v13 }
0x157c   : > { %5500 = vmatpush2.msra.mxu0 %v6842_v4 }
0x157d   : > { %5501 = vmatprep.subr.mxu0 %v6843_v37 }
0x157e   : > { %5502 = vmatpush2.msra.mxu0 %v6844_v40 }
0x157f   : > { %5503 = vmatprep.subr.mxu0 %v6845_v14 }
0x1580   : > { %5504 = vmatpush2.msra.mxu0 %v6846_v15 }
0x1581   : > { %5505 = vmatprep.subr.mxu0 %v6847_v16 }
0x1582   : > { %5506 = vmatpush2.msra.mxu0 %v6848_v17 }
0x1583   : > { %5508 = vmatmul.mubr.f32.vlgmr.msra.gmra.mxu0 %v7528_v38 }
0x1584   : > { %5513 = vmatprep.mubr.f32.mxu0 %v7538_v45 }
0x1587   : > { %5514 = vmatmul.mubr.f32.gmra.mxu0 %v7534_v57 }
0x1588   : > { %5519 = vmatprep.mubr.f32.mxu0 %v7325_v62  ;;  %v5527_v62 = vld [vmem:[#allocation2 + $0x10] sm:$0x3] }
0x158b   : > { %5520 = vmatmul.mubr.f32.gmra.mxu0 %v7327_v0 }
0x1603   : > { %v5436_v26 = vpop.f32.mrf.mxu0 }
0x1604   : > { %v5441_v18 = vadd.f32 %v5436_v26, %v7617_v2 }
0x1605   : > { %v5438_v19 = vpop.f32.mrf.mxu0 }
0x1606   : > { %v5442_v20 = vadd.f32 %v5438_v19, %v7620_v7  ;;  %v5608_v7 = vpop.permute.xlu1 %5607 }
0x1643   : > { %v5509_v21 = vpop.f32.mrf.mxu0 }
0x1645   : > { %v5511_v54 = vpop.f32.mrf.mxu0 }
0x1647   : > { %v5515_v63 = vpop.f32.mrf.mxu0 }
0x1649   : > { %v5517_v3 = vpop.f32.mrf.mxu0 }
0x164b   : > { %v5521_v6 = vpop.f32.mrf.mxu0 }
0x164d   : > { %v5523_v38 = vpop.f32.mrf.mxu0 }
0x164e   : > { %5557 = vmatprep.subr.mxu1 %v5523_v38 }
0x164f   : > { %5558 = vmatpush1.msra.mxu1 %v5521_v6 }
0x1650   : > { %5559 = vmatprep.subr.mxu1 %v5517_v3 }
0x1651   : > { %5560 = vmatpush1.msra.mxu1 %v5515_v63 }
0x1652   : > { %5561 = vmatprep.subr.mxu1 %v5511_v54 }
0x1653   : > { %5562 = vmatpush1.msra.mxu1 %v5509_v21 }
0x1654   : > { %5837 = vmatmul.mubr.msk.f32.vlgmr.msra.gmra.mxu1 %vm4328_vm5, %v5527_v62 }
0x1714   : > { %v5597_v0 = vpop.f32.mrf.mxu1 }
0x1715   : > { %v5602_v57 = vadd.f32 %v5597_v0, %v5441_v18 }
0x1716   : > { %v5599_v45 = vpop.f32.mrf.mxu1 }
0x1717   : > { %v5603_v2 = vadd.f32 %v5599_v45, %v5442_v20  ;;  %v5610_v23 = vadd.f32 %v5608_v7, %v5602_v57 }
0x1719   : > { %v5611_v25 = vadd.f32 %v5608_v7, %v5603_v2 }
0x171b   : > { %v5614_v27 = vcombine.low %v5610_v23, %v5611_v25 }
0x171d   : > { %5838 = vst.sshfl [vmem:[%s459_s30] sm:$0x33 pattern:$0x76325410] %v5614_v27 }
0x171e PF: > { %s24_s17 = sadd.s32 1, %s6997_s17  }
0x171f   : > { %p21_p3 = scmp.ge.s32.totalorder %s24_s17, 4  }
0x1721   :  { %23 = sbr.rel (!%p21_p3) target bundleno = 3 (0x3), region = 155 }
0x1726   :  { %5645 = vsyncpa [#allocation3], 1 }
0x1727   :  { %5647 = vsyncpa [#allocation3 + $0x1], 1 }
0x1728   :  { %5648 = vsyncpa [#allocation5], 1 }
0x1729   :  { %5649 = vsyncpa [#allocation8], 1 }

</bundles_post_ra>
